<compile_context>
chip_gen: v7x
topology: tpu7x:2x2x1
jax: 0.10.0
libtpu: 0.0.40
codegen_flags: <defaults>
</compile_context>

<pallas_src>
import jax
import jax.numpy as jnp
from jax.experimental import pallas as pl
from jax.experimental.pallas import tpu as pltpu


def _leaky_relu(x, slope=0.2):
    return jnp.where(x > 0, x, slope * x)


def _round_up(x, m):
    return (x + m - 1) // m * m


def discriminator_kernel(x_ref,
                         w1_ref, b1_ref,
                         w2_ref, b2_ref,
                         w3_ref, b3_ref,
                         w4_ref, b4_ref,
                         out_ref,
                         acc_ref):
    """One (batch-tile, layer-1 K-tile) grid step of the Discriminator MLP.

    Grid = (batch tiles ["parallel"], layer-1 K tiles ["arbitrary" reduction]).
    Layer 1 (D -> 1024) is accumulated over K tiles into an f32 VMEM scratch;
    on the last K tile the rest of the MLP (1024 -> 512 -> 256 -> 1) runs and
    the sigmoid probabilities are written.
    """
    k = pl.program_id(1)

    @pl.when(k == 0)
    def _init():
        # Start the accumulator at the layer-1 bias.
        acc_ref[...] = jnp.broadcast_to(b1_ref[...], acc_ref.shape)

    # Layer-1 partial product: bf16 x bf16 on the MXU, f32 accumulation.
    acc_ref[...] += jnp.dot(x_ref[...].astype(jnp.bfloat16), w1_ref[...],
                            preferred_element_type=jnp.float32)

    @pl.when(k == pl.num_programs(1) - 1)
    def _finish():
        h = _leaky_relu(acc_ref[...])          # Dropout(0.3) -> identity (eval)

        h = jnp.dot(h.astype(jnp.bfloat16), w2_ref[...],
                    preferred_element_type=jnp.float32) + b2_ref[...]
        h = _leaky_relu(h)                     # Dropout(0.3) -> identity (eval)

        h = jnp.dot(h.astype(jnp.bfloat16), w3_ref[...],
                    preferred_element_type=jnp.float32) + b3_ref[...]
        h = _leaky_relu(h)                     # Dropout(0.3) -> identity (eval)

        # Final layer (256 -> 1): VPU multiply + lane reduce instead of a
        # degenerate N=1 MXU pass.
        logits = jnp.sum(h * w4_ref[...].astype(jnp.float32),
                         axis=-1, keepdims=True) + b4_ref[...]
        out_ref[...] = jax.nn.sigmoid(logits)


def init_params(key, image_size, channels):
    """PyTorch nn.Linear default init: U(-1/sqrt(fan_in), 1/sqrt(fan_in)).

    Weights are stored in bf16 (halves the HBM->VMEM weight traffic, which is
    the binding resource); biases stay f32.
    """
    d_in = image_size * image_size * channels
    dims = [d_in, 1024, 512, 256, 1]
    params = []
    for i in range(4):
        fan_in, fan_out = dims[i], dims[i + 1]
        key, kw, kb = jax.random.split(key, 3)
        bound = 1.0 / (fan_in ** 0.5)
        w = jax.random.uniform(kw, (fan_in, fan_out), jnp.float32, -bound, bound)
        b = jax.random.uniform(kb, (1, fan_out), jnp.float32, -bound, bound)
        params += [w.astype(jnp.bfloat16), b]
    return params


def discriminator_forward(x_nchw, params, image_size, channels):
    b = x_nchw.shape[0]
    d = image_size * image_size * channels
    x_flat = x_nchw.reshape(b, d).astype(jnp.float32)     # == x.view(-1, D)

    w1, b1, w2, b2, w3, b3, w4, b4 = params
    w4_row = w4.reshape(1, 256)                           # (256,1) -> (1,256) row

    # Batch tiling: pad to >= 8 sublanes; 128-row tiles for large batches.
    tb = 128 if b >= 128 else max(8, _round_up(b, 8))
    b_pad = _round_up(b, tb)

    # Layer-1 K tiling so a large D never needs a single oversized W1 block.
    tk = 2048 if d > 4096 else _round_up(d, 128)
    d_pad = _round_up(d, tk)
    nk = d_pad // tk

    if b_pad != b or d_pad != d:
        x_flat = jnp.pad(x_flat, ((0, b_pad - b), (0, d_pad - d)))
    if d_pad != d:
        w1 = jnp.pad(w1, ((0, d_pad - d), (0, 0)))        # zero rows: exact

    grid = (b_pad // tb, nk)

    in_specs = [
        pl.BlockSpec((tb, tk), lambda i, k: (i, k)),      # x
        pl.BlockSpec((tk, 1024), lambda i, k: (k, 0)),    # w1 (bf16)
        pl.BlockSpec((1, 1024), lambda i, k: (0, 0)),     # b1
        pl.BlockSpec((1024, 512), lambda i, k: (0, 0)),   # w2 (bf16)
        pl.BlockSpec((1, 512), lambda i, k: (0, 0)),      # b2
        pl.BlockSpec((512, 256), lambda i, k: (0, 0)),    # w3 (bf16)
        pl.BlockSpec((1, 256), lambda i, k: (0, 0)),      # b3
        pl.BlockSpec((1, 256), lambda i, k: (0, 0)),      # w4 row (bf16)
        pl.BlockSpec((1, 1), lambda i, k: (0, 0)),        # b4
    ]
    out_spec = pl.BlockSpec((tb, 1), lambda i, k: (i, 0))

    weight_bytes = (d_pad * 1024 + 1024 * 512 + 512 * 256 + 256) * 2  # bf16
    bias_bytes = (1024 + 512 + 256 + 1) * 4
    cost = pl.CostEstimate(
        flops=2 * b_pad * (d_pad * 1024 + 1024 * 512 + 512 * 256 + 256),
        transcendentals=b_pad,                             # sigmoid
        bytes_accessed=weight_bytes + bias_bytes + b_pad * d_pad * 4 + b_pad * 4,
    )

    out = pl.pallas_call(
        discriminator_kernel,
        out_shape=jax.ShapeDtypeStruct((b_pad, 1), jnp.float32),
        grid_spec=pltpu.PrefetchScalarGridSpec(
            num_scalar_prefetch=0,
            grid=grid,
            in_specs=in_specs,
            out_specs=out_spec,
            scratch_shapes=[pltpu.VMEM((tb, 1024), jnp.float32)],
        ),
        compiler_params=pltpu.CompilerParams(
            dimension_semantics=("parallel", "arbitrary"),
            vmem_limit_bytes=24 << 20,   # ~2x footprint; safe on v7x (64 MiB VMEM)
        ),
        cost_estimate=cost,
    )(x_flat, w1, b1, w2, b2, w3, b3, w4_row, b4)

    return out[:b]


def _reference_forward(x_nchw, params, image_size, channels):
    """Pure-JAX reference with the same bf16-weight / f32-accumulate recipe."""
    b = x_nchw.shape[0]
    d = image_size * image_size * channels
    x = x_nchw.reshape(b, d).astype(jnp.float32)
    w1, b1, w2, b2, w3, b3, w4, b4 = params
    h = _leaky_relu(jnp.dot(x.astype(jnp.bfloat16), w1,
                            preferred_element_type=jnp.float32) + b1)
    h = _leaky_relu(jnp.dot(h.astype(jnp.bfloat16), w2,
                            preferred_element_type=jnp.float32) + b2)
    h = _leaky_relu(jnp.dot(h.astype(jnp.bfloat16), w3,
                            preferred_element_type=jnp.float32) + b3)
    logits = jnp.dot(h.astype(jnp.bfloat16), w4,
                     preferred_element_type=jnp.float32) + b4
    return jax.nn.sigmoid(logits)


if __name__ == "__main__":
    image_size = 16
    channels = 4
    batch = 2

    key = jax.random.PRNGKey(0)
    key, kx = jax.random.split(key)
    x = jax.random.normal(kx, (batch, channels, image_size, image_size),
                          dtype=jnp.float32)

    params = init_params(key, image_size, channels)

    out = discriminator_forward(x, params, image_size, channels)
    out = jax.block_until_ready(out)

    ref = jax.block_until_ready(
        _reference_forward(x, params, image_size, channels))

    assert out.shape == (batch, 1)
    assert bool(jnp.all((out >= 0.0) & (out <= 1.0)))
    assert bool(jnp.allclose(out, ref, atol=1e-2)), (out, ref)
    print("KERNEL_OK")
</pallas_src>

<mosaic_0001>
module attributes {stable_mosaic.version = 11 : i64} {
  func.func @discriminator_kernel(%arg0: i32, %arg1: i32, %arg2: memref<8x1024xf32, #tpu.memory_space<vmem>>, %arg3: memref<1024x1024xbf16, #tpu.memory_space<vmem>>, %arg4: memref<1x1024xf32, #tpu.memory_space<vmem>>, %arg5: memref<1024x512xbf16, #tpu.memory_space<vmem>>, %arg6: memref<1x512xf32, #tpu.memory_space<vmem>>, %arg7: memref<512x256xbf16, #tpu.memory_space<vmem>>, %arg8: memref<1x256xf32, #tpu.memory_space<vmem>>, %arg9: memref<1x256xbf16, #tpu.memory_space<vmem>>, %arg10: memref<1x1xf32, #tpu.memory_space<vmem>>, %arg11: memref<8x1xf32, #tpu.memory_space<vmem>>, %arg12: memref<8x1024xf32, #tpu.memory_space<vmem>>) attributes {dimension_semantics = [#tpu.dimension_semantics<parallel>, #tpu.dimension_semantics<arbitrary>], iteration_bounds = array<i64: 1, 1>, scalar_prefetch = 0 : i64, scratch_operands = 1 : i64, tpu.core_type = #tpu.core_type<tc>, window_params = [{transform_indices = @transform_0, window_bounds = array<i64: 8, 1024>}, {transform_indices = @transform_1, window_bounds = array<i64: 1024, 1024>}, {pipeline_mode = #tpu.pipeline_mode<synchronous>, transform_indices = @transform_2, window_bounds = array<i64: 1, 1024>}, {pipeline_mode = #tpu.pipeline_mode<synchronous>, transform_indices = @transform_3, window_bounds = array<i64: 1024, 512>}, {pipeline_mode = #tpu.pipeline_mode<synchronous>, transform_indices = @transform_4, window_bounds = array<i64: 1, 512>}, {pipeline_mode = #tpu.pipeline_mode<synchronous>, transform_indices = @transform_5, window_bounds = array<i64: 512, 256>}, {pipeline_mode = #tpu.pipeline_mode<synchronous>, transform_indices = @transform_6, window_bounds = array<i64: 1, 256>}, {pipeline_mode = #tpu.pipeline_mode<synchronous>, transform_indices = @transform_7, window_bounds = array<i64: 1, 256>}, {pipeline_mode = #tpu.pipeline_mode<synchronous>, transform_indices = @transform_8, window_bounds = array<i64: 1, 1>}, {transform_indices = @transform_9, window_bounds = array<i64: 8, 1>}]} {
    %c0_i32 = arith.constant 0 : i32
    %0 = arith.cmpi eq, %arg1, %c0_i32 : i32
    %1 = arith.extui %0 : i1 to i32
    %c0_i32_0 = arith.constant 0 : i32
    %2 = arith.cmpi ne, %1, %c0_i32_0 : i32
    scf.if %2 {
      %c0_10 = arith.constant 0 : index
      %c0_11 = arith.constant 0 : index
      %13 = vector.load %arg4[%c0_10, %c0_11] : memref<1x1024xf32, #tpu.memory_space<vmem>>, vector<1x1024xf32>
      %14 = vector.shape_cast %13 : vector<1x1024xf32> to vector<1x1024xf32>
      %15 = vector.broadcast %14 : vector<1x1024xf32> to vector<8x1024xf32>
      %c0_12 = arith.constant 0 : index
      %c0_13 = arith.constant 0 : index
      %16 = vector.load %arg12[%c0_12, %c0_13] : memref<8x1024xf32, #tpu.memory_space<vmem>>, vector<8x1024xf32>
      tpu.vector_store %arg12[%c0_12, %c0_13], %15 {strides = array<i32>} : memref<8x1024xf32, #tpu.memory_space<vmem>>, vector<8x1024xf32>,
    } else {
    }
    %c0 = arith.constant 0 : index
    %c0_1 = arith.constant 0 : index
    %3 = vector.load %arg12[%c0, %c0_1] : memref<8x1024xf32, #tpu.memory_space<vmem>>, vector<8x1024xf32>
    %c0_2 = arith.constant 0 : index
    %c0_3 = arith.constant 0 : index
    %4 = vector.load %arg2[%c0_2, %c0_3] : memref<8x1024xf32, #tpu.memory_space<vmem>>, vector<8x1024xf32>
    %5 = arith.truncf %4 : vector<8x1024xf32> to vector<8x1024xbf16>
    %c0_4 = arith.constant 0 : index
    %c0_5 = arith.constant 0 : index
    %6 = vector.load %arg3[%c0_4, %c0_5] : memref<1024x1024xbf16, #tpu.memory_space<vmem>>, vector<1024x1024xbf16>
    %cst = arith.constant dense<0.000000e+00> : vector<8x1024xf32>
    %7 = tpu.matmul %5, %6, %cst {dimension_numbers = #tpu.dot_dimension_numbers<[1], [0], [0], [1], [0, 0, 1, 1], [], []>} : vector<8x1024xbf16>, vector<1024x1024xbf16>, vector<8x1024xf32> -> vector<8x1024xf32>
    %8 = arith.addf %3, %7 : vector<8x1024xf32>
    %c0_6 = arith.constant 0 : index
    %c0_7 = arith.constant 0 : index
    %9 = vector.load %arg12[%c0_6, %c0_7] : memref<8x1024xf32, #tpu.memory_space<vmem>>, vector<8x1024xf32>
    tpu.vector_store %arg12[%c0_6, %c0_7], %8 {strides = array<i32>} : memref<8x1024xf32, #tpu.memory_space<vmem>>, vector<8x1024xf32>,
    %c0_i32_8 = arith.constant 0 : i32
    %10 = arith.cmpi eq, %arg1, %c0_i32_8 : i32
    %11 = arith.extui %10 : i1 to i32
    %c0_i32_9 = arith.constant 0 : i32
    %12 = arith.cmpi ne, %11, %c0_i32_9 : i32
    scf.if %12 {
      %c0_10 = arith.constant 0 : index
      %c0_11 = arith.constant 0 : index
      %13 = vector.load %arg12[%c0_10, %c0_11] : memref<8x1024xf32, #tpu.memory_space<vmem>>, vector<8x1024xf32>
      %cst_12 = arith.constant 0.000000e+00 : f32
      %14 = vector.broadcast %cst_12 : f32 to vector<8x1024xf32>
      %15 = arith.cmpf ogt, %13, %14 : vector<8x1024xf32>
      %cst_13 = arith.constant 2.000000e-01 : f32
      %16 = vector.broadcast %cst_13 : f32 to vector<8x1024xf32>
      %17 = arith.mulf %16, %13 : vector<8x1024xf32>
      %18 = arith.select %15, %13, %17 : vector<8x1024xi1>, vector<8x1024xf32>
      %19 = arith.truncf %18 : vector<8x1024xf32> to vector<8x1024xbf16>
      %c0_14 = arith.constant 0 : index
      %c0_15 = arith.constant 0 : index
      %20 = vector.load %arg5[%c0_14, %c0_15] : memref<1024x512xbf16, #tpu.memory_space<vmem>>, vector<1024x512xbf16>
      %cst_16 = arith.constant dense<0.000000e+00> : vector<8x512xf32>
      %21 = tpu.matmul %19, %20, %cst_16 {dimension_numbers = #tpu.dot_dimension_numbers<[1], [0], [0], [1], [0, 0, 1, 1], [], []>} : vector<8x1024xbf16>, vector<1024x512xbf16>, vector<8x512xf32> -> vector<8x512xf32>
      %c0_17 = arith.constant 0 : index
      %c0_18 = arith.constant 0 : index
      %22 = vector.load %arg6[%c0_17, %c0_18] : memref<1x512xf32, #tpu.memory_space<vmem>>, vector<1x512xf32>
      %23 = vector.broadcast %22 : vector<1x512xf32> to vector<8x512xf32>
      %24 = arith.addf %21, %23 : vector<8x512xf32>
      %cst_19 = arith.constant 0.000000e+00 : f32
      %25 = vector.broadcast %cst_19 : f32 to vector<8x512xf32>
      %26 = arith.cmpf ogt, %24, %25 : vector<8x512xf32>
      %cst_20 = arith.constant 2.000000e-01 : f32
      %27 = vector.broadcast %cst_20 : f32 to vector<8x512xf32>
      %28 = arith.mulf %27, %24 : vector<8x512xf32>
      %29 = arith.select %26, %24, %28 : vector<8x512xi1>, vector<8x512xf32>
      %30 = arith.truncf %29 : vector<8x512xf32> to vector<8x512xbf16>
      %c0_21 = arith.constant 0 : index
      %c0_22 = arith.constant 0 : index
      %31 = vector.load %arg7[%c0_21, %c0_22] : memref<512x256xbf16, #tpu.memory_space<vmem>>, vector<512x256xbf16>
      %cst_23 = arith.constant dense<0.000000e+00> : vector<8x256xf32>
      %32 = tpu.matmul %30, %31, %cst_23 {dimension_numbers = #tpu.dot_dimension_numbers<[1], [0], [0], [1], [0, 0, 1, 1], [], []>} : vector<8x512xbf16>, vector<512x256xbf16>, vector<8x256xf32> -> vector<8x256xf32>
      %c0_24 = arith.constant 0 : index
      %c0_25 = arith.constant 0 : index
      %33 = vector.load %arg8[%c0_24, %c0_25] : memref<1x256xf32, #tpu.memory_space<vmem>>, vector<1x256xf32>
      %34 = vector.broadcast %33 : vector<1x256xf32> to vector<8x256xf32>
      %35 = arith.addf %32, %34 : vector<8x256xf32>
      %cst_26 = arith.constant 0.000000e+00 : f32
      %36 = vector.broadcast %cst_26 : f32 to vector<8x256xf32>
      %37 = arith.cmpf ogt, %35, %36 : vector<8x256xf32>
      %cst_27 = arith.constant 2.000000e-01 : f32
      %38 = vector.broadcast %cst_27 : f32 to vector<8x256xf32>
      %39 = arith.mulf %38, %35 : vector<8x256xf32>
      %40 = arith.select %37, %35, %39 : vector<8x256xi1>, vector<8x256xf32>
      %c0_28 = arith.constant 0 : index
      %c0_29 = arith.constant 0 : index
      %41 = vector.load %arg9[%c0_28, %c0_29] : memref<1x256xbf16, #tpu.memory_space<vmem>>, vector<1x256xbf16>
      %42 = arith.extf %41 : vector<1x256xbf16> to vector<1x256xf32>
      %43 = vector.broadcast %42 : vector<1x256xf32> to vector<8x256xf32>
      %44 = arith.mulf %40, %43 : vector<8x256xf32>
      %cst_30 = arith.constant dense<0.000000e+00> : vector<8xf32>
      %45 = vector.multi_reduction <add>, %44, %cst_30 [1] : vector<8x256xf32> to vector<8xf32>
      %46 = vector.shape_cast %45 : vector<8xf32> to vector<8x1xf32>
      %c0_31 = arith.constant 0 : index
      %c0_32 = arith.constant 0 : index
      %47 = vector.load %arg10[%c0_31, %c0_32] : memref<1x1xf32, #tpu.memory_space<vmem>>, vector<1x1xf32>
      %48 = vector.broadcast %47 : vector<1x1xf32> to vector<8x1xf32>
      %49 = arith.addf %46, %48 : vector<8x1xf32>
      %50 = arith.negf %49 : vector<8x1xf32>
      %51 = math.exp %50 : vector<8x1xf32>
      %cst_33 = arith.constant 1.000000e+00 : f32
      %52 = vector.broadcast %cst_33 : f32 to vector<8x1xf32>
      %53 = arith.addf %52, %51 : vector<8x1xf32>
      %54 = arith.divf %52, %53 : vector<8x1xf32>
      %c0_34 = arith.constant 0 : index
      %c0_35 = arith.constant 0 : index
      %55 = vector.load %arg11[%c0_34, %c0_35] : memref<8x1xf32, #tpu.memory_space<vmem>>, vector<8x1xf32>
      tpu.vector_store %arg11[%c0_34, %c0_35], %54 {strides = array<i32>} : memref<8x1xf32, #tpu.memory_space<vmem>>, vector<8x1xf32>,
    } else {
    }
    return
  }
  func.func @transform_0(%arg0: i32, %arg1: i32) -> (i32, i32) {
    %c0_i32 = arith.constant 0 : i32
    return %arg0, %arg1 : i32, i32
  }
  func.func @transform_1(%arg0: i32, %arg1: i32) -> (i32, i32) {
    %c0_i32 = arith.constant 0 : i32
    %c0_i32_0 = arith.constant 0 : i32
    return %arg1, %c0_i32 : i32, i32
  }
  func.func @transform_2(%arg0: i32, %arg1: i32) -> (i32, i32) {
    %c0_i32 = arith.constant 0 : i32
    %c0_i32_0 = arith.constant 0 : i32
    %c0_i32_1 = arith.constant 0 : i32
    return %c0_i32, %c0_i32_0 : i32, i32
  }
  func.func @transform_3(%arg0: i32, %arg1: i32) -> (i32, i32) {
    %c0_i32 = arith.constant 0 : i32
    %c0_i32_0 = arith.constant 0 : i32
    %c0_i32_1 = arith.constant 0 : i32
    return %c0_i32, %c0_i32_0 : i32, i32
  }
  func.func @transform_4(%arg0: i32, %arg1: i32) -> (i32, i32) {
    %c0_i32 = arith.constant 0 : i32
    %c0_i32_0 = arith.constant 0 : i32
    %c0_i32_1 = arith.constant 0 : i32
    return %c0_i32, %c0_i32_0 : i32, i32
  }
  func.func @transform_5(%arg0: i32, %arg1: i32) -> (i32, i32) {
    %c0_i32 = arith.constant 0 : i32
    %c0_i32_0 = arith.constant 0 : i32
    %c0_i32_1 = arith.constant 0 : i32
    return %c0_i32, %c0_i32_0 : i32, i32
  }
  func.func @transform_6(%arg0: i32, %arg1: i32) -> (i32, i32) {
    %c0_i32 = arith.constant 0 : i32
    %c0_i32_0 = arith.constant 0 : i32
    %c0_i32_1 = arith.constant 0 : i32
    return %c0_i32, %c0_i32_0 : i32, i32
  }
  func.func @transform_7(%arg0: i32, %arg1: i32) -> (i32, i32) {
    %c0_i32 = arith.constant 0 : i32
    %c0_i32_0 = arith.constant 0 : i32
    %c0_i32_1 = arith.constant 0 : i32
    return %c0_i32, %c0_i32_0 : i32, i32
  }
  func.func @transform_8(%arg0: i32, %arg1: i32) -> (i32, i32) {
    %c0_i32 = arith.constant 0 : i32
    %c0_i32_0 = arith.constant 0 : i32
    %c0_i32_1 = arith.constant 0 : i32
    return %c0_i32, %c0_i32_0 : i32, i32
  }
  func.func @transform_9(%arg0: i32, %arg1: i32) -> (i32, i32) {
    %c0_i32 = arith.constant 0 : i32
    %c0_i32_0 = arith.constant 0 : i32
    return %arg0, %c0_i32 : i32, i32
  }
}

</mosaic_0001>

<bundles_post_ra>
// kernel: tpu_custom_call.1
= control target key start
LH: loop header
LB: loop body
LE: loop exit
PB: predicated region body
PF: predicated region fallthrough
CT: control target
= control target key end

     0   :  { %s8361_s0 = inlined_call_operand.hbm [shape: f32[8,1024], index: 0, kind: input, shape index: {}]   ;;  %s8362_s1 = inlined_call_operand.hbm [shape: bf16[1024,1024], index: 1, kind: input, shape index: {}]   ;;  %s8363_s2 = inlined_call_operand.hbm [shape: f32[1,1024], index: 2, kind: input, shape index: {}]   ;;  %s8364_s3 = inlined_call_operand.hbm [shape: bf16[1024,512], index: 3, kind: input, shape index: {}]   ;;  %s8365_s4 = inlined_call_operand.hbm [shape: f32[1,512], index: 4, kind: input, shape index: {}]   ;;  %s8366_s5 = inlined_call_operand.hbm [shape: bf16[512,256], index: 5, kind: input, shape index: {}]   ;;  %s8367_s6 = inlined_call_operand.hbm [shape: f32[1,256], index: 6, kind: input, shape index: {}]   ;;  %s8368_s7 = inlined_call_operand.hbm [shape: bf16[1,256], index: 7, kind: input, shape index: {}]   ;;  %s8369_s8 = inlined_call_operand.<no memory space> [shape: f32[1,1], index: 8, kind: input, shape index: {}]   ;;  %s8370_s9 = inlined_call_operand.vmem [shape: f32[8,1], index: 9, kind: output, shape index: {}]  }
   0x1   :  { %v14_v0 = vstv %s8369_s8 }
   0x2   :  { %15 = vst [vmem:[#allocation3] sm:$0x1] %v14_v0 }
   0x3   :  { %16 = vsyncpa [#allocation5], 0 }
   0x4   :  { %17 = vsyncpa [#allocation7], 0 }
   0x5   :  { %18 = vsyncpa [#allocation10], 0 }
   0x6   :  { %19 = vsyncpa [#allocation13], 0 }
   0x7   :  { %20 = vsyncpa [#allocation16], 0  ;;  %s7988_s11 = smov [#allocation6]   ;;  %s7802_s15 = scalar_lea.hbm %s8362_s1, 65536 }
   0x8   :  { %s36_s12 = sshll.u32 %s7988_s11, 4  ;;  %p7803_p0 = scmp.ne.s32.totalorder %s8362_s1, %s7802_s15  ;;  %s37_s12 = int_to_ptr.vmem [resolvable:$true] %s36_s12 }
   0x9   :  { %p7806_p1 = scmp.lt.u32.totalorder %s7802_s15, %s8362_s1 }
   0xb   :  { %p7808_p2 = pnand %p7806_p1, %p7803_p0 }
   0xd   :  { %7811 = shalt.err (!%p7808_p2)
}
   0xe   :  { %s7812_s8 = scalar_lea.vmem %s37_s12, 65536  ;;  %p7817_p4 = scmp.lt.s32.totalorder %s37_s12, %s37_s12 }
   0xf   :  { %p7813_p3 = scmp.ne.s32.totalorder %s37_s12, %s7812_s8  ;;  %p7818_p5 = scmp.lt.s32.totalorder %s7812_s8, %s7812_s8 }
  0x11   :  { %p7819_p6 = por %p7818_p5, %p7817_p4 }
  0x13   :  { %p7820_p7 = pnand %p7819_p6, %p7813_p3 }
  0x15   :  { %7823 = shalt.err (!%p7820_p7)
}
  0x16   :  { %s7989_s20 = smov 512   ;;  %s7990_s21 = smov 32  }
  0x17   :  { %42 = dma.hbm_to_vmem [thread:$0]  %s8362_s1, 65536, %s37_s12, [#allocation7], %s7989_s20, %s7989_s20, %s7990_s21  }
  0x18   :  { %s7991_s24 = smov [#allocation9]   ;;  %s7824_s28 = scalar_lea.hbm %s8364_s3, 32768 }
  0x19   :  { %s58_s25 = sshll.u32 %s7991_s24, 4  ;;  %p7825_p8 = scmp.ne.s32.totalorder %s8364_s3, %s7824_s28  ;;  %s59_s25 = int_to_ptr.vmem [resolvable:$true] %s58_s25 }
  0x1a   :  { %p7828_p9 = scmp.lt.u32.totalorder %s7824_s28, %s8364_s3 }
  0x1c   :  { %p7830_p10 = pnand %p7828_p9, %p7825_p8 }
  0x1e   :  { %7833 = shalt.err (!%p7830_p10)
}
  0x1f   :  { %s7834_s13 = scalar_lea.vmem %s59_s25, 32768  ;;  %p7839_p12 = scmp.lt.s32.totalorder %s59_s25, %s59_s25 }
  0x20   :  { %p7835_p11 = scmp.ne.s32.totalorder %s59_s25, %s7834_s13  ;;  %p7840_p13 = scmp.lt.s32.totalorder %s7834_s13, %s7834_s13 }
  0x22   :  { %p7841_p0 = por %p7840_p13, %p7839_p12 }
  0x24   :  { %p7842_p1 = pnand %p7841_p0, %p7835_p11 }
  0x26   :  { %7845 = shalt.err (!%p7842_p1)
}
  0x27   :  { %s7992_s1 = smov 256   ;;  %s7993_s12 = smov 16  }
  0x28   :  { %64 = dma.hbm_to_vmem [thread:$0]  %s8364_s3, 32768, %s59_s25, [#allocation10], %s7992_s1, %s7992_s1, %s7993_s12  }
  0x29   :  { %s7994_s16 = smov [#allocation12]   ;;  %s7846_s8 = scalar_lea.hbm %s8366_s5, 8192 }
  0x2a   :  { %s80_s17 = sshll.u32 %s7994_s16, 4  ;;  %p7847_p2 = scmp.ne.s32.totalorder %s8366_s5, %s7846_s8  ;;  %s81_s17 = int_to_ptr.vmem [resolvable:$true] %s80_s17 }
  0x2b   :  { %p7850_p3 = scmp.lt.u32.totalorder %s7846_s8, %s8366_s5 }
  0x2d   :  { %p7852_p4 = pnand %p7850_p3, %p7847_p2 }
  0x2f   :  { %7855 = shalt.err (!%p7852_p4)
}
  0x30   :  { %s7856_s24 = scalar_lea.vmem %s81_s17, 8192  ;;  %p7861_p6 = scmp.lt.s32.totalorder %s81_s17, %s81_s17 }
  0x31   :  { %p7857_p5 = scmp.ne.s32.totalorder %s81_s17, %s7856_s24  ;;  %p7862_p7 = scmp.lt.s32.totalorder %s7856_s24, %s7856_s24 }
  0x33   :  { %p7863_p8 = por %p7862_p7, %p7861_p6 }
  0x35   :  { %p7864_p9 = pnand %p7863_p8, %p7857_p5 }
  0x37   :  { %7867 = shalt.err (!%p7864_p9)
}
  0x38   :  { %s7995_s3 = smov 128   ;;  %s7996_s25 = smov 8  }
  0x39   :  { %86 = dma.hbm_to_vmem [thread:$0]  %s8366_s5, 8192, %s81_s17, [#allocation13], %s7995_s3, %s7995_s3, %s7996_s25  }
  0x3a   :  { %s7997_s28 = smov [#allocation4]   ;;  %s7998_s30 = smov [#allocation8]  }
  0x3b   :  { %s27_s29 = sshll.u32 %s7997_s28, 4  ;;  %s49_s10 = sshll.u32 %s7998_s30, 4  ;;  %s28_s29 = int_to_ptr.vmem [resolvable:$true] %s27_s29  ;;  %s50_s10 = int_to_ptr.vmem [resolvable:$true] %s49_s10 }
  0x3c   :  { %s7868_s1 = scalar_lea.hbm %s8361_s0, 1024 }
  0x3d   :  { %p7869_p10 = scmp.ne.s32.totalorder %s8361_s0, %s7868_s1  ;;  %p7872_p11 = scmp.lt.u32.totalorder %s7868_s1, %s8361_s0 }
  0x3f   :  { %p7874_p12 = pnand %p7872_p11, %p7869_p10 }
  0x41   :  { %7877 = shalt.err (!%p7874_p12)
}
  0x42   :  { %s7878_s5 = scalar_lea.vmem %s28_s29, 1024  ;;  %p7883_p0 = scmp.lt.s32.totalorder %s28_s29, %s28_s29 }
  0x43   :  { %p7879_p13 = scmp.ne.s32.totalorder %s28_s29, %s7878_s5  ;;  %p7884_p1 = scmp.lt.s32.totalorder %s7878_s5, %s7878_s5 }
  0x45   :  { %p7885_p2 = por %p7884_p1, %p7883_p0 }
  0x47   :  { %p7886_p3 = pnand %p7885_p2, %p7879_p13 }
  0x49   :  { %7889 = shalt.err (!%p7886_p3)
}
  0x4a   :  { %30 = dma.hbm_to_vmem [thread:$0]  %s8361_s0, 1024, %s28_s29, [#allocation5]  }
  0x4b   :  { %s7890_s20 = scalar_lea.hbm %s8363_s2, 128 }
  0x4c   :  { %p7891_p4 = scmp.ne.s32.totalorder %s8363_s2, %s7890_s20  ;;  %p7894_p5 = scmp.lt.u32.totalorder %s7890_s20, %s8363_s2 }
  0x4e   :  { %p7896_p6 = pnand %p7894_p5, %p7891_p4 }
  0x50   :  { %7899 = shalt.err (!%p7896_p6)
}
  0x51   :  { %s7900_s3 = scalar_lea.vmem %s50_s10, 128  ;;  %p7905_p8 = scmp.lt.s32.totalorder %s50_s10, %s50_s10 }
  0x52   :  { %p7901_p7 = scmp.ne.s32.totalorder %s50_s10, %s7900_s3  ;;  %p7906_p9 = scmp.lt.s32.totalorder %s7900_s3, %s7900_s3 }
  0x54   :  { %p7907_p10 = por %p7906_p9, %p7905_p8 }
  0x56   :  { %p7908_p11 = pnand %p7907_p10, %p7901_p7 }
  0x58   :  { %7911 = shalt.err (!%p7908_p11)
}
  0x59   :  { %52 = dma.hbm_to_vmem [thread:$0]  %s8363_s2, 128, %s50_s10, [#allocation7]  }
  0x5a   :  { %s7999_s26 = smov [#allocation11]   ;;  %s8000_s28 = smov [#allocation14]  }
  0x5b   :  { %s71_s27 = sshll.u32 %s7999_s26, 4  ;;  %s93_s29 = sshll.u32 %s8000_s28, 4  ;;  %s72_s27 = int_to_ptr.vmem [resolvable:$true] %s71_s27  ;;  %s94_s29 = int_to_ptr.vmem [resolvable:$true] %s93_s29 }
  0x5c   :  { %s7912_s13 = scalar_lea.hbm %s8365_s4, 64 }
  0x5d   :  { %p7913_p12 = scmp.ne.s32.totalorder %s8365_s4, %s7912_s13  ;;  %p7916_p13 = scmp.lt.u32.totalorder %s7912_s13, %s8365_s4 }
  0x5f   :  { %p7918_p0 = pnand %p7916_p13, %p7913_p12 }
  0x61   :  { %7921 = shalt.err (!%p7918_p0)
}
  0x62   :  { %s7922_s2 = scalar_lea.vmem %s72_s27, 64  ;;  %p7927_p2 = scmp.lt.s32.totalorder %s72_s27, %s72_s27 }
  0x63   :  { %p7923_p1 = scmp.ne.s32.totalorder %s72_s27, %s7922_s2  ;;  %p7928_p3 = scmp.lt.s32.totalorder %s7922_s2, %s7922_s2 }
  0x65   :  { %p7929_p4 = por %p7928_p3, %p7927_p2 }
  0x67   :  { %p7930_p5 = pnand %p7929_p4, %p7923_p1 }
  0x69   :  { %7933 = shalt.err (!%p7930_p5)
}
  0x6a   :  { %74 = dma.hbm_to_vmem [thread:$0]  %s8365_s4, 64, %s72_s27, [#allocation10]  }
  0x6b   :  { %s7934_s18 = scalar_lea.hbm %s8367_s6, 32 }
  0x6c   :  { %p7935_p6 = scmp.ne.s32.totalorder %s8367_s6, %s7934_s18  ;;  %p7938_p7 = scmp.lt.u32.totalorder %s7934_s18, %s8367_s6 }
  0x6e   :  { %p7940_p8 = pnand %p7938_p7, %p7935_p6 }
  0x70   :  { %7943 = shalt.err (!%p7940_p8)
}
  0x71   :  { %s7944_s22 = scalar_lea.vmem %s94_s29, 32  ;;  %p7949_p10 = scmp.lt.s32.totalorder %s94_s29, %s94_s29 }
  0x72   :  { %p7945_p9 = scmp.ne.s32.totalorder %s94_s29, %s7944_s22  ;;  %p7950_p11 = scmp.lt.s32.totalorder %s7944_s22, %s7944_s22 }
  0x74   :  { %p7951_p12 = por %p7950_p11, %p7949_p10 }
  0x76   :  { %p7952_p13 = pnand %p7951_p12, %p7945_p9 }
  0x78   :  { %7955 = shalt.err (!%p7952_p13)
}
  0x79   :  { %96 = dma.hbm_to_vmem [thread:$0]  %s8367_s6, 32, %s94_s29, [#allocation13]  }
  0x7a   :  { %s8001_s24 = smov [#allocation15]   ;;  %s7956_s26 = scalar_lea.hbm %s8368_s7, 32 }
  0x7b   :  { %s103_s3 = sshll.u32 %s8001_s24, 4  ;;  %p7957_p0 = scmp.ne.s32.totalorder %s8368_s7, %s7956_s26  ;;  %s104_s3 = int_to_ptr.vmem [resolvable:$true] %s103_s3 }
  0x7c   :  { %p7960_p1 = scmp.lt.u32.totalorder %s7956_s26, %s8368_s7 }
  0x7e   :  { %p7962_p2 = pnand %p7960_p1, %p7957_p0 }
  0x80   :  { %7965 = shalt.err (!%p7962_p2)
}
  0x81   :  { %s7966_s13 = scalar_lea.vmem %s104_s3, 32  ;;  %p7971_p4 = scmp.lt.s32.totalorder %s104_s3, %s104_s3 }
  0x82   :  { %p7967_p3 = scmp.ne.s32.totalorder %s104_s3, %s7966_s13  ;;  %p7972_p5 = scmp.lt.s32.totalorder %s7966_s13, %s7966_s13 }
  0x84   :  { %p7973_p6 = por %p7972_p5, %p7971_p4 }
  0x86   :  { %p7974_p7 = pnand %p7973_p6, %p7967_p3 }
  0x88   :  { %7977 = shalt.err (!%p7974_p7)
}
  0x89   :  { %106 = dma.hbm_to_vmem [thread:$0]  %s8368_s7, 32, %s104_s3, [#allocation16]  }
  0x8a   :  { %7978 = dma.done.wait [#allocation5], 1024  }
  0x8b   :  { %7979 = vsyncadd [#allocation5], 4294966272 }
  0x8c   :  { %7980 = dma.done.wait [#allocation7], 65664  }
  0x8d   :  { %7981 = vsyncadd [#allocation7], 4294901632 }
  0x8e   :  { %7982 = dma.done.wait [#allocation10], 32832  }
  0x8f   :  { %7983 = vsyncadd [#allocation10], 4294934464 }
  0x90   :  { %7984 = dma.done.wait [#allocation13], 8224  }
  0x91   :  { %7985 = vsyncadd [#allocation13], 4294959072 }
  0x92   :  { %7986 = dma.done.wait [#allocation16], 32  }
  0x93   :  { %7987 = vsyncadd [#allocation16], 4294967264  ;;  %v211_v1 = vld [vmem:[#allocation6] sm:$0xff]  ;;  %v196_v54 = vld [vmem:[#allocation4 + $0x8] sm:$0xff]  ;;  %vm6424_vm14 = vcmask 7168  }
  0x94   :  { %v215_v2 = vld [vmem:[#allocation6 + $0x20] sm:$0xff]  ;;  %v8151_v58 = vpack.c.bf16 %v196_v54, %v196_v54  ;;  %v200_v59 = vld [vmem:[#allocation4 + $0x28] sm:$0xff] }
  0x95   :  { %v467_v3 = vld [vmem:[#allocation6 + $0x800] sm:$0xff]  ;;  %v6436_v4 = vcombine.high %v211_v1, %v215_v2  ;;  %v6435_v6 = vcombine.low %v211_v1, %v215_v2  ;;  %v8153_v62 = vpack.c.bf16 %v200_v59, %v200_v59 }
  0x96   :  { %v471_v5 = vld [vmem:[#allocation6 + $0x820] sm:$0xff]  ;;  %3315 = vmatprep.mubr.bf16.mxu1 %v8151_v58 }
  0x97   :  { %v219_v7 = vld [vmem:[#allocation6 + $0x40] sm:$0xff]  ;;  %v6692_v9 = vcombine.high %v467_v3, %v471_v5  ;;  %v6691_v10 = vcombine.low %v467_v3, %v471_v5  ;;  %3283 = vmatprep.subr.bf16.mxu1 %v6436_v4  ;;  %3397 = vmatprep.mubr.bf16.mxu0 %v8153_v62 }
  0x98   :  { %v223_v8 = vld [vmem:[#allocation6 + $0x60] sm:$0xff]  ;;  %3284 = vmatpush1.bf16.msra.mxu1 %v6435_v6 }
  0x99   :  { %v6444_v11 = vcombine.high %v219_v7, %v223_v8  ;;  %v475_v12 = vld [vmem:[#allocation6 + $0x840] sm:$0xff]  ;;  %3365 = vmatprep.subr.bf16.mxu0 %v6692_v9  ;;  %v6443_v19 = vcombine.low %v219_v7, %v223_v8 }
  0x9a   :  { %v479_v13 = vld [vmem:[#allocation6 + $0x860] sm:$0xff]  ;;  %3366 = vmatpush1.bf16.msra.mxu0 %v6691_v10 }
  0x9b   :  { %v227_v14 = vld [vmem:[#allocation6 + $0x80] sm:$0xff]  ;;  %v6700_v15 = vcombine.high %v475_v12, %v479_v13  ;;  %3285 = vmatprep.subr.bf16.mxu1 %v6444_v11  ;;  %v6699_v20 = vcombine.low %v475_v12, %v479_v13 }
  0x9c   :  { %v231_v16 = vld [vmem:[#allocation6 + $0xa0] sm:$0xff]  ;;  %3286 = vmatpush1.bf16.msra.mxu1 %v6443_v19 }
  0x9d   :  { %v483_v17 = vld [vmem:[#allocation6 + $0x880] sm:$0xff]  ;;  %v6452_v21 = vcombine.high %v227_v14, %v231_v16  ;;  %3367 = vmatprep.subr.bf16.mxu0 %v6700_v15  ;;  %v6451_v27 = vcombine.low %v227_v14, %v231_v16 }
  0x9e   :  { %v487_v18 = vld [vmem:[#allocation6 + $0x8a0] sm:$0xff]  ;;  %3368 = vmatpush1.bf16.msra.mxu0 %v6699_v20 }
  0x9f   :  { %v6708_v22 = vcombine.high %v483_v17, %v487_v18  ;;  %v235_v23 = vld [vmem:[#allocation6 + $0xc0] sm:$0xff]  ;;  %3287 = vmatprep.subr.bf16.mxu1 %v6452_v21  ;;  %v6707_v28 = vcombine.low %v483_v17, %v487_v18 }
  0xa0   :  { %v239_v24 = vld [vmem:[#allocation6 + $0xe0] sm:$0xff]  ;;  %3288 = vmatpush1.bf16.msra.mxu1 %v6451_v27 }
  0xa1   :  { %v491_v25 = vld [vmem:[#allocation6 + $0x8c0] sm:$0xff]  ;;  %v6460_v29 = vcombine.high %v235_v23, %v239_v24  ;;  %3369 = vmatprep.subr.bf16.mxu0 %v6708_v22  ;;  %v6459_v35 = vcombine.low %v235_v23, %v239_v24 }
  0xa2   :  { %v495_v26 = vld [vmem:[#allocation6 + $0x8e0] sm:$0xff]  ;;  %3370 = vmatpush1.bf16.msra.mxu0 %v6707_v28 }
  0xa3   :  { %v6716_v30 = vcombine.high %v491_v25, %v495_v26  ;;  %v243_v31 = vld [vmem:[#allocation6 + $0x100] sm:$0xff]  ;;  %3289 = vmatprep.subr.bf16.mxu1 %v6460_v29  ;;  %v6715_v36 = vcombine.low %v491_v25, %v495_v26 }
  0xa4   :  { %v247_v32 = vld [vmem:[#allocation6 + $0x120] sm:$0xff]  ;;  %3290 = vmatpush1.bf16.msra.mxu1 %v6459_v35 }
  0xa5   :  { %v499_v33 = vld [vmem:[#allocation6 + $0x900] sm:$0xff]  ;;  %v6468_v37 = vcombine.high %v243_v31, %v247_v32  ;;  %3371 = vmatprep.subr.bf16.mxu0 %v6716_v30  ;;  %v6467_v43 = vcombine.low %v243_v31, %v247_v32 }
  0xa6   :  { %v503_v34 = vld [vmem:[#allocation6 + $0x920] sm:$0xff]  ;;  %3372 = vmatpush1.bf16.msra.mxu0 %v6715_v36 }
  0xa7   :  { %v6724_v38 = vcombine.high %v499_v33, %v503_v34  ;;  %v251_v39 = vld [vmem:[#allocation6 + $0x140] sm:$0xff]  ;;  %3291 = vmatprep.subr.bf16.mxu1 %v6468_v37  ;;  %v6723_v44 = vcombine.low %v499_v33, %v503_v34 }
  0xa8   :  { %v255_v40 = vld [vmem:[#allocation6 + $0x160] sm:$0xff]  ;;  %3292 = vmatpush1.bf16.msra.mxu1 %v6467_v43 }
  0xa9   :  { %v507_v41 = vld [vmem:[#allocation6 + $0x940] sm:$0xff]  ;;  %v6476_v45 = vcombine.high %v251_v39, %v255_v40  ;;  %3373 = vmatprep.subr.bf16.mxu0 %v6724_v38  ;;  %v6475_v51 = vcombine.low %v251_v39, %v255_v40 }
  0xaa   :  { %v511_v42 = vld [vmem:[#allocation6 + $0x960] sm:$0xff]  ;;  %3374 = vmatpush1.bf16.msra.mxu0 %v6723_v44 }
  0xab   :  { %v6732_v46 = vcombine.high %v507_v41, %v511_v42  ;;  %v259_v47 = vld [vmem:[#allocation6 + $0x180] sm:$0xff]  ;;  %3293 = vmatprep.subr.bf16.mxu1 %v6476_v45  ;;  %v6731_v52 = vcombine.low %v507_v41, %v511_v42 }
  0xac   :  { %v263_v48 = vld [vmem:[#allocation6 + $0x1a0] sm:$0xff]  ;;  %3294 = vmatpush1.bf16.msra.mxu1 %v6475_v51 }
  0xad   :  { %v515_v49 = vld [vmem:[#allocation6 + $0x980] sm:$0xff]  ;;  %v6484_v53 = vcombine.high %v259_v47, %v263_v48  ;;  %3375 = vmatprep.subr.bf16.mxu0 %v6732_v46  ;;  %v6483_v63 = vcombine.low %v259_v47, %v263_v48 }
  0xae   :  { %v519_v50 = vld [vmem:[#allocation6 + $0x9a0] sm:$0xff]  ;;  %3376 = vmatpush1.bf16.msra.mxu0 %v6731_v52 }
  0xaf   :  { %v6740_v55 = vcombine.high %v515_v49, %v519_v50  ;;  %v267_v56 = vld [vmem:[#allocation6 + $0x1c0] sm:$0xff]  ;;  %3295 = vmatprep.subr.bf16.mxu1 %v6484_v53  ;;  %v6739_v0 = vcombine.low %v515_v49, %v519_v50 }
  0xb0   :  { %v271_v57 = vld [vmem:[#allocation6 + $0x1e0] sm:$0xff]  ;;  %3296 = vmatpush1.bf16.msra.mxu1 %v6483_v63 }
  0xb1   :  { %v523_v60 = vld [vmem:[#allocation6 + $0x9c0] sm:$0xff]  ;;  %v6492_v1 = vcombine.high %v267_v56, %v271_v57  ;;  %3377 = vmatprep.subr.bf16.mxu0 %v6740_v55  ;;  %v6491_v7 = vcombine.low %v267_v56, %v271_v57 }
  0xb2   :  { %v527_v61 = vld [vmem:[#allocation6 + $0x9e0] sm:$0xff]  ;;  %3378 = vmatpush1.bf16.msra.mxu0 %v6739_v0 }
  0xb3   :  { %v6748_v2 = vcombine.high %v523_v60, %v527_v61  ;;  %v275_v3 = vld [vmem:[#allocation6 + $0x200] sm:$0xff]  ;;  %3297 = vmatprep.subr.bf16.mxu1 %v6492_v1  ;;  %v6747_v8 = vcombine.low %v523_v60, %v527_v61 }
  0xb4   :  { %v279_v4 = vld [vmem:[#allocation6 + $0x220] sm:$0xff]  ;;  %3298 = vmatpush1.bf16.msra.mxu1 %v6491_v7  ;;  %v212_v7 = vld [vmem:[#allocation6 + $0x8] sm:$0xff] }
  0xb5   :  { %v531_v5 = vld [vmem:[#allocation6 + $0xa00] sm:$0xff]  ;;  %v6500_v9 = vcombine.high %v275_v3, %v279_v4  ;;  %3379 = vmatprep.subr.bf16.mxu0 %v6748_v2  ;;  %v6499_v15 = vcombine.low %v275_v3, %v279_v4 }
  0xb6   :  { %v535_v6 = vld [vmem:[#allocation6 + $0xa20] sm:$0xff]  ;;  %3380 = vmatpush1.bf16.msra.mxu0 %v6747_v8  ;;  %v216_v8 = vld [vmem:[#allocation6 + $0x28] sm:$0xff] }
  0xb7   :  { %v6756_v10 = vcombine.high %v531_v5, %v535_v6  ;;  %v283_v11 = vld [vmem:[#allocation6 + $0x240] sm:$0xff]  ;;  %3299 = vmatprep.subr.bf16.mxu1 %v6500_v9  ;;  %v6755_v16 = vcombine.low %v531_v5, %v535_v6 }
  0xb8   :  { %v287_v12 = vld [vmem:[#allocation6 + $0x260] sm:$0xff]  ;;  %3300 = vmatpush1.bf16.msra.mxu1 %v6499_v15 }
  0xb9   :  { %v539_v13 = vld [vmem:[#allocation6 + $0xa40] sm:$0xff]  ;;  %v6508_v17 = vcombine.high %v283_v11, %v287_v12  ;;  %3381 = vmatprep.subr.bf16.mxu0 %v6756_v10  ;;  %v6507_v23 = vcombine.low %v283_v11, %v287_v12 }
  0xba   :  { %v543_v14 = vld [vmem:[#allocation6 + $0xa60] sm:$0xff]  ;;  %3382 = vmatpush1.bf16.msra.mxu0 %v6755_v16 }
  0xbb   :  { %v6764_v18 = vcombine.high %v539_v13, %v543_v14  ;;  %v291_v19 = vld [vmem:[#allocation6 + $0x280] sm:$0xff]  ;;  %3301 = vmatprep.subr.bf16.mxu1 %v6508_v17  ;;  %v6763_v24 = vcombine.low %v539_v13, %v543_v14  ;;  %v6438_v14 = vcombine.high %v212_v7, %v216_v8 }
  0xbc   :  { %v295_v20 = vld [vmem:[#allocation6 + $0x2a0] sm:$0xff]  ;;  %3302 = vmatpush1.bf16.msra.mxu1 %v6507_v23  ;;  %v6437_v23 = vcombine.low %v212_v7, %v216_v8  ;;  %v272_v8 = vld [vmem:[#allocation6 + $0x1e8] sm:$0xff] }
  0xbd   :  { %v547_v21 = vld [vmem:[#allocation6 + $0xa80] sm:$0xff]  ;;  %v6516_v25 = vcombine.high %v291_v19, %v295_v20  ;;  %3383 = vmatprep.subr.bf16.mxu0 %v6764_v18  ;;  %v6515_v31 = vcombine.low %v291_v19, %v295_v20  ;;  %v220_v18 = vld [vmem:[#allocation6 + $0x48] sm:$0xff]  ;;  %v198_v20 = vld [vmem:[#allocation4 + $0x18] sm:$0xff] }
  0xbe   :  { %v551_v22 = vld [vmem:[#allocation6 + $0xaa0] sm:$0xff]  ;;  %3384 = vmatpush1.bf16.msra.mxu0 %v6763_v24  ;;  %v224_v19 = vld [vmem:[#allocation6 + $0x68] sm:$0xff] }
  0xbf   :  { %v6772_v26 = vcombine.high %v547_v21, %v551_v22  ;;  %v299_v27 = vld [vmem:[#allocation6 + $0x2c0] sm:$0xff]  ;;  %3303 = vmatprep.subr.bf16.mxu1 %v6516_v25  ;;  %v6771_v32 = vcombine.low %v547_v21, %v551_v22  ;;  %v6446_v25 = vcombine.high %v220_v18, %v224_v19 }
  0xc0   :  { %v303_v28 = vld [vmem:[#allocation6 + $0x2e0] sm:$0xff]  ;;  %3304 = vmatpush1.bf16.msra.mxu1 %v6515_v31 }
  0xc1   :  { %v555_v29 = vld [vmem:[#allocation6 + $0xac0] sm:$0xff]  ;;  %v6524_v33 = vcombine.high %v299_v27, %v303_v28  ;;  %3385 = vmatprep.subr.bf16.mxu0 %v6772_v26  ;;  %v6523_v39 = vcombine.low %v299_v27, %v303_v28  ;;  %v8161_v28 = vpack.c.bf16 %v198_v20, %v198_v20 }
  0xc2   :  { %v559_v30 = vld [vmem:[#allocation6 + $0xae0] sm:$0xff]  ;;  %3386 = vmatpush1.bf16.msra.mxu0 %v6771_v32  ;;  %v6445_v32 = vcombine.low %v220_v18, %v224_v19 }
  0xc3   :  { %v6780_v34 = vcombine.high %v555_v29, %v559_v30  ;;  %v307_v35 = vld [vmem:[#allocation6 + $0x300] sm:$0xff]  ;;  %3305 = vmatprep.subr.bf16.mxu1 %v6524_v33  ;;  %v6779_v40 = vcombine.low %v555_v29, %v559_v30  ;;  %v228_v29 = vld [vmem:[#allocation6 + $0x88] sm:$0xff] }
  0xc4   :  { %v311_v36 = vld [vmem:[#allocation6 + $0x320] sm:$0xff]  ;;  %3306 = vmatpush1.bf16.msra.mxu1 %v6523_v39  ;;  %v232_v30 = vld [vmem:[#allocation6 + $0xa8] sm:$0xff] }
  0xc5   :  { %v563_v37 = vld [vmem:[#allocation6 + $0xb00] sm:$0xff]  ;;  %v6532_v41 = vcombine.high %v307_v35, %v311_v36  ;;  %3387 = vmatprep.subr.bf16.mxu0 %v6780_v34  ;;  %v6531_v47 = vcombine.low %v307_v35, %v311_v36  ;;  %v236_v36 = vld [vmem:[#allocation6 + $0xc8] sm:$0xff] }
  0xc6   :  { %v567_v38 = vld [vmem:[#allocation6 + $0xb20] sm:$0xff]  ;;  %3388 = vmatpush1.bf16.msra.mxu0 %v6779_v40  ;;  %v6453_v40 = vcombine.low %v228_v29, %v232_v30 }
  0xc7   :  { %v6788_v42 = vcombine.high %v563_v37, %v567_v38  ;;  %v315_v43 = vld [vmem:[#allocation6 + $0x340] sm:$0xff]  ;;  %3307 = vmatprep.subr.bf16.mxu1 %v6532_v41  ;;  %v6787_v48 = vcombine.low %v563_v37, %v567_v38  ;;  %v6454_v37 = vcombine.high %v228_v29, %v232_v30  ;;  %v240_v38 = vld [vmem:[#allocation6 + $0xe8] sm:$0xff] }
  0xc8   :  { %v319_v44 = vld [vmem:[#allocation6 + $0x360] sm:$0xff]  ;;  %3308 = vmatpush1.bf16.msra.mxu1 %v6531_v47 }
  0xc9   :  { %v571_v45 = vld [vmem:[#allocation6 + $0xb40] sm:$0xff]  ;;  %v6540_v49 = vcombine.high %v315_v43, %v319_v44  ;;  %3389 = vmatprep.subr.bf16.mxu0 %v6788_v42  ;;  %v6539_v55 = vcombine.low %v315_v43, %v319_v44  ;;  %v244_v44 = vld [vmem:[#allocation6 + $0x108] sm:$0xff] }
  0xca   :  { %v575_v46 = vld [vmem:[#allocation6 + $0xb60] sm:$0xff]  ;;  %3390 = vmatpush1.bf16.msra.mxu0 %v6787_v48  ;;  %v6461_v48 = vcombine.low %v236_v36, %v240_v38 }
  0xcb   :  { %v6796_v50 = vcombine.high %v571_v45, %v575_v46  ;;  %v323_v51 = vld [vmem:[#allocation6 + $0x380] sm:$0xff]  ;;  %3309 = vmatprep.subr.bf16.mxu1 %v6540_v49  ;;  %v6795_v56 = vcombine.low %v571_v45, %v575_v46  ;;  %v6462_v45 = vcombine.high %v236_v36, %v240_v38  ;;  %v248_v46 = vld [vmem:[#allocation6 + $0x128] sm:$0xff] }
  0xcc   :  { %v327_v52 = vld [vmem:[#allocation6 + $0x3a0] sm:$0xff]  ;;  %3310 = vmatpush1.bf16.msra.mxu1 %v6539_v55 }
  0xcd   :  { %v579_v53 = vld [vmem:[#allocation6 + $0xb80] sm:$0xff]  ;;  %v6548_v57 = vcombine.high %v323_v51, %v327_v52  ;;  %3391 = vmatprep.subr.bf16.mxu0 %v6796_v50  ;;  %v6547_v1 = vcombine.low %v323_v51, %v327_v52  ;;  %v252_v52 = vld [vmem:[#allocation6 + $0x148] sm:$0xff] }
  0xce   :  { %v583_v54 = vld [vmem:[#allocation6 + $0xba0] sm:$0xff]  ;;  %3392 = vmatpush1.bf16.msra.mxu0 %v6795_v56  ;;  %v6469_v56 = vcombine.low %v244_v44, %v248_v46 }
  0xcf   :  { %v6804_v59 = vcombine.high %v579_v53, %v583_v54  ;;  %v331_v60 = vld [vmem:[#allocation6 + $0x3c0] sm:$0xff]  ;;  %3311 = vmatprep.subr.bf16.mxu1 %v6548_v57  ;;  %v6803_v2 = vcombine.low %v579_v53, %v583_v54  ;;  %v6470_v53 = vcombine.high %v244_v44, %v248_v46  ;;  %v256_v54 = vld [vmem:[#allocation6 + $0x168] sm:$0xff] }
  0xd0   :  { %v335_v61 = vld [vmem:[#allocation6 + $0x3e0] sm:$0xff]  ;;  %3312 = vmatpush1.bf16.msra.mxu1 %v6547_v1 }
  0xd1   :  { %v587_v63 = vld [vmem:[#allocation6 + $0xbc0] sm:$0xff]  ;;  %v6556_v3 = vcombine.high %v331_v60, %v335_v61  ;;  %3393 = vmatprep.subr.bf16.mxu0 %v6804_v59  ;;  %v6555_v9 = vcombine.low %v331_v60, %v335_v61  ;;  %v260_v61 = vld [vmem:[#allocation6 + $0x188] sm:$0xff] }
  0xd2   :  { %v591_v0 = vld [vmem:[#allocation6 + $0xbe0] sm:$0xff]  ;;  %3394 = vmatpush1.bf16.msra.mxu0 %v6803_v2  ;;  %v6477_v2 = vcombine.low %v252_v52, %v256_v54 }
  0xd3   :  { %v6812_v4 = vcombine.high %v587_v63, %v591_v0  ;;  %v339_v5 = vld [vmem:[#allocation6 + $0x400] sm:$0xff]  ;;  %3313 = vmatprep.subr.bf16.mxu1 %v6556_v3  ;;  %v6811_v11 = vcombine.low %v587_v63, %v591_v0  ;;  %v6478_v63 = vcombine.high %v252_v52, %v256_v54  ;;  %v264_v0 = vld [vmem:[#allocation6 + $0x1a8] sm:$0xff] }
  0xd4   :  { %v343_v6 = vld [vmem:[#allocation6 + $0x420] sm:$0xff]  ;;  %3314 = vmatpush1.bf16.msra.mxu1 %v6555_v9  ;;  %v6486_v7 = vcombine.high %v260_v61, %v264_v0 }
  0xd5   :  { %v195_v10 = vld [vmem:[#allocation4] sm:$0xff]  ;;  %v6564_v12 = vcombine.high %v339_v5, %v343_v6  ;;  %3395 = vmatprep.subr.bf16.mxu0 %v6812_v4  ;;  %v6563_v21 = vcombine.low %v339_v5, %v343_v6  ;;  %v268_v6 = vld [vmem:[#allocation6 + $0x1c8] sm:$0xff] }
  0xd6   :  { %v199_v13 = vld [vmem:[#allocation4 + $0x20] sm:$0xff]  ;;  %v8157_v17 = vpack.c.bf16 %v195_v10, %v195_v10  ;;  %3396 = vmatpush1.bf16.msra.mxu0 %v6811_v11  ;;  %v6485_v10 = vcombine.low %v260_v61, %v264_v0  ;;  %v6493_v19 = vcombine.low %v268_v6, %v272_v8 }
  0xd7   :  { %v347_v15 = vld [vmem:[#allocation6 + $0x440] sm:$0xff]  ;;  %v8159_v22 = vpack.c.bf16 %v199_v13, %v199_v13  ;;  %3324 = vmatprep.subr.bf16.mxu1 %v6564_v12  ;;  %3447 = vmatprep.subr.bf16.mxu0 %v6438_v14  ;;  %v276_v14 = vld [vmem:[#allocation6 + $0x208] sm:$0xff] }
  0xd8   :  { %v351_v16 = vld [vmem:[#allocation6 + $0x460] sm:$0xff]  ;;  %3316 = vmatmul.mubr.bf16.vlgmr.msra.gmra.mrb[0].mxu1 %v8157_v17 }
  0xd9   :  { %v6572_v24 = vcombine.high %v347_v15, %v351_v16  ;;  %v355_v26 = vld [vmem:[#allocation6 + $0x480] sm:$0xff]  ;;  %3325 = vmatpush1.bf16.msra.mxu1 %v6563_v21  ;;  %3398 = vmatmul.mubr.bf16.vlgmr.msra.gmra.mrb[0].mxu0 %v8159_v22  ;;  %v6571_v31 = vcombine.low %v347_v15, %v351_v16  ;;  %v6494_v15 = vcombine.high %v268_v6, %v272_v8  ;;  %v280_v16 = vld [vmem:[#allocation6 + $0x228] sm:$0xff] }
  0xda   :  { %v359_v27 = vld [vmem:[#allocation6 + $0x4a0] sm:$0xff]  ;;  %3448 = vmatpush1.bf16.msra.mxu0 %v6437_v23  ;;  %3356 = vmatprep.mubr.bf16.mxu1 %v8161_v28  ;;  %v6501_v29 = vcombine.low %v276_v14, %v280_v16 }
  0xdb   :  { %3326 = vmatprep.subr.bf16.mxu1 %v6572_v24  ;;  %v6580_v33 = vcombine.high %v355_v26, %v359_v27  ;;  %v363_v34 = vld [vmem:[#allocation6 + $0x4c0] sm:$0xff]  ;;  %3449 = vmatprep.subr.bf16.mxu0 %v6446_v25  ;;  %v6579_v39 = vcombine.low %v355_v26, %v359_v27  ;;  %v284_v24 = vld [vmem:[#allocation6 + $0x248] sm:$0xff]  ;;  %v6502_v25 = vcombine.high %v276_v14, %v280_v16 }
  0xdc   :  { %v367_v35 = vld [vmem:[#allocation6 + $0x4e0] sm:$0xff]  ;;  %3479 = vmatprep.mubr.bf16.mxu0 %v8151_v58  ;;  %v288_v26 = vld [vmem:[#allocation6 + $0x268] sm:$0xff] }
  0xdd   :  { %3327 = vmatpush1.bf16.msra.mxu1 %v6571_v31  ;;  %v6588_v41 = vcombine.high %v363_v34, %v367_v35  ;;  %v371_v42 = vld [vmem:[#allocation6 + $0x500] sm:$0xff]  ;;  %v6587_v47 = vcombine.low %v363_v34, %v367_v35  ;;  %v6510_v34 = vcombine.high %v284_v24, %v288_v26  ;;  %v296_v35 = vld [vmem:[#allocation6 + $0x2a8] sm:$0xff] }
  0xde   :  { %3450 = vmatpush1.bf16.msra.mxu0 %v6445_v32  ;;  %3328 = vmatprep.subr.bf16.mxu1 %v6580_v33  ;;  %v375_v43 = vld [vmem:[#allocation6 + $0x520] sm:$0xff]  ;;  %v292_v33 = vld [vmem:[#allocation6 + $0x288] sm:$0xff] }
  0xdf   :  { %3451 = vmatprep.subr.bf16.mxu0 %v6454_v37  ;;  %v6596_v49 = vcombine.high %v371_v42, %v375_v43  ;;  %v379_v50 = vld [vmem:[#allocation6 + $0x540] sm:$0xff]  ;;  %v6595_v55 = vcombine.low %v371_v42, %v375_v43  ;;  %v6509_v37 = vcombine.low %v284_v24, %v288_v26  ;;  %v6518_v42 = vcombine.high %v292_v33, %v296_v35  ;;  %v304_v43 = vld [vmem:[#allocation6 + $0x2e8] sm:$0xff] }
  0xe0   :  { %v383_v51 = vld [vmem:[#allocation6 + $0x560] sm:$0xff]  ;;  %v472_v24 = vld [vmem:[#allocation6 + $0x828] sm:$0xff] }
  0xe1   :  { %3329 = vmatpush1.bf16.msra.mxu1 %v6579_v39  ;;  %v6604_v57 = vcombine.high %v379_v50, %v383_v51  ;;  %v387_v59 = vld [vmem:[#allocation6 + $0x580] sm:$0xff]  ;;  %v6603_v1 = vcombine.low %v379_v50, %v383_v51  ;;  %v312_v51 = vld [vmem:[#allocation6 + $0x328] sm:$0xff] }
  0xe2   :  { %3452 = vmatpush1.bf16.msra.mxu0 %v6453_v40  ;;  %3330 = vmatprep.subr.bf16.mxu1 %v6588_v41  ;;  %v391_v60 = vld [vmem:[#allocation6 + $0x5a0] sm:$0xff]  ;;  %v300_v41 = vld [vmem:[#allocation6 + $0x2c8] sm:$0xff] }
  0xe3   :  { %3453 = vmatprep.subr.bf16.mxu0 %v6462_v45  ;;  %v6612_v3 = vcombine.high %v387_v59, %v391_v60  ;;  %v395_v4 = vld [vmem:[#allocation6 + $0x5c0] sm:$0xff]  ;;  %v6611_v9 = vcombine.low %v387_v59, %v391_v60  ;;  %v6517_v45 = vcombine.low %v292_v33, %v296_v35  ;;  %v6526_v50 = vcombine.high %v300_v41, %v304_v43  ;;  %v320_v60 = vld [vmem:[#allocation6 + $0x368] sm:$0xff] }
  0xe4   :  { %v399_v5 = vld [vmem:[#allocation6 + $0x5e0] sm:$0xff] }
  0xe5   :  { %3331 = vmatpush1.bf16.msra.mxu1 %v6587_v47  ;;  %v6620_v11 = vcombine.high %v395_v4, %v399_v5  ;;  %v403_v12 = vld [vmem:[#allocation6 + $0x600] sm:$0xff]  ;;  %v6619_v18 = vcombine.low %v395_v4, %v399_v5  ;;  %v328_v5 = vld [vmem:[#allocation6 + $0x3a8] sm:$0xff] }
  0xe6   :  { %3454 = vmatpush1.bf16.msra.mxu0 %v6461_v48  ;;  %3332 = vmatprep.subr.bf16.mxu1 %v6596_v49  ;;  %v407_v13 = vld [vmem:[#allocation6 + $0x620] sm:$0xff]  ;;  %v308_v49 = vld [vmem:[#allocation6 + $0x308] sm:$0xff] }
  0xe7   :  { %3455 = vmatprep.subr.bf16.mxu0 %v6470_v53  ;;  %v6628_v20 = vcombine.high %v403_v12, %v407_v13  ;;  %v411_v21 = vld [vmem:[#allocation6 + $0x640] sm:$0xff]  ;;  %v6627_v27 = vcombine.low %v403_v12, %v407_v13  ;;  %v6525_v53 = vcombine.low %v300_v41, %v304_v43  ;;  %v6534_v59 = vcombine.high %v308_v49, %v312_v51  ;;  %v336_v13 = vld [vmem:[#allocation6 + $0x3e8] sm:$0xff] }
  0xe8   :  { %v415_v23 = vld [vmem:[#allocation6 + $0x660] sm:$0xff]  ;;  %v484_v41 = vld [vmem:[#allocation6 + $0x888] sm:$0xff] }
  0xe9   :  { %3333 = vmatpush1.bf16.msra.mxu1 %v6595_v55  ;;  %v6636_v30 = vcombine.high %v411_v21, %v415_v23  ;;  %v419_v31 = vld [vmem:[#allocation6 + $0x680] sm:$0xff]  ;;  %v6635_v36 = vcombine.low %v411_v21, %v415_v23  ;;  %v197_v23 = vld [vmem:[#allocation4 + $0x10] sm:$0xff]  ;;  %v488_v43 = vld [vmem:[#allocation6 + $0x8a8] sm:$0xff] }
  0xea   :  { %3456 = vmatpush1.bf16.msra.mxu0 %v6469_v56  ;;  %3334 = vmatprep.subr.bf16.mxu1 %v6604_v57  ;;  %v423_v32 = vld [vmem:[#allocation6 + $0x6a0] sm:$0xff]  ;;  %v316_v57 = vld [vmem:[#allocation6 + $0x348] sm:$0xff]  ;;  %v8167_v35 = vpack.c.bf16 %v197_v23, %v197_v23 }
  0xeb   :  { %3457 = vmatprep.subr.bf16.mxu0 %v6478_v63  ;;  %v6644_v38 = vcombine.high %v419_v31, %v423_v32  ;;  %v427_v39 = vld [vmem:[#allocation6 + $0x6c0] sm:$0xff]  ;;  %v6643_v44 = vcombine.low %v419_v31, %v423_v32  ;;  %v6533_v63 = vcombine.low %v308_v49, %v312_v51  ;;  %v6542_v4 = vcombine.high %v316_v57, %v320_v60  ;;  %v476_v31 = vld [vmem:[#allocation6 + $0x848] sm:$0xff] }
  0xec   :  { %v431_v40 = vld [vmem:[#allocation6 + $0x6e0] sm:$0xff]  ;;  %v480_v32 = vld [vmem:[#allocation6 + $0x868] sm:$0xff]  ;;  %v6710_v51 = vcombine.high %v484_v41, %v488_v43 }
  0xed   :  { %3335 = vmatpush1.bf16.msra.mxu1 %v6603_v1  ;;  %v6652_v46 = vcombine.high %v427_v39, %v431_v40  ;;  %v435_v47 = vld [vmem:[#allocation6 + $0x700] sm:$0xff]  ;;  %v6651_v52 = vcombine.low %v427_v39, %v431_v40 }
  0xee   :  { %3458 = vmatpush1.bf16.msra.mxu0 %v6477_v2  ;;  %3336 = vmatprep.subr.bf16.mxu1 %v6612_v3  ;;  %v439_v48 = vld [vmem:[#allocation6 + $0x720] sm:$0xff]  ;;  %v324_v3 = vld [vmem:[#allocation6 + $0x388] sm:$0xff] }
  0xef   :  { %3459 = vmatprep.subr.bf16.mxu0 %v6486_v7  ;;  %v6660_v54 = vcombine.high %v435_v47, %v439_v48  ;;  %v443_v55 = vld [vmem:[#allocation6 + $0x740] sm:$0xff]  ;;  %v6659_v61 = vcombine.low %v435_v47, %v439_v48  ;;  %v6541_v7 = vcombine.low %v316_v57, %v320_v60  ;;  %v6550_v12 = vcombine.high %v324_v3, %v328_v5 }
  0xf0   :  { %v447_v56 = vld [vmem:[#allocation6 + $0x760] sm:$0xff] }
  0xf1   :  { %3337 = vmatpush1.bf16.msra.mxu1 %v6611_v9  ;;  %v6668_v0 = vcombine.high %v443_v55, %v447_v56  ;;  %v451_v1 = vld [vmem:[#allocation6 + $0x780] sm:$0xff]  ;;  %v6667_v6 = vcombine.low %v443_v55, %v447_v56 }
  0xf2   :  { %3460 = vmatpush1.bf16.msra.mxu0 %v6485_v10  ;;  %3338 = vmatprep.subr.bf16.mxu1 %v6620_v11  ;;  %v455_v2 = vld [vmem:[#allocation6 + $0x7a0] sm:$0xff]  ;;  %v332_v11 = vld [vmem:[#allocation6 + $0x3c8] sm:$0xff] }
  0xf3   :  { %3461 = vmatprep.subr.bf16.mxu0 %v6494_v15  ;;  %v6676_v8 = vcombine.high %v451_v1, %v455_v2  ;;  %v459_v9 = vld [vmem:[#allocation6 + $0x7c0] sm:$0xff]  ;;  %v6675_v14 = vcombine.low %v451_v1, %v455_v2  ;;  %v6549_v15 = vcombine.low %v324_v3, %v328_v5  ;;  %v6558_v21 = vcombine.high %v332_v11, %v336_v13 }
  0xf4   :  { %v463_v10 = vld [vmem:[#allocation6 + $0x7e0] sm:$0xff] }
  0xf5   :  { %3339 = vmatpush1.bf16.msra.mxu1 %v6619_v18  ;;  %v6684_v16 = vcombine.high %v459_v9, %v463_v10  ;;  %v595_v18 = vld [vmem:[#allocation6 + $0xc00] sm:$0xff] }
  0xf6   :  { %3462 = vmatpush1.bf16.msra.mxu0 %v6493_v19  ;;  %3340 = vmatprep.subr.bf16.mxu1 %v6628_v20  ;;  %v599_v19 = vld [vmem:[#allocation6 + $0xc20] sm:$0xff]  ;;  %v468_v20 = vld [vmem:[#allocation6 + $0x808] sm:$0xff] }
  0xf7   :  { %3463 = vmatprep.subr.bf16.mxu0 %v6502_v25  ;;  %v6683_v25 = vcombine.low %v459_v9, %v463_v10  ;;  %v603_v26 = vld [vmem:[#allocation6 + $0xc40] sm:$0xff]  ;;  %v6694_v33 = vcombine.high %v468_v20, %v472_v24 }
  0xf8   :  { %v611_v39 = vld [vmem:[#allocation6 + $0xc80] sm:$0xff] }
  0xf9   :  { %3341 = vmatpush1.bf16.msra.mxu1 %v6627_v27  ;;  %v6557_v27 = vcombine.low %v332_v11, %v336_v13  ;;  %v615_v40 = vld [vmem:[#allocation6 + $0xca0] sm:$0xff] }
  0xfa   :  { %3464 = vmatpush1.bf16.msra.mxu0 %v6501_v29  ;;  %3342 = vmatprep.subr.bf16.mxu1 %v6636_v30  ;;  %v6820_v29 = vcombine.high %v595_v18, %v599_v19  ;;  %v607_v30 = vld [vmem:[#allocation6 + $0xc60] sm:$0xff]  ;;  %v6836_v47 = vcombine.high %v611_v39, %v615_v40 }
  0xfb   :  { %3465 = vmatprep.subr.bf16.mxu0 %v6510_v34  ;;  %v202_v34 = vld [vmem:[#allocation4 + $0x38] sm:$0xff]  ;;  %v619_v48 = vld [vmem:[#allocation6 + $0xcc0] sm:$0xff] }
  0xfc   :  { %v623_v49 = vld [vmem:[#allocation6 + $0xce0] sm:$0xff] }
  0xfd   :  { %3343 = vmatpush1.bf16.msra.mxu1 %v6635_v36  ;;  %v6819_v36 = vcombine.low %v595_v18, %v599_v19  ;;  %v6844_v55 = vcombine.high %v619_v48, %v623_v49  ;;  %v627_v56 = vld [vmem:[#allocation6 + $0xd00] sm:$0xff] }
  0xfe   :  { %3466 = vmatpush1.bf16.msra.mxu0 %v6509_v37  ;;  %3344 = vmatprep.subr.bf16.mxu1 %v6644_v38  ;;  %v6693_v37 = vcombine.low %v468_v20, %v472_v24  ;;  %v6828_v38 = vcombine.high %v603_v26, %v607_v30  ;;  %v631_v57 = vld [vmem:[#allocation6 + $0xd20] sm:$0xff]  ;;  %v528_v24 = vld [vmem:[#allocation6 + $0x9e8] sm:$0xff] }
  0xff   :  { %3467 = vmatprep.subr.bf16.mxu0 %v6518_v42  ;;  %v6702_v42 = vcombine.high %v476_v31, %v480_v32  ;;  %v6852_v1 = vcombine.high %v627_v56, %v631_v57  ;;  %v635_v2 = vld [vmem:[#allocation6 + $0xd40] sm:$0xff] }
 0x100   :  { %v639_v3 = vld [vmem:[#allocation6 + $0xd60] sm:$0xff] }
 0x101   :  { %3345 = vmatpush1.bf16.msra.mxu1 %v6643_v44  ;;  %v8169_v44 = vpack.c.bf16 %v202_v34, %v202_v34  ;;  %v6860_v9 = vcombine.high %v635_v2, %v639_v3  ;;  %v643_v10 = vld [vmem:[#allocation6 + $0xd80] sm:$0xff] }
 0x102   :  { %3468 = vmatpush1.bf16.msra.mxu0 %v6517_v45  ;;  %3346 = vmatprep.subr.bf16.mxu1 %v6652_v46  ;;  %v6827_v45 = vcombine.low %v603_v26, %v607_v30  ;;  %v6701_v46 = vcombine.low %v476_v31, %v480_v32  ;;  %v647_v11 = vld [vmem:[#allocation6 + $0xda0] sm:$0xff]  ;;  %v532_v31 = vld [vmem:[#allocation6 + $0xa08] sm:$0xff] }
 0x103   :  { %3469 = vmatprep.subr.bf16.mxu0 %v6526_v50  ;;  %v492_v50 = vld [vmem:[#allocation6 + $0x8c8] sm:$0xff]  ;;  %v6868_v18 = vcombine.high %v643_v10, %v647_v11  ;;  %v651_v19 = vld [vmem:[#allocation6 + $0xdc0] sm:$0xff] }
 0x104   :  { %v655_v20 = vld [vmem:[#allocation6 + $0xde0] sm:$0xff] }
 0x105   :  { %3347 = vmatpush1.bf16.msra.mxu1 %v6651_v52  ;;  %v496_v52 = vld [vmem:[#allocation6 + $0x8e8] sm:$0xff]  ;;  %v663_v30 = vld [vmem:[#allocation6 + $0xe20] sm:$0xff]  ;;  %v6875_v34 = vcombine.low %v651_v19, %v655_v20 }
 0x106   :  { %3470 = vmatpush1.bf16.msra.mxu0 %v6525_v53  ;;  %3348 = vmatprep.subr.bf16.mxu1 %v6660_v54  ;;  %v6835_v53 = vcombine.low %v611_v39, %v615_v40  ;;  %v6709_v54 = vcombine.low %v484_v41, %v488_v43  ;;  %v6718_v60 = vcombine.high %v492_v50, %v496_v52  ;;  %v671_v39 = vld [vmem:[#allocation6 + $0xe60] sm:$0xff]  ;;  %v540_v40 = vld [vmem:[#allocation6 + $0xa48] sm:$0xff] }
 0x107   :  { %3471 = vmatprep.subr.bf16.mxu0 %v6534_v59  ;;  %v500_v59 = vld [vmem:[#allocation6 + $0x908] sm:$0xff] }
 0x109   :  { %3349 = vmatpush1.bf16.msra.mxu1 %v6659_v61  ;;  %v504_v61 = vld [vmem:[#allocation6 + $0x928] sm:$0xff] }
 0x10a   :  { %3472 = vmatpush1.bf16.msra.mxu0 %v6533_v63  ;;  %3350 = vmatprep.subr.bf16.mxu1 %v6668_v0  ;;  %v6843_v63 = vcombine.low %v619_v48, %v623_v49  ;;  %v6717_v0 = vcombine.low %v492_v50, %v496_v52  ;;  %v6726_v5 = vcombine.high %v500_v59, %v504_v61  ;;  %v679_v48 = vld [vmem:[#allocation6 + $0xea0] sm:$0xff]  ;;  %v548_v49 = vld [vmem:[#allocation6 + $0xa88] sm:$0xff] }
 0x10b   :  { %3473 = vmatprep.subr.bf16.mxu0 %v6542_v4  ;;  %v508_v4 = vld [vmem:[#allocation6 + $0x948] sm:$0xff] }
 0x10d   :  { %3351 = vmatpush1.bf16.msra.mxu1 %v6667_v6  ;;  %v512_v6 = vld [vmem:[#allocation6 + $0x968] sm:$0xff] }
 0x10e   :  { %3474 = vmatpush1.bf16.msra.mxu0 %v6541_v7  ;;  %3352 = vmatprep.subr.bf16.mxu1 %v6676_v8  ;;  %v6851_v7 = vcombine.low %v627_v56, %v631_v57  ;;  %v6725_v8 = vcombine.low %v500_v59, %v504_v61  ;;  %v6734_v13 = vcombine.high %v508_v4, %v512_v6  ;;  %v687_v56 = vld [vmem:[#allocation6 + $0xee0] sm:$0xff]  ;;  %v556_v57 = vld [vmem:[#allocation6 + $0xac8] sm:$0xff] }
 0x10f   :  { %3475 = vmatprep.subr.bf16.mxu0 %v6550_v12  ;;  %v516_v12 = vld [vmem:[#allocation6 + $0x988] sm:$0xff] }
 0x111   :  { %3353 = vmatpush1.bf16.msra.mxu1 %v6675_v14  ;;  %v520_v14 = vld [vmem:[#allocation6 + $0x9a8] sm:$0xff] }
 0x112   :  { %3476 = vmatpush1.bf16.msra.mxu0 %v6549_v15  ;;  %3354 = vmatprep.subr.bf16.mxu1 %v6684_v16  ;;  %v6859_v15 = vcombine.low %v635_v2, %v639_v3  ;;  %v6733_v16 = vcombine.low %v508_v4, %v512_v6  ;;  %v6742_v23 = vcombine.high %v516_v12, %v520_v14  ;;  %v695_v2 = vld [vmem:[#allocation6 + $0xf20] sm:$0xff]  ;;  %v564_v3 = vld [vmem:[#allocation6 + $0xb08] sm:$0xff] }
 0x113   :  { %3477 = vmatprep.subr.bf16.mxu0 %v6558_v21  ;;  %v524_v21 = vld [vmem:[#allocation6 + $0x9c8] sm:$0xff]  ;;  %v6741_v26 = vcombine.low %v516_v12, %v520_v14 }
 0x114   :  { %v6750_v32 = vcombine.high %v524_v21, %v528_v24 }
 0x115   :  { %3355 = vmatpush1.bf16.msra.mxu1 %v6683_v25  ;;  %v6867_v25 = vcombine.low %v643_v10, %v647_v11  ;;  %v703_v10 = vld [vmem:[#allocation6 + $0xf60] sm:$0xff]  ;;  %v572_v11 = vld [vmem:[#allocation6 + $0xb48] sm:$0xff] }
 0x116   :  { %3478 = vmatpush1.bf16.msra.mxu0 %v6557_v27  ;;  %3406 = vmatprep.subr.bf16.mxu1 %v6820_v29  ;;  %v6876_v27 = vcombine.high %v651_v19, %v655_v20  ;;  %v659_v29 = vld [vmem:[#allocation6 + $0xe00] sm:$0xff]  ;;  %v580_v20 = vld [vmem:[#allocation6 + $0xb88] sm:$0xff] }
 0x117   :  { %3529 = vmatprep.subr.bf16.mxu0 %v6694_v33  ;;  %v536_v33 = vld [vmem:[#allocation6 + $0xa28] sm:$0xff]  ;;  %v6883_v43 = vcombine.low %v659_v29, %v663_v30  ;;  %v711_v19 = vld [vmem:[#allocation6 + $0xfa0] sm:$0xff] }
 0x118   :  { %3357 = vmatmul.mubr.bf16.vlgmr.msra.gmra.mrb[4].mxu1 %v8167_v35  ;;  %v6758_v41 = vcombine.high %v532_v31, %v536_v33 }
 0x119   :  { %3407 = vmatpush1.bf16.msra.mxu1 %v6819_v36  ;;  %3480 = vmatmul.mubr.bf16.vlgmr.msra.gmra.mrb[4].mxu0 %v8157_v17  ;;  %v6749_v36 = vcombine.low %v524_v21, %v528_v24 }
 0x11a   :  { %3530 = vmatpush1.bf16.msra.mxu0 %v6693_v37  ;;  %3408 = vmatprep.subr.bf16.mxu1 %v6828_v38  ;;  %v6884_v37 = vcombine.high %v659_v29, %v663_v30  ;;  %v667_v38 = vld [vmem:[#allocation6 + $0xe40] sm:$0xff]  ;;  %v588_v30 = vld [vmem:[#allocation6 + $0xbc8] sm:$0xff] }
 0x11b   :  { %3531 = vmatprep.subr.bf16.mxu0 %v6702_v42  ;;  %3438 = vmatprep.mubr.bf16.mxu1 %v8169_v44  ;;  %v544_v42 = vld [vmem:[#allocation6 + $0xa68] sm:$0xff]  ;;  %v6891_v52 = vcombine.low %v667_v38, %v671_v39  ;;  %v719_v29 = vld [vmem:[#allocation6 + $0xfe0] sm:$0xff] }
 0x11c   :  { %3561 = vmatprep.mubr.bf16.mxu0 %v8153_v62  ;;  %v6766_v50 = vcombine.high %v540_v40, %v544_v42 }
 0x11d   :  { %3409 = vmatpush1.bf16.msra.mxu1 %v6827_v45  ;;  %v6757_v45 = vcombine.low %v532_v31, %v536_v33 }
 0x11e   :  { %3532 = vmatpush1.bf16.msra.mxu0 %v6701_v46  ;;  %3410 = vmatprep.subr.bf16.mxu1 %v6836_v47  ;;  %v6892_v46 = vcombine.high %v667_v38, %v671_v39  ;;  %v675_v47 = vld [vmem:[#allocation6 + $0xe80] sm:$0xff]  ;;  %v344_v38 = vld [vmem:[#allocation6 + $0x428] sm:$0xff]  ;;  %v213_v39 = vld [vmem:[#allocation6 + $0x10] sm:$0xff] }
 0x11f   :  { %3533 = vmatprep.subr.bf16.mxu0 %v6710_v51  ;;  %v552_v51 = vld [vmem:[#allocation6 + $0xaa8] sm:$0xff]  ;;  %v6899_v61 = vcombine.low %v675_v47, %v679_v48 }
 0x120   :  { %v6774_v59 = vcombine.high %v548_v49, %v552_v51 }
 0x121   :  { %3411 = vmatpush1.bf16.msra.mxu1 %v6835_v53  ;;  %v6765_v53 = vcombine.low %v540_v40, %v544_v42  ;;  %v217_v42 = vld [vmem:[#allocation6 + $0x30] sm:$0xff] }
 0x122   :  { %3534 = vmatpush1.bf16.msra.mxu0 %v6709_v54  ;;  %3412 = vmatprep.subr.bf16.mxu1 %v6844_v55  ;;  %v6900_v54 = vcombine.high %v675_v47, %v679_v48  ;;  %v683_v55 = vld [vmem:[#allocation6 + $0xec0] sm:$0xff]  ;;  %v348_v47 = vld [vmem:[#allocation6 + $0x448] sm:$0xff] }
 0x123   :  { %3535 = vmatprep.subr.bf16.mxu0 %v6718_v60  ;;  %v560_v60 = vld [vmem:[#allocation6 + $0xae8] sm:$0xff]  ;;  %v6907_v6 = vcombine.low %v683_v55, %v687_v56 }
 0x124   :  { %v6782_v4 = vcombine.high %v556_v57, %v560_v60  ;;  %v352_v48 = vld [vmem:[#allocation6 + $0x468] sm:$0xff] }
 0x125   :  { %3413 = vmatpush1.bf16.msra.mxu1 %v6843_v63  ;;  %v6773_v63 = vcombine.low %v548_v49, %v552_v51  ;;  %v221_v49 = vld [vmem:[#allocation6 + $0x50] sm:$0xff] }
 0x126   :  { %3536 = vmatpush1.bf16.msra.mxu0 %v6717_v0  ;;  %3414 = vmatprep.subr.bf16.mxu1 %v6852_v1  ;;  %v6908_v0 = vcombine.high %v683_v55, %v687_v56  ;;  %v691_v1 = vld [vmem:[#allocation6 + $0xf00] sm:$0xff]  ;;  %v225_v51 = vld [vmem:[#allocation6 + $0x70] sm:$0xff]  ;;  %v6574_v55 = vcombine.high %v348_v47, %v352_v48  ;;  %v356_v56 = vld [vmem:[#allocation6 + $0x488] sm:$0xff] }
 0x127   :  { %3537 = vmatprep.subr.bf16.mxu0 %v6726_v5  ;;  %v568_v5 = vld [vmem:[#allocation6 + $0xb28] sm:$0xff]  ;;  %v6915_v14 = vcombine.low %v691_v1, %v695_v2 }
 0x128   :  { %v6790_v12 = vcombine.high %v564_v3, %v568_v5 }
 0x129   :  { %3415 = vmatpush1.bf16.msra.mxu1 %v6851_v7  ;;  %v6781_v7 = vcombine.low %v556_v57, %v560_v60  ;;  %v360_v57 = vld [vmem:[#allocation6 + $0x4a8] sm:$0xff]  ;;  %v6448_v60 = vcombine.high %v221_v49, %v225_v51 }
 0x12a   :  { %3538 = vmatpush1.bf16.msra.mxu0 %v6725_v8  ;;  %3416 = vmatprep.subr.bf16.mxu1 %v6860_v9  ;;  %v6916_v8 = vcombine.high %v691_v1, %v695_v2  ;;  %v699_v9 = vld [vmem:[#allocation6 + $0xf40] sm:$0xff]  ;;  %v6582_v1 = vcombine.high %v356_v56, %v360_v57  ;;  %v364_v2 = vld [vmem:[#allocation6 + $0x4c8] sm:$0xff] }
 0x12b   :  { %3539 = vmatprep.subr.bf16.mxu0 %v6734_v13  ;;  %v576_v13 = vld [vmem:[#allocation6 + $0xb68] sm:$0xff]  ;;  %v6923_v24 = vcombine.low %v699_v9, %v703_v10 }
 0x12c   :  { %v6798_v21 = vcombine.high %v572_v11, %v576_v13 }
 0x12d   :  { %3417 = vmatpush1.bf16.msra.mxu1 %v6859_v15  ;;  %v6789_v15 = vcombine.low %v564_v3, %v568_v5  ;;  %v368_v3 = vld [vmem:[#allocation6 + $0x4e8] sm:$0xff] }
 0x12e   :  { %3540 = vmatpush1.bf16.msra.mxu0 %v6733_v16  ;;  %3418 = vmatprep.subr.bf16.mxu1 %v6868_v18  ;;  %v6924_v16 = vcombine.high %v699_v9, %v703_v10  ;;  %v707_v18 = vld [vmem:[#allocation6 + $0xf80] sm:$0xff]  ;;  %v6590_v9 = vcombine.high %v364_v2, %v368_v3  ;;  %v372_v10 = vld [vmem:[#allocation6 + $0x508] sm:$0xff] }
 0x12f   :  { %3541 = vmatprep.subr.bf16.mxu0 %v6742_v23  ;;  %v584_v23 = vld [vmem:[#allocation6 + $0xba8] sm:$0xff]  ;;  %v6931_v33 = vcombine.low %v707_v18, %v711_v19 }
 0x130   :  { %v6806_v31 = vcombine.high %v580_v20, %v584_v23 }
 0x131   :  { %3419 = vmatpush1.bf16.msra.mxu1 %v6867_v25  ;;  %v6797_v25 = vcombine.low %v572_v11, %v576_v13  ;;  %v376_v11 = vld [vmem:[#allocation6 + $0x528] sm:$0xff] }
 0x132   :  { %3542 = vmatpush1.bf16.msra.mxu0 %v6741_v26  ;;  %3420 = vmatprep.subr.bf16.mxu1 %v6876_v27  ;;  %v6932_v26 = vcombine.high %v707_v18, %v711_v19  ;;  %v715_v27 = vld [vmem:[#allocation6 + $0xfc0] sm:$0xff]  ;;  %v6598_v18 = vcombine.high %v372_v10, %v376_v11  ;;  %v380_v19 = vld [vmem:[#allocation6 + $0x548] sm:$0xff] }
 0x133   :  { %3543 = vmatprep.subr.bf16.mxu0 %v6750_v32  ;;  %v592_v32 = vld [vmem:[#allocation6 + $0xbe8] sm:$0xff] }
 0x134   :  { %v6814_v40 = vcombine.high %v588_v30, %v592_v32 }
 0x135   :  { %3421 = vmatpush1.bf16.msra.mxu1 %v6875_v34  ;;  %v6805_v34 = vcombine.low %v580_v20, %v584_v23  ;;  %v384_v20 = vld [vmem:[#allocation6 + $0x568] sm:$0xff] }
 0x136   :  { %3544 = vmatpush1.bf16.msra.mxu0 %v6749_v36  ;;  %3422 = vmatprep.subr.bf16.mxu1 %v6884_v37  ;;  %v6940_v36 = vcombine.high %v715_v27, %v719_v29  ;;  %v340_v37 = vld [vmem:[#allocation6 + $0x408] sm:$0xff] }
 0x137   :  { %3545 = vmatprep.subr.bf16.mxu0 %v6758_v41  ;;  %v201_v41 = vld [vmem:[#allocation4 + $0x30] sm:$0xff] }
 0x139   :  { %3423 = vmatpush1.bf16.msra.mxu1 %v6883_v43  ;;  %v6939_v43 = vcombine.low %v715_v27, %v719_v29  ;;  %v6606_v27 = vcombine.high %v380_v19, %v384_v20  ;;  %v388_v29 = vld [vmem:[#allocation6 + $0x588] sm:$0xff] }
 0x13a   :  { %3546 = vmatpush1.bf16.msra.mxu0 %v6757_v45  ;;  %3424 = vmatprep.subr.bf16.mxu1 %v6892_v46  ;;  %v6813_v45 = vcombine.low %v588_v30, %v592_v32  ;;  %v6566_v46 = vcombine.high %v340_v37, %v344_v38  ;;  %v392_v30 = vld [vmem:[#allocation6 + $0x5a8] sm:$0xff] }
 0x13b   :  { %3547 = vmatprep.subr.bf16.mxu0 %v6766_v50  ;;  %v6440_v50 = vcombine.high %v213_v39, %v217_v42 }
 0x13d   :  { %3425 = vmatpush1.bf16.msra.mxu1 %v6891_v52  ;;  %v8175_v52 = vpack.c.bf16 %v201_v41, %v201_v41 }
 0x13e   :  { %3548 = vmatpush1.bf16.msra.mxu0 %v6765_v53  ;;  %3426 = vmatprep.subr.bf16.mxu1 %v6900_v54  ;;  %v6565_v53 = vcombine.low %v340_v37, %v344_v38  ;;  %v6439_v54 = vcombine.low %v213_v39, %v217_v42  ;;  %v6614_v37 = vcombine.high %v388_v29, %v392_v30  ;;  %v396_v38 = vld [vmem:[#allocation6 + $0x5c8] sm:$0xff]  ;;  %v273_v42 = vld [vmem:[#allocation6 + $0x1f0] sm:$0xff] }
 0x13f   :  { %3549 = vmatprep.subr.bf16.mxu0 %v6774_v59  ;;  %v229_v59 = vld [vmem:[#allocation6 + $0x90] sm:$0xff]  ;;  %v400_v39 = vld [vmem:[#allocation6 + $0x5e8] sm:$0xff] }
 0x141   :  { %3427 = vmatpush1.bf16.msra.mxu1 %v6899_v61  ;;  %v233_v61 = vld [vmem:[#allocation6 + $0xb0] sm:$0xff] }
 0x142   :  { %3550 = vmatpush1.bf16.msra.mxu0 %v6773_v63  ;;  %3428 = vmatprep.subr.bf16.mxu1 %v6908_v0  ;;  %v6573_v63 = vcombine.low %v348_v47, %v352_v48  ;;  %v6447_v0 = vcombine.low %v221_v49, %v225_v51  ;;  %v6456_v5 = vcombine.high %v229_v59, %v233_v61  ;;  %v404_v47 = vld [vmem:[#allocation6 + $0x608] sm:$0xff]  ;;  %v277_v49 = vld [vmem:[#allocation6 + $0x210] sm:$0xff] }
 0x143   :  { %3551 = vmatprep.subr.bf16.mxu0 %v6782_v4  ;;  %v237_v4 = vld [vmem:[#allocation6 + $0xd0] sm:$0xff]  ;;  %v408_v48 = vld [vmem:[#allocation6 + $0x628] sm:$0xff] }
 0x144   :  { %v281_v51 = vld [vmem:[#allocation6 + $0x230] sm:$0xff] }
 0x145   :  { %3429 = vmatpush1.bf16.msra.mxu1 %v6907_v6  ;;  %v241_v6 = vld [vmem:[#allocation6 + $0xf0] sm:$0xff] }
 0x146   :  { %3552 = vmatpush1.bf16.msra.mxu0 %v6781_v7  ;;  %3430 = vmatprep.subr.bf16.mxu1 %v6916_v8  ;;  %v6581_v7 = vcombine.low %v356_v56, %v360_v57  ;;  %v6455_v8 = vcombine.low %v229_v59, %v233_v61  ;;  %v6464_v13 = vcombine.high %v237_v4, %v241_v6  ;;  %v412_v56 = vld [vmem:[#allocation6 + $0x648] sm:$0xff]  ;;  %v285_v59 = vld [vmem:[#allocation6 + $0x250] sm:$0xff] }
 0x147   :  { %3553 = vmatprep.subr.bf16.mxu0 %v6790_v12  ;;  %v245_v12 = vld [vmem:[#allocation6 + $0x110] sm:$0xff]  ;;  %v416_v57 = vld [vmem:[#allocation6 + $0x668] sm:$0xff] }
 0x148   :  { %v289_v61 = vld [vmem:[#allocation6 + $0x270] sm:$0xff] }
 0x149   :  { %3431 = vmatpush1.bf16.msra.mxu1 %v6915_v14  ;;  %v249_v14 = vld [vmem:[#allocation6 + $0x130] sm:$0xff] }
 0x14a   :  { %3554 = vmatpush1.bf16.msra.mxu0 %v6789_v15  ;;  %3432 = vmatprep.subr.bf16.mxu1 %v6924_v16  ;;  %v6589_v15 = vcombine.low %v364_v2, %v368_v3  ;;  %v6463_v16 = vcombine.low %v237_v4, %v241_v6  ;;  %v6472_v23 = vcombine.high %v245_v12, %v249_v14  ;;  %v420_v2 = vld [vmem:[#allocation6 + $0x688] sm:$0xff]  ;;  %v293_v4 = vld [vmem:[#allocation6 + $0x290] sm:$0xff] }
 0x14b   :  { %3555 = vmatprep.subr.bf16.mxu0 %v6798_v21  ;;  %v253_v21 = vld [vmem:[#allocation6 + $0x150] sm:$0xff]  ;;  %v424_v3 = vld [vmem:[#allocation6 + $0x6a8] sm:$0xff] }
 0x14c   :  { %v297_v6 = vld [vmem:[#allocation6 + $0x2b0] sm:$0xff] }
 0x14d   :  { %3433 = vmatpush1.bf16.msra.mxu1 %v6923_v24  ;;  %v257_v24 = vld [vmem:[#allocation6 + $0x170] sm:$0xff] }
 0x14e   :  { %3556 = vmatpush1.bf16.msra.mxu0 %v6797_v25  ;;  %3434 = vmatprep.subr.bf16.mxu1 %v6932_v26  ;;  %v6597_v25 = vcombine.low %v372_v10, %v376_v11  ;;  %v6471_v26 = vcombine.low %v245_v12, %v249_v14  ;;  %v6480_v32 = vcombine.high %v253_v21, %v257_v24  ;;  %v428_v11 = vld [vmem:[#allocation6 + $0x6c8] sm:$0xff]  ;;  %v305_v14 = vld [vmem:[#allocation6 + $0x2f0] sm:$0xff] }
 0x14f   :  { %3557 = vmatprep.subr.bf16.mxu0 %v6806_v31  ;;  %v261_v31 = vld [vmem:[#allocation6 + $0x190] sm:$0xff]  ;;  %v6520_v10 = vcombine.high %v293_v4, %v297_v6  ;;  %v432_v12 = vld [vmem:[#allocation6 + $0x6e8] sm:$0xff] }
 0x151   :  { %3435 = vmatpush1.bf16.msra.mxu1 %v6931_v33  ;;  %v265_v33 = vld [vmem:[#allocation6 + $0x1b0] sm:$0xff] }
 0x152   :  { %3558 = vmatpush1.bf16.msra.mxu0 %v6805_v34  ;;  %3436 = vmatprep.subr.bf16.mxu1 %v6940_v36  ;;  %v6605_v34 = vcombine.low %v380_v19, %v384_v20  ;;  %v6479_v36 = vcombine.low %v253_v21, %v257_v24  ;;  %v6488_v41 = vcombine.high %v261_v31, %v265_v33  ;;  %v436_v20 = vld [vmem:[#allocation6 + $0x708] sm:$0xff]  ;;  %v313_v24 = vld [vmem:[#allocation6 + $0x330] sm:$0xff] }
 0x153   :  { %3559 = vmatprep.subr.bf16.mxu0 %v6814_v40  ;;  %v269_v40 = vld [vmem:[#allocation6 + $0x1d0] sm:$0xff]  ;;  %v440_v21 = vld [vmem:[#allocation6 + $0x728] sm:$0xff] }
 0x155   :  { %3437 = vmatpush1.bf16.msra.mxu1 %v6939_v43  ;;  %v6613_v43 = vcombine.low %v388_v29, %v392_v30  ;;  %v444_v30 = vld [vmem:[#allocation6 + $0x748] sm:$0xff] }
 0x156   :  { %3560 = vmatpush1.bf16.msra.mxu0 %v6813_v45  ;;  %3488 = vmatprep.subr.bf16.mxu1 %v6566_v46  ;;  %v6487_v45 = vcombine.low %v261_v31, %v265_v33  ;;  %v6622_v46 = vcombine.high %v396_v38, %v400_v39  ;;  %v448_v31 = vld [vmem:[#allocation6 + $0x768] sm:$0xff]  ;;  %v321_v33 = vld [vmem:[#allocation6 + $0x370] sm:$0xff] }
 0x157   :  { %3611 = vmatprep.subr.bf16.mxu0 %v6440_v50  ;;  %v6496_v50 = vcombine.high %v269_v40, %v273_v42 }
 0x158   :  { %3439 = vmatmul.mubr.bf16.vlgmr.msra.gmra.mrb[8].mxu1 %v8175_v52 }
 0x159   :  { %3489 = vmatpush1.bf16.msra.mxu1 %v6565_v53  ;;  %3562 = vmatmul.mubr.bf16.vlgmr.msra.gmra.mrb[8].mxu0 %v8159_v22  ;;  %v6621_v53 = vcombine.low %v396_v38, %v400_v39  ;;  %v452_v39 = vld [vmem:[#allocation6 + $0x788] sm:$0xff] }
 0x15a   :  { %3612 = vmatpush1.bf16.msra.mxu0 %v6439_v54  ;;  %3490 = vmatprep.subr.bf16.mxu1 %v6574_v55  ;;  %v6495_v54 = vcombine.low %v269_v40, %v273_v42  ;;  %v6630_v55 = vcombine.high %v404_v47, %v408_v48  ;;  %v456_v40 = vld [vmem:[#allocation6 + $0x7a8] sm:$0xff]  ;;  %v329_v42 = vld [vmem:[#allocation6 + $0x3b0] sm:$0xff] }
 0x15b   :  { %3613 = vmatprep.subr.bf16.mxu0 %v6448_v60  ;;  %3520 = vmatprep.mubr.bf16.mxu1 %v8161_v28  ;;  %v6504_v60 = vcombine.high %v277_v49, %v281_v51 }
 0x15c   :  { %3643 = vmatprep.mubr.bf16.mxu0 %v8151_v58 }
 0x15d   :  { %3491 = vmatpush1.bf16.msra.mxu1 %v6573_v63  ;;  %v6629_v63 = vcombine.low %v404_v47, %v408_v48  ;;  %v460_v48 = vld [vmem:[#allocation6 + $0x7c8] sm:$0xff] }
 0x15e   :  { %3614 = vmatpush1.bf16.msra.mxu0 %v6447_v0  ;;  %3492 = vmatprep.subr.bf16.mxu1 %v6582_v1  ;;  %v6503_v0 = vcombine.low %v277_v49, %v281_v51  ;;  %v6638_v1 = vcombine.high %v412_v56, %v416_v57  ;;  %v464_v49 = vld [vmem:[#allocation6 + $0x7e8] sm:$0xff]  ;;  %v337_v51 = vld [vmem:[#allocation6 + $0x3f0] sm:$0xff] }
 0x15f   :  { %3615 = vmatprep.subr.bf16.mxu0 %v6456_v5  ;;  %v6512_v5 = vcombine.high %v285_v59, %v289_v61 }
 0x161   :  { %3493 = vmatpush1.bf16.msra.mxu1 %v6581_v7  ;;  %v6637_v7 = vcombine.low %v412_v56, %v416_v57  ;;  %v596_v57 = vld [vmem:[#allocation6 + $0xc08] sm:$0xff] }
 0x162   :  { %3616 = vmatpush1.bf16.msra.mxu0 %v6455_v8  ;;  %3494 = vmatprep.subr.bf16.mxu1 %v6590_v9  ;;  %v6511_v8 = vcombine.low %v285_v59, %v289_v61  ;;  %v6646_v9 = vcombine.high %v420_v2, %v424_v3  ;;  %v600_v59 = vld [vmem:[#allocation6 + $0xc28] sm:$0xff]  ;;  %v473_v61 = vld [vmem:[#allocation6 + $0x830] sm:$0xff] }
 0x163   :  { %3617 = vmatprep.subr.bf16.mxu0 %v6464_v13  ;;  %v301_v13 = vld [vmem:[#allocation6 + $0x2d0] sm:$0xff] }
 0x164   :  { %v6528_v19 = vcombine.high %v301_v13, %v305_v14 }
 0x165   :  { %3495 = vmatpush1.bf16.msra.mxu1 %v6589_v15  ;;  %v6645_v15 = vcombine.low %v420_v2, %v424_v3  ;;  %v604_v3 = vld [vmem:[#allocation6 + $0xc48] sm:$0xff] }
 0x166   :  { %3618 = vmatpush1.bf16.msra.mxu0 %v6463_v16  ;;  %3496 = vmatprep.subr.bf16.mxu1 %v6598_v18  ;;  %v6519_v16 = vcombine.low %v293_v4, %v297_v6  ;;  %v6654_v18 = vcombine.high %v428_v11, %v432_v12  ;;  %v608_v4 = vld [vmem:[#allocation6 + $0xc68] sm:$0xff]  ;;  %v481_v6 = vld [vmem:[#allocation6 + $0x870] sm:$0xff] }
 0x167   :  { %3619 = vmatprep.subr.bf16.mxu0 %v6472_v23  ;;  %v309_v23 = vld [vmem:[#allocation6 + $0x310] sm:$0xff] }
 0x168   :  { %v6536_v29 = vcombine.high %v309_v23, %v313_v24 }
 0x169   :  { %3497 = vmatpush1.bf16.msra.mxu1 %v6597_v25  ;;  %v6653_v25 = vcombine.low %v428_v11, %v432_v12  ;;  %v612_v11 = vld [vmem:[#allocation6 + $0xc88] sm:$0xff] }
 0x16a   :  { %3620 = vmatpush1.bf16.msra.mxu0 %v6471_v26  ;;  %3498 = vmatprep.subr.bf16.mxu1 %v6606_v27  ;;  %v6527_v26 = vcombine.low %v301_v13, %v305_v14  ;;  %v6662_v27 = vcombine.high %v436_v20, %v440_v21  ;;  %v616_v12 = vld [vmem:[#allocation6 + $0xca8] sm:$0xff]  ;;  %v485_v13 = vld [vmem:[#allocation6 + $0x890] sm:$0xff] }
 0x16b   :  { %3621 = vmatprep.subr.bf16.mxu0 %v6480_v32  ;;  %v317_v32 = vld [vmem:[#allocation6 + $0x350] sm:$0xff] }
 0x16c   :  { %v6544_v38 = vcombine.high %v317_v32, %v321_v33  ;;  %v489_v14 = vld [vmem:[#allocation6 + $0x8b0] sm:$0xff] }
 0x16d   :  { %3499 = vmatpush1.bf16.msra.mxu1 %v6605_v34  ;;  %v6661_v34 = vcombine.low %v436_v20, %v440_v21  ;;  %v620_v20 = vld [vmem:[#allocation6 + $0xcc8] sm:$0xff] }
 0x16e   :  { %3622 = vmatpush1.bf16.msra.mxu0 %v6479_v36  ;;  %3500 = vmatprep.subr.bf16.mxu1 %v6614_v37  ;;  %v6535_v36 = vcombine.low %v309_v23, %v313_v24  ;;  %v6670_v37 = vcombine.high %v444_v30, %v448_v31  ;;  %v624_v21 = vld [vmem:[#allocation6 + $0xce8] sm:$0xff]  ;;  %v493_v23 = vld [vmem:[#allocation6 + $0x8d0] sm:$0xff] }
 0x16f   :  { %3623 = vmatprep.subr.bf16.mxu0 %v6488_v41  ;;  %v325_v41 = vld [vmem:[#allocation6 + $0x390] sm:$0xff] }
 0x170   :  { %v6552_v47 = vcombine.high %v325_v41, %v329_v42  ;;  %v497_v24 = vld [vmem:[#allocation6 + $0x8f0] sm:$0xff] }
 0x171   :  { %3501 = vmatpush1.bf16.msra.mxu1 %v6613_v43  ;;  %v6669_v43 = vcombine.low %v444_v30, %v448_v31  ;;  %v628_v30 = vld [vmem:[#allocation6 + $0xd08] sm:$0xff] }
 0x172   :  { %3624 = vmatpush1.bf16.msra.mxu0 %v6487_v45  ;;  %3502 = vmatprep.subr.bf16.mxu1 %v6622_v46  ;;  %v6543_v45 = vcombine.low %v317_v32, %v321_v33  ;;  %v6678_v46 = vcombine.high %v452_v39, %v456_v40  ;;  %v632_v31 = vld [vmem:[#allocation6 + $0xd28] sm:$0xff]  ;;  %v501_v32 = vld [vmem:[#allocation6 + $0x910] sm:$0xff] }
 0x173   :  { %3625 = vmatprep.subr.bf16.mxu0 %v6496_v50  ;;  %v333_v50 = vld [vmem:[#allocation6 + $0x3d0] sm:$0xff] }
 0x174   :  { %v6560_v56 = vcombine.high %v333_v50, %v337_v51  ;;  %v505_v33 = vld [vmem:[#allocation6 + $0x930] sm:$0xff] }
 0x175   :  { %3503 = vmatpush1.bf16.msra.mxu1 %v6621_v53  ;;  %v6677_v53 = vcombine.low %v452_v39, %v456_v40  ;;  %v636_v39 = vld [vmem:[#allocation6 + $0xd48] sm:$0xff] }
 0x176   :  { %3626 = vmatpush1.bf16.msra.mxu0 %v6495_v54  ;;  %3504 = vmatprep.subr.bf16.mxu1 %v6630_v55  ;;  %v6551_v54 = vcombine.low %v325_v41, %v329_v42  ;;  %v6686_v55 = vcombine.high %v460_v48, %v464_v49  ;;  %v640_v40 = vld [vmem:[#allocation6 + $0xd68] sm:$0xff]  ;;  %v509_v41 = vld [vmem:[#allocation6 + $0x950] sm:$0xff] }
 0x177   :  { %3627 = vmatprep.subr.bf16.mxu0 %v6504_v60  ;;  %v469_v60 = vld [vmem:[#allocation6 + $0x810] sm:$0xff] }
 0x178   :  { %v6696_v2 = vcombine.high %v469_v60, %v473_v61  ;;  %v513_v42 = vld [vmem:[#allocation6 + $0x970] sm:$0xff] }
 0x179   :  { %3505 = vmatpush1.bf16.msra.mxu1 %v6629_v63  ;;  %v6685_v63 = vcombine.low %v460_v48, %v464_v49  ;;  %v644_v48 = vld [vmem:[#allocation6 + $0xd88] sm:$0xff] }
 0x17a   :  { %3628 = vmatpush1.bf16.msra.mxu0 %v6503_v0  ;;  %3506 = vmatprep.subr.bf16.mxu1 %v6638_v1  ;;  %v6559_v0 = vcombine.low %v333_v50, %v337_v51  ;;  %v6822_v1 = vcombine.high %v596_v57, %v600_v59  ;;  %v648_v49 = vld [vmem:[#allocation6 + $0xda8] sm:$0xff]  ;;  %v517_v50 = vld [vmem:[#allocation6 + $0x990] sm:$0xff] }
 0x17b   :  { %3629 = vmatprep.subr.bf16.mxu0 %v6512_v5  ;;  %v477_v5 = vld [vmem:[#allocation6 + $0x850] sm:$0xff] }
 0x17c   :  { %v521_v51 = vld [vmem:[#allocation6 + $0x9b0] sm:$0xff] }
 0x17d   :  { %3507 = vmatpush1.bf16.msra.mxu1 %v6637_v7  ;;  %v6821_v7 = vcombine.low %v596_v57, %v600_v59  ;;  %v6744_v57 = vcombine.high %v517_v50, %v521_v51  ;;  %v652_v59 = vld [vmem:[#allocation6 + $0xdc8] sm:$0xff] }
 0x17e   :  { %3630 = vmatpush1.bf16.msra.mxu0 %v6511_v8  ;;  %3508 = vmatprep.subr.bf16.mxu1 %v6646_v9  ;;  %v6695_v8 = vcombine.low %v469_v60, %v473_v61  ;;  %v6830_v9 = vcombine.high %v604_v3, %v608_v4  ;;  %v656_v60 = vld [vmem:[#allocation6 + $0xde8] sm:$0xff] }
 0x17f   :  { %3631 = vmatprep.subr.bf16.mxu0 %v6520_v10  ;;  %v6704_v10 = vcombine.high %v477_v5, %v481_v6 }
 0x181   :  { %3509 = vmatpush1.bf16.msra.mxu1 %v6645_v15  ;;  %v6829_v15 = vcombine.low %v604_v3, %v608_v4  ;;  %v6869_v3 = vcombine.low %v644_v48, %v648_v49 }
 0x182   :  { %3632 = vmatpush1.bf16.msra.mxu0 %v6519_v16  ;;  %3510 = vmatprep.subr.bf16.mxu1 %v6654_v18  ;;  %v6703_v16 = vcombine.low %v477_v5, %v481_v6  ;;  %v6838_v18 = vcombine.high %v612_v11, %v616_v12  ;;  %v6743_v6 = vcombine.low %v517_v50, %v521_v51  ;;  %v565_v50 = vld [vmem:[#allocation6 + $0xb10] sm:$0xff] }
 0x183   :  { %3633 = vmatprep.subr.bf16.mxu0 %v6528_v19  ;;  %v6712_v19 = vcombine.high %v485_v13, %v489_v14  ;;  %v569_v51 = vld [vmem:[#allocation6 + $0xb30] sm:$0xff] }
 0x185   :  { %3511 = vmatpush1.bf16.msra.mxu1 %v6653_v25  ;;  %v6837_v25 = vcombine.low %v612_v11, %v616_v12  ;;  %v664_v11 = vld [vmem:[#allocation6 + $0xe28] sm:$0xff] }
 0x186   :  { %3634 = vmatpush1.bf16.msra.mxu0 %v6527_v26  ;;  %3512 = vmatprep.subr.bf16.mxu1 %v6662_v27  ;;  %v6711_v26 = vcombine.low %v485_v13, %v489_v14  ;;  %v6846_v27 = vcombine.high %v620_v20, %v624_v21  ;;  %v533_v13 = vld [vmem:[#allocation6 + $0xa10] sm:$0xff] }
 0x187   :  { %3635 = vmatprep.subr.bf16.mxu0 %v6536_v29  ;;  %v6720_v29 = vcombine.high %v493_v23, %v497_v24  ;;  %v537_v14 = vld [vmem:[#allocation6 + $0xa30] sm:$0xff] }
 0x189   :  { %3513 = vmatpush1.bf16.msra.mxu1 %v6661_v34  ;;  %v6845_v34 = vcombine.low %v620_v20, %v624_v21  ;;  %v668_v20 = vld [vmem:[#allocation6 + $0xe48] sm:$0xff] }
 0x18a   :  { %3636 = vmatpush1.bf16.msra.mxu0 %v6535_v36  ;;  %3514 = vmatprep.subr.bf16.mxu1 %v6670_v37  ;;  %v6719_v36 = vcombine.low %v493_v23, %v497_v24  ;;  %v6854_v37 = vcombine.high %v628_v30, %v632_v31  ;;  %v672_v21 = vld [vmem:[#allocation6 + $0xe68] sm:$0xff]  ;;  %v541_v23 = vld [vmem:[#allocation6 + $0xa50] sm:$0xff] }
 0x18b   :  { %3637 = vmatprep.subr.bf16.mxu0 %v6544_v38  ;;  %v6728_v38 = vcombine.high %v501_v32, %v505_v33  ;;  %v545_v24 = vld [vmem:[#allocation6 + $0xa70] sm:$0xff] }
 0x18d   :  { %3515 = vmatpush1.bf16.msra.mxu1 %v6669_v43  ;;  %v6853_v43 = vcombine.low %v628_v30, %v632_v31  ;;  %v676_v30 = vld [vmem:[#allocation6 + $0xe88] sm:$0xff] }
 0x18e   :  { %3638 = vmatpush1.bf16.msra.mxu0 %v6543_v45  ;;  %3516 = vmatprep.subr.bf16.mxu1 %v6678_v46  ;;  %v6727_v45 = vcombine.low %v501_v32, %v505_v33  ;;  %v6862_v46 = vcombine.high %v636_v39, %v640_v40  ;;  %v680_v31 = vld [vmem:[#allocation6 + $0xea8] sm:$0xff]  ;;  %v549_v32 = vld [vmem:[#allocation6 + $0xa90] sm:$0xff] }
 0x18f   :  { %3639 = vmatprep.subr.bf16.mxu0 %v6552_v47  ;;  %v6736_v47 = vcombine.high %v509_v41, %v513_v42  ;;  %v553_v33 = vld [vmem:[#allocation6 + $0xab0] sm:$0xff] }
 0x191   :  { %3517 = vmatpush1.bf16.msra.mxu1 %v6677_v53  ;;  %v6861_v53 = vcombine.low %v636_v39, %v640_v40  ;;  %v684_v39 = vld [vmem:[#allocation6 + $0xec8] sm:$0xff] }
 0x192   :  { %3640 = vmatpush1.bf16.msra.mxu0 %v6551_v54  ;;  %3518 = vmatprep.subr.bf16.mxu1 %v6686_v55  ;;  %v6735_v54 = vcombine.low %v509_v41, %v513_v42  ;;  %v6870_v55 = vcombine.high %v644_v48, %v648_v49  ;;  %v688_v40 = vld [vmem:[#allocation6 + $0xee8] sm:$0xff]  ;;  %v557_v41 = vld [vmem:[#allocation6 + $0xad0] sm:$0xff] }
 0x193   :  { %3641 = vmatprep.subr.bf16.mxu0 %v6560_v56  ;;  %v561_v42 = vld [vmem:[#allocation6 + $0xaf0] sm:$0xff]  ;;  %v692_v48 = vld [vmem:[#allocation6 + $0xf08] sm:$0xff] }
 0x194   :  { %v696_v49 = vld [vmem:[#allocation6 + $0xf28] sm:$0xff] }
 0x195   :  { %3519 = vmatpush1.bf16.msra.mxu1 %v6685_v63  ;;  %v525_v63 = vld [vmem:[#allocation6 + $0x9d0] sm:$0xff] }
 0x196   :  { %3642 = vmatpush1.bf16.msra.mxu0 %v6559_v0  ;;  %3570 = vmatprep.subr.bf16.mxu1 %v6822_v1  ;;  %v529_v0 = vld [vmem:[#allocation6 + $0x9f0] sm:$0xff] }
 0x197   :  { %3693 = vmatprep.subr.bf16.mxu0 %v6696_v2 }
 0x198   :  { %3521 = vmatmul.mubr.bf16.vlgmr.msra.gmra.mrb[12].mxu1 %v8167_v35 }
 0x199   :  { %3571 = vmatpush1.bf16.msra.mxu1 %v6821_v7  ;;  %3644 = vmatmul.mubr.bf16.vlgmr.msra.gmra.mrb[12].mxu0 %v8157_v17  ;;  %v6878_v7 = vcombine.high %v652_v59, %v656_v60 }
 0x19a   :  { %3694 = vmatpush1.bf16.msra.mxu0 %v6695_v8  ;;  %3572 = vmatprep.subr.bf16.mxu1 %v6830_v9  ;;  %v6752_v9 = vcombine.high %v525_v63, %v529_v0 }
 0x19b   :  { %3695 = vmatprep.subr.bf16.mxu0 %v6704_v10  ;;  %3602 = vmatprep.mubr.bf16.mxu1 %v8169_v44  ;;  %v660_v10 = vld [vmem:[#allocation6 + $0xe08] sm:$0xff] }
 0x19c   :  { %3725 = vmatprep.mubr.bf16.mxu0 %v8153_v62 }
 0x19d   :  { %3573 = vmatpush1.bf16.msra.mxu1 %v6829_v15  ;;  %v6877_v15 = vcombine.low %v652_v59, %v656_v60  ;;  %v700_v59 = vld [vmem:[#allocation6 + $0xf48] sm:$0xff] }
 0x19e   :  { %3696 = vmatpush1.bf16.msra.mxu0 %v6703_v16  ;;  %3574 = vmatprep.subr.bf16.mxu1 %v6838_v18  ;;  %v6751_v16 = vcombine.low %v525_v63, %v529_v0  ;;  %v6886_v18 = vcombine.high %v660_v10, %v664_v11  ;;  %v704_v60 = vld [vmem:[#allocation6 + $0xf68] sm:$0xff]  ;;  %v573_v63 = vld [vmem:[#allocation6 + $0xb50] sm:$0xff] }
 0x19f   :  { %3697 = vmatprep.subr.bf16.mxu0 %v6712_v19  ;;  %v6760_v19 = vcombine.high %v533_v13, %v537_v14  ;;  %v577_v0 = vld [vmem:[#allocation6 + $0xb70] sm:$0xff] }
 0x1a1   :  { %3575 = vmatpush1.bf16.msra.mxu1 %v6837_v25  ;;  %v6885_v25 = vcombine.low %v660_v10, %v664_v11  ;;  %v585_v10 = vld [vmem:[#allocation6 + $0xbb0] sm:$0xff]  ;;  %v6925_v11 = vcombine.low %v700_v59, %v704_v60 }
 0x1a2   :  { %3698 = vmatpush1.bf16.msra.mxu0 %v6711_v26  ;;  %3576 = vmatprep.subr.bf16.mxu1 %v6846_v27  ;;  %v6759_v26 = vcombine.low %v533_v13, %v537_v14  ;;  %v6894_v27 = vcombine.high %v668_v20, %v672_v21 }
 0x1a3   :  { %3699 = vmatprep.subr.bf16.mxu0 %v6720_v29  ;;  %v6768_v29 = vcombine.high %v541_v23, %v545_v24 }
 0x1a5   :  { %3577 = vmatpush1.bf16.msra.mxu1 %v6845_v34  ;;  %v6893_v34 = vcombine.low %v668_v20, %v672_v21 }
 0x1a6   :  { %3700 = vmatpush1.bf16.msra.mxu0 %v6719_v36  ;;  %3578 = vmatprep.subr.bf16.mxu1 %v6854_v37  ;;  %v6767_v36 = vcombine.low %v541_v23, %v545_v24  ;;  %v6902_v37 = vcombine.high %v676_v30, %v680_v31 }
 0x1a7   :  { %3701 = vmatprep.subr.bf16.mxu0 %v6728_v38  ;;  %v6776_v38 = vcombine.high %v549_v32, %v553_v33 }
 0x1a9   :  { %3579 = vmatpush1.bf16.msra.mxu1 %v6853_v43  ;;  %v6901_v43 = vcombine.low %v676_v30, %v680_v31 }
 0x1aa   :  { %3702 = vmatpush1.bf16.msra.mxu0 %v6727_v45  ;;  %3580 = vmatprep.subr.bf16.mxu1 %v6862_v46  ;;  %v6775_v45 = vcombine.low %v549_v32, %v553_v33  ;;  %v6910_v46 = vcombine.high %v684_v39, %v688_v40 }
 0x1ab   :  { %v8185_v56 = vpop.f32.mrb[0].mxu1  ;;  %3703 = vmatprep.subr.bf16.mxu0 %v6736_v47  ;;  %v6784_v47 = vcombine.high %v557_v41, %v561_v42 }
 0x1ac   :  { %v8187_v61 = vpop.f32.mrb[1].mxu1  ;;  %v8189_v1 = vpop.f32.mrb[0].mxu0 }
 0x1ad   :  { %v3321_v2 = vpop.f32.mrb[2].mxu1  ;;  %3581 = vmatpush1.bf16.msra.mxu1 %v6861_v53  ;;  %v8191_v4 = vpop.f32.mrb[1].mxu0  ;;  %v6909_v53 = vcombine.low %v684_v39, %v688_v40 }
 0x1ae   :  { %3704 = vmatpush1.bf16.msra.mxu0 %v6735_v54  ;;  %v3322_v5 = vpop.f32.mrb[3].mxu1  ;;  %3582 = vmatprep.subr.bf16.mxu1 %v6870_v55  ;;  %v3403_v8 = vpop.f32.mrb[2].mxu0  ;;  %v6783_v54 = vcombine.low %v557_v41, %v561_v42  ;;  %v6918_v55 = vcombine.high %v692_v48, %v696_v49  ;;  %v6917_v2 = vcombine.low %v692_v48, %v696_v49 }
 0x1af   :  { %3705 = vmatprep.subr.bf16.mxu0 %v6744_v57  ;;  %v3404_v12 = vpop.f32.mrb[3].mxu0  ;;  %v6792_v57 = vcombine.high %v565_v50, %v569_v51  ;;  %v6926_v5 = vcombine.high %v700_v59, %v704_v60  ;;  %v712_v8 = vld [vmem:[#allocation6 + $0xfa8] sm:$0xff] }
 0x1b0   :  { %v6799_v12 = vcombine.low %v573_v63, %v577_v0 }
 0x1b1   :  { %3583 = vmatpush1.bf16.msra.mxu1 %v6869_v3  ;;  %v6791_v3 = vcombine.low %v565_v50, %v569_v51 }
 0x1b2   :  { %3706 = vmatpush1.bf16.msra.mxu0 %v6743_v6  ;;  %3584 = vmatprep.subr.bf16.mxu1 %v6878_v7  ;;  %v6800_v6 = vcombine.high %v573_v63, %v577_v0  ;;  %v708_v7 = vld [vmem:[#allocation6 + $0xf88] sm:$0xff] }
 0x1b3   :  { %3707 = vmatprep.subr.bf16.mxu0 %v6752_v9  ;;  %v581_v9 = vld [vmem:[#allocation6 + $0xb90] sm:$0xff]  ;;  %v6934_v13 = vcombine.high %v708_v7, %v712_v8  ;;  %v6933_v20 = vcombine.low %v708_v7, %v712_v8 }
 0x1b4   :  { %v6808_v14 = vcombine.high %v581_v9, %v585_v10  ;;  %v6807_v21 = vcombine.low %v581_v9, %v585_v10  ;;  %v381_v10 = vld [vmem:[#allocation6 + $0x550] sm:$0xff] }
 0x1b5   :  { %3585 = vmatpush1.bf16.msra.mxu1 %v6877_v15  ;;  %v716_v15 = vld [vmem:[#allocation6 + $0xfc8] sm:$0xff] }
 0x1b6   :  { %3708 = vmatpush1.bf16.msra.mxu0 %v6751_v16  ;;  %3586 = vmatprep.subr.bf16.mxu1 %v6886_v18  ;;  %v720_v16 = vld [vmem:[#allocation6 + $0xfe8] sm:$0xff]  ;;  %v589_v18 = vld [vmem:[#allocation6 + $0xbd0] sm:$0xff] }
 0x1b7   :  { %3709 = vmatprep.subr.bf16.mxu0 %v6760_v19  ;;  %v593_v19 = vld [vmem:[#allocation6 + $0xbf0] sm:$0xff]  ;;  %v6942_v23 = vcombine.high %v716_v15, %v720_v16  ;;  %v6941_v30 = vcombine.low %v716_v15, %v720_v16 }
 0x1b8   :  { %v6816_v24 = vcombine.high %v589_v18, %v593_v19  ;;  %v6815_v31 = vcombine.low %v589_v18, %v593_v19  ;;  %v389_v19 = vld [vmem:[#allocation6 + $0x590] sm:$0xff] }
 0x1b9   :  { %3587 = vmatpush1.bf16.msra.mxu1 %v6885_v25  ;;  %v341_v25 = vld [vmem:[#allocation6 + $0x410] sm:$0xff] }
 0x1ba   :  { %3710 = vmatpush1.bf16.msra.mxu0 %v6759_v26  ;;  %3588 = vmatprep.subr.bf16.mxu1 %v6894_v27  ;;  %v345_v26 = vld [vmem:[#allocation6 + $0x430] sm:$0xff]  ;;  %v214_v27 = vld [vmem:[#allocation6 + $0x18] sm:$0xff] }
 0x1bb   :  { %3711 = vmatprep.subr.bf16.mxu0 %v6768_v29  ;;  %v218_v29 = vld [vmem:[#allocation6 + $0x38] sm:$0xff]  ;;  %v6568_v32 = vcombine.high %v341_v25, %v345_v26  ;;  %v6567_v39 = vcombine.low %v341_v25, %v345_v26 }
 0x1bc   :  { %v6442_v33 = vcombine.high %v214_v27, %v218_v29  ;;  %v6441_v40 = vcombine.low %v214_v27, %v218_v29 }
 0x1bd   :  { %3589 = vmatpush1.bf16.msra.mxu1 %v6893_v34  ;;  %v349_v34 = vld [vmem:[#allocation6 + $0x450] sm:$0xff] }
 0x1be   :  { %3712 = vmatpush1.bf16.msra.mxu0 %v6767_v36  ;;  %3590 = vmatprep.subr.bf16.mxu1 %v6902_v37  ;;  %v353_v36 = vld [vmem:[#allocation6 + $0x470] sm:$0xff]  ;;  %v222_v37 = vld [vmem:[#allocation6 + $0x58] sm:$0xff] }
 0x1bf   :  { %3713 = vmatprep.subr.bf16.mxu0 %v6776_v38  ;;  %v226_v38 = vld [vmem:[#allocation6 + $0x78] sm:$0xff]  ;;  %v6576_v41 = vcombine.high %v349_v34, %v353_v36  ;;  %v6575_v48 = vcombine.low %v349_v34, %v353_v36 }
 0x1c0   :  { %v6450_v42 = vcombine.high %v222_v37, %v226_v38  ;;  %v6449_v49 = vcombine.low %v222_v37, %v226_v38  ;;  %v270_v34 = vld [vmem:[#allocation6 + $0x1d8] sm:$0xff] }
 0x1c1   :  { %3591 = vmatpush1.bf16.msra.mxu1 %v6901_v43  ;;  %v357_v43 = vld [vmem:[#allocation6 + $0x490] sm:$0xff]  ;;  %v274_v36 = vld [vmem:[#allocation6 + $0x1f8] sm:$0xff] }
 0x1c2   :  { %3714 = vmatpush1.bf16.msra.mxu0 %v6775_v45  ;;  %3592 = vmatprep.subr.bf16.mxu1 %v6910_v46  ;;  %v361_v45 = vld [vmem:[#allocation6 + $0x4b0] sm:$0xff]  ;;  %v230_v46 = vld [vmem:[#allocation6 + $0x98] sm:$0xff] }
 0x1c3   :  { %3715 = vmatprep.subr.bf16.mxu0 %v6784_v47  ;;  %v234_v47 = vld [vmem:[#allocation6 + $0xb8] sm:$0xff]  ;;  %v6584_v50 = vcombine.high %v357_v43, %v361_v45  ;;  %v6583_v59 = vcombine.low %v357_v43, %v361_v45 }
 0x1c4   :  { %v6458_v51 = vcombine.high %v230_v46, %v234_v47  ;;  %v6457_v60 = vcombine.low %v230_v46, %v234_v47 }
 0x1c5   :  { %3593 = vmatpush1.bf16.msra.mxu1 %v6909_v53  ;;  %v365_v53 = vld [vmem:[#allocation6 + $0x4d0] sm:$0xff] }
 0x1c6   :  { %3716 = vmatpush1.bf16.msra.mxu0 %v6783_v54  ;;  %3594 = vmatprep.subr.bf16.mxu1 %v6918_v55  ;;  %v369_v54 = vld [vmem:[#allocation6 + $0x4f0] sm:$0xff]  ;;  %v238_v55 = vld [vmem:[#allocation6 + $0xd8] sm:$0xff] }
 0x1c7   :  { %3717 = vmatprep.subr.bf16.mxu0 %v6792_v57  ;;  %v242_v57 = vld [vmem:[#allocation6 + $0xf8] sm:$0xff]  ;;  %v6592_v63 = vcombine.high %v365_v53, %v369_v54  ;;  %v6591_v7 = vcombine.low %v365_v53, %v369_v54 }
 0x1c8   :  { %v6466_v0 = vcombine.high %v238_v55, %v242_v57  ;;  %v6465_v8 = vcombine.low %v238_v55, %v242_v57  ;;  %v282_v53 = vld [vmem:[#allocation6 + $0x238] sm:$0xff] }
 0x1c9   :  { %3595 = vmatpush1.bf16.msra.mxu1 %v6917_v2  ;;  %v373_v2 = vld [vmem:[#allocation6 + $0x510] sm:$0xff] }
 0x1ca   :  { %3718 = vmatpush1.bf16.msra.mxu0 %v6791_v3  ;;  %3596 = vmatprep.subr.bf16.mxu1 %v6926_v5  ;;  %v377_v3 = vld [vmem:[#allocation6 + $0x530] sm:$0xff]  ;;  %v246_v5 = vld [vmem:[#allocation6 + $0x118] sm:$0xff] }
 0x1cb   :  { %3719 = vmatprep.subr.bf16.mxu0 %v6800_v6  ;;  %v250_v6 = vld [vmem:[#allocation6 + $0x138] sm:$0xff]  ;;  %v6600_v9 = vcombine.high %v373_v2, %v377_v3 }
 0x1cc   :  { %v6473_v15 = vcombine.low %v246_v5, %v250_v6 }
 0x1cd   :  { %3597 = vmatpush1.bf16.msra.mxu1 %v6925_v11  ;;  %v385_v11 = vld [vmem:[#allocation6 + $0x570] sm:$0xff] }
 0x1ce   :  { %3720 = vmatpush1.bf16.msra.mxu0 %v6799_v12  ;;  %3598 = vmatprep.subr.bf16.mxu1 %v6934_v13  ;;  %v254_v12 = vld [vmem:[#allocation6 + $0x158] sm:$0xff]  ;;  %v6608_v16 = vcombine.high %v381_v10, %v385_v11 }
 0x1cf   :  { %3721 = vmatprep.subr.bf16.mxu0 %v6808_v14  ;;  %v258_v13 = vld [vmem:[#allocation6 + $0x178] sm:$0xff]  ;;  %v6599_v14 = vcombine.low %v373_v2, %v377_v3 }
 0x1d0   :  { %v6482_v18 = vcombine.high %v254_v12, %v258_v13  ;;  %v6481_v25 = vcombine.low %v254_v12, %v258_v13  ;;  %v429_v13 = vld [vmem:[#allocation6 + $0x6d0] sm:$0xff] }
 0x1d1   :  { %3599 = vmatpush1.bf16.msra.mxu1 %v6933_v20  ;;  %v393_v20 = vld [vmem:[#allocation6 + $0x5b0] sm:$0xff] }
 0x1d2   :  { %3722 = vmatpush1.bf16.msra.mxu0 %v6807_v21  ;;  %3600 = vmatprep.subr.bf16.mxu1 %v6942_v23  ;;  %v262_v21 = vld [vmem:[#allocation6 + $0x198] sm:$0xff]  ;;  %v6616_v26 = vcombine.high %v389_v19, %v393_v20 }
 0x1d3   :  { %3723 = vmatprep.subr.bf16.mxu0 %v6816_v24  ;;  %v266_v23 = vld [vmem:[#allocation6 + $0x1b8] sm:$0xff]  ;;  %v6607_v24 = vcombine.low %v381_v10, %v385_v11 }
 0x1d4   :  { %v6490_v29 = vcombine.high %v262_v21, %v266_v23  ;;  %v6489_v45 = vcombine.low %v262_v21, %v266_v23  ;;  %v437_v23 = vld [vmem:[#allocation6 + $0x710] sm:$0xff] }
 0x1d5   :  { %3601 = vmatpush1.bf16.msra.mxu1 %v6941_v30  ;;  %v397_v30 = vld [vmem:[#allocation6 + $0x5d0] sm:$0xff] }
 0x1d6   :  { %3724 = vmatpush1.bf16.msra.mxu0 %v6815_v31  ;;  %3652 = vmatprep.subr.bf16.mxu1 %v6568_v32  ;;  %v401_v31 = vld [vmem:[#allocation6 + $0x5f0] sm:$0xff] }
 0x1d7   :  { %3775 = vmatprep.subr.bf16.mxu0 %v6442_v33  ;;  %v6623_v54 = vcombine.low %v397_v30, %v401_v31 }
 0x1d8   :  { %3603 = vmatmul.mubr.bf16.vlgmr.msra.gmra.mrb[16].mxu1 %v8175_v52 }
 0x1d9   :  { %3653 = vmatpush1.bf16.msra.mxu1 %v6567_v39  ;;  %3726 = vmatmul.mubr.bf16.vlgmr.msra.gmra.mrb[16].mxu0 %v8159_v22 }
 0x1da   :  { %3776 = vmatpush1.bf16.msra.mxu0 %v6441_v40  ;;  %3654 = vmatprep.subr.bf16.mxu1 %v6576_v41  ;;  %v6615_v40 = vcombine.low %v389_v19, %v393_v20 }
 0x1db   :  { %3777 = vmatprep.subr.bf16.mxu0 %v6450_v42  ;;  %3684 = vmatprep.mubr.bf16.mxu1 %v8161_v28 }
 0x1dc   :  { %3807 = vmatprep.mubr.bf16.mxu0 %v8151_v58  ;;  %v6474_v58 = vcombine.high %v246_v5, %v250_v6  ;;  %v421_v6 = vld [vmem:[#allocation6 + $0x690] sm:$0xff] }
 0x1dd   :  { %3655 = vmatpush1.bf16.msra.mxu1 %v6575_v48  ;;  %v6498_v48 = vcombine.high %v270_v34, %v274_v36 }
 0x1de   :  { %3778 = vmatpush1.bf16.msra.mxu0 %v6449_v49  ;;  %3656 = vmatprep.subr.bf16.mxu1 %v6584_v50  ;;  %v409_v49 = vld [vmem:[#allocation6 + $0x630] sm:$0xff] }
 0x1df   :  { %3779 = vmatprep.subr.bf16.mxu0 %v6458_v51  ;;  %v278_v51 = vld [vmem:[#allocation6 + $0x218] sm:$0xff] }
 0x1e0   :  { %v6506_v57 = vcombine.high %v278_v51, %v282_v53  ;;  %v6505_v2 = vcombine.low %v278_v51, %v282_v53  ;;  %v461_v53 = vld [vmem:[#allocation6 + $0x7d0] sm:$0xff] }
 0x1e1   :  { %3657 = vmatpush1.bf16.msra.mxu1 %v6583_v59  ;;  %v413_v59 = vld [vmem:[#allocation6 + $0x650] sm:$0xff] }
 0x1e2   :  { %3780 = vmatpush1.bf16.msra.mxu0 %v6457_v60  ;;  %3658 = vmatprep.subr.bf16.mxu1 %v6592_v63  ;;  %v417_v60 = vld [vmem:[#allocation6 + $0x670] sm:$0xff]  ;;  %v286_v63 = vld [vmem:[#allocation6 + $0x258] sm:$0xff] }
 0x1e3   :  { %3781 = vmatprep.subr.bf16.mxu0 %v6466_v0  ;;  %v6640_v3 = vcombine.high %v413_v59, %v417_v60 }
 0x1e5   :  { %3659 = vmatpush1.bf16.msra.mxu1 %v6591_v7  ;;  %v425_v7 = vld [vmem:[#allocation6 + $0x6b0] sm:$0xff] }
 0x1e6   :  { %3782 = vmatpush1.bf16.msra.mxu0 %v6465_v8  ;;  %3660 = vmatprep.subr.bf16.mxu1 %v6600_v9  ;;  %v294_v8 = vld [vmem:[#allocation6 + $0x298] sm:$0xff]  ;;  %v6648_v11 = vcombine.high %v421_v6, %v425_v7 }
 0x1e7   :  { %3783 = vmatprep.subr.bf16.mxu0 %v6474_v58  ;;  %v298_v9 = vld [vmem:[#allocation6 + $0x2b8] sm:$0xff]  ;;  %v6639_v58 = vcombine.low %v413_v59, %v417_v60 }
 0x1e8   :  { %v6522_v12 = vcombine.high %v294_v8, %v298_v9  ;;  %v6521_v19 = vcombine.low %v294_v8, %v298_v9  ;;  %v605_v9 = vld [vmem:[#allocation6 + $0xc50] sm:$0xff] }
 0x1e9   :  { %3661 = vmatpush1.bf16.msra.mxu1 %v6599_v14  ;;  %v433_v14 = vld [vmem:[#allocation6 + $0x6f0] sm:$0xff] }
 0x1ea   :  { %3784 = vmatpush1.bf16.msra.mxu0 %v6473_v15  ;;  %3662 = vmatprep.subr.bf16.mxu1 %v6608_v16  ;;  %v302_v15 = vld [vmem:[#allocation6 + $0x2d8] sm:$0xff]  ;;  %v6656_v20 = vcombine.high %v429_v13, %v433_v14 }
 0x1eb   :  { %v3358_v27 = vpop.f32.mrb[4].mxu1  ;;  %3785 = vmatprep.subr.bf16.mxu0 %v6482_v18  ;;  %v306_v16 = vld [vmem:[#allocation6 + $0x2f8] sm:$0xff]  ;;  %v6647_v18 = vcombine.low %v421_v6, %v425_v7 }
 0x1ec   :  { %v3359_v32 = vadd.f32 %v3358_v27, %v8185_v56  ;;  %v3360_v33 = vpop.f32.mrb[5].mxu1  ;;  %v8198_v37 = vpop.f32.mrb[4].mxu0  ;;  %v6624_v56 = vcombine.high %v397_v30, %v401_v31  ;;  %v6530_v21 = vcombine.high %v302_v15, %v306_v16  ;;  %v6655_v27 = vcombine.low %v429_v13, %v433_v14 }
 0x1ed   :  { %v3361_v38 = vadd.f32 %v3360_v33, %v8187_v61  ;;  %v3362_v39 = vpop.f32.mrb[6].mxu1  ;;  %3663 = vmatpush1.bf16.msra.mxu1 %v6607_v24  ;;  %v8201_v41 = vpop.f32.mrb[5].mxu0  ;;  %v405_v61 = vld [vmem:[#allocation6 + $0x610] sm:$0xff] }
 0x1ee   :  { %v8204_v42 = vadd.f32 %v8189_v1, %v3359_v32  ;;  %3786 = vmatpush1.bf16.msra.mxu0 %v6481_v25  ;;  %v3363_v43 = vpop.f32.mrb[7].mxu1  ;;  %3664 = vmatprep.subr.bf16.mxu1 %v6616_v26  ;;  %v3485_v46 = vpop.f32.mrb[6].mxu0  ;;  %v6497_v1 = vcombine.low %v270_v34, %v274_v36  ;;  %v6632_v55 = vcombine.high %v405_v61, %v409_v49  ;;  %v441_v24 = vld [vmem:[#allocation6 + $0x730] sm:$0xff]  ;;  %v310_v25 = vld [vmem:[#allocation6 + $0x318] sm:$0xff] }
 0x1ef   :  { %v8207_v47 = vadd.f32 %v8191_v4, %v3361_v38  ;;  %3787 = vmatprep.subr.bf16.mxu0 %v6490_v29  ;;  %v3486_v50 = vpop.f32.mrb[7].mxu0  ;;  %v290_v4 = vld [vmem:[#allocation6 + $0x278] sm:$0xff]  ;;  %v6631_v0 = vcombine.low %v405_v61, %v409_v49  ;;  %v6529_v29 = vcombine.low %v302_v15, %v306_v16  ;;  %v6664_v30 = vcombine.high %v437_v23, %v441_v24  ;;  %v445_v32 = vld [vmem:[#allocation6 + $0x750] sm:$0xff] }
 0x1f0   :  { %v6514_v5 = vcombine.high %v286_v63, %v290_v4  ;;  %v6513_v10 = vcombine.low %v286_v63, %v290_v4  ;;  %v314_v26 = vld [vmem:[#allocation6 + $0x338] sm:$0xff]  ;;  %v449_v33 = vld [vmem:[#allocation6 + $0x770] sm:$0xff]  ;;  %v6663_v38 = vcombine.low %v437_v23, %v441_v24 }
 0x1f1   :  { %3665 = vmatpush1.bf16.msra.mxu1 %v6615_v40  ;;  %v6538_v31 = vcombine.high %v310_v25, %v314_v26  ;;  %v318_v34 = vld [vmem:[#allocation6 + $0x358] sm:$0xff]  ;;  %v6537_v39 = vcombine.low %v310_v25, %v314_v26  ;;  %v6672_v40 = vcombine.high %v445_v32, %v449_v33  ;;  %v6671_v61 = vcombine.low %v445_v32, %v449_v33  ;;  %v597_v4 = vld [vmem:[#allocation6 + $0xc10] sm:$0xff] }
 0x1f2   :  { %3788 = vmatpush1.bf16.msra.mxu0 %v6489_v45  ;;  %3666 = vmatprep.subr.bf16.mxu1 %v6624_v56  ;;  %v322_v36 = vld [vmem:[#allocation6 + $0x378] sm:$0xff]  ;;  %v453_v45 = vld [vmem:[#allocation6 + $0x790] sm:$0xff] }
 0x1f3   :  { %3789 = vmatprep.subr.bf16.mxu0 %v6498_v48  ;;  %v6546_v43 = vcombine.high %v318_v34, %v322_v36  ;;  %v457_v56 = vld [vmem:[#allocation6 + $0x7b0] sm:$0xff]  ;;  %v326_v46 = vld [vmem:[#allocation6 + $0x398] sm:$0xff]  ;;  %v6545_v49 = vcombine.low %v318_v34, %v322_v36 }
 0x1f4   :  { %v330_v48 = vld [vmem:[#allocation6 + $0x3b8] sm:$0xff]  ;;  %v6680_v50 = vcombine.high %v453_v45, %v457_v56  ;;  %v613_v16 = vld [vmem:[#allocation6 + $0xc90] sm:$0xff] }
 0x1f5   :  { %3667 = vmatpush1.bf16.msra.mxu1 %v6623_v54  ;;  %v6554_v51 = vcombine.high %v326_v46, %v330_v48  ;;  %v465_v54 = vld [vmem:[#allocation6 + $0x7f0] sm:$0xff]  ;;  %v6553_v59 = vcombine.low %v326_v46, %v330_v48  ;;  %v510_v48 = vld [vmem:[#allocation6 + $0x958] sm:$0xff] }
 0x1f6   :  { %3790 = vmatpush1.bf16.msra.mxu0 %v6497_v1  ;;  %3668 = vmatprep.subr.bf16.mxu1 %v6632_v55  ;;  %v334_v1 = vld [vmem:[#allocation6 + $0x3d8] sm:$0xff]  ;;  %v6688_v60 = vcombine.high %v461_v53, %v465_v54  ;;  %v621_v26 = vld [vmem:[#allocation6 + $0xcd0] sm:$0xff] }
 0x1f7   :  { %3791 = vmatprep.subr.bf16.mxu0 %v6506_v57  ;;  %v338_v55 = vld [vmem:[#allocation6 + $0x3f8] sm:$0xff]  ;;  %v6679_v57 = vcombine.low %v453_v45, %v457_v56  ;;  %v629_v34 = vld [vmem:[#allocation6 + $0xd10] sm:$0xff] }
 0x1f8   :  { %v6562_v63 = vcombine.high %v334_v1, %v338_v55  ;;  %v6561_v6 = vcombine.low %v334_v1, %v338_v55  ;;  %v633_v36 = vld [vmem:[#allocation6 + $0xd30] sm:$0xff]  ;;  %v518_v55 = vld [vmem:[#allocation6 + $0x998] sm:$0xff] }
 0x1f9   :  { %3669 = vmatpush1.bf16.msra.mxu1 %v6631_v0  ;;  %v601_v0 = vld [vmem:[#allocation6 + $0xc30] sm:$0xff]  ;;  %v6856_v45 = vcombine.high %v629_v34, %v633_v36 }
 0x1fa   :  { %3792 = vmatpush1.bf16.msra.mxu0 %v6505_v2  ;;  %3670 = vmatprep.subr.bf16.mxu1 %v6640_v3  ;;  %v470_v2 = vld [vmem:[#allocation6 + $0x818] sm:$0xff]  ;;  %v6824_v7 = vcombine.high %v597_v4, %v601_v0  ;;  %v637_v56 = vld [vmem:[#allocation6 + $0xd50] sm:$0xff] }
 0x1fb   :  { %3793 = vmatprep.subr.bf16.mxu0 %v6514_v5  ;;  %v474_v3 = vld [vmem:[#allocation6 + $0x838] sm:$0xff]  ;;  %v6687_v5 = vcombine.low %v461_v53, %v465_v54  ;;  %v641_v46 = vld [vmem:[#allocation6 + $0xd70] sm:$0xff] }
 0x1fc   :  { %v6698_v8 = vcombine.high %v470_v2, %v474_v3  ;;  %v6697_v13 = vcombine.low %v470_v2, %v474_v3  ;;  %v645_v54 = vld [vmem:[#allocation6 + $0xd90] sm:$0xff] }
 0x1fd   :  { %3671 = vmatpush1.bf16.msra.mxu1 %v6639_v58  ;;  %v609_v58 = vld [vmem:[#allocation6 + $0xc70] sm:$0xff] }
 0x1fe   :  { %3794 = vmatpush1.bf16.msra.mxu0 %v6513_v10  ;;  %3672 = vmatprep.subr.bf16.mxu1 %v6648_v11  ;;  %v478_v10 = vld [vmem:[#allocation6 + $0x858] sm:$0xff]  ;;  %v6832_v14 = vcombine.high %v605_v9, %v609_v58  ;;  %v649_v1 = vld [vmem:[#allocation6 + $0xdb0] sm:$0xff] }
 0x1ff   :  { %3795 = vmatprep.subr.bf16.mxu0 %v6522_v12  ;;  %v482_v11 = vld [vmem:[#allocation6 + $0x878] sm:$0xff]  ;;  %v6823_v12 = vcombine.low %v597_v4, %v601_v0  ;;  %v653_v2 = vld [vmem:[#allocation6 + $0xdd0] sm:$0xff] }
 0x200   :  { %v6706_v15 = vcombine.high %v478_v10, %v482_v11  ;;  %v6705_v23 = vcombine.low %v478_v10, %v482_v11  ;;  %v657_v3 = vld [vmem:[#allocation6 + $0xdf0] sm:$0xff]  ;;  %v6871_v11 = vcombine.low %v645_v54, %v649_v1 }
 0x201   :  { %3673 = vmatpush1.bf16.msra.mxu1 %v6647_v18  ;;  %v617_v18 = vld [vmem:[#allocation6 + $0xcb0] sm:$0xff] }
 0x202   :  { %3796 = vmatpush1.bf16.msra.mxu0 %v6521_v19  ;;  %3674 = vmatprep.subr.bf16.mxu1 %v6656_v20  ;;  %v486_v19 = vld [vmem:[#allocation6 + $0x898] sm:$0xff]  ;;  %v6840_v24 = vcombine.high %v613_v16, %v617_v18 }
 0x203   :  { %3797 = vmatprep.subr.bf16.mxu0 %v6530_v21  ;;  %v490_v20 = vld [vmem:[#allocation6 + $0x8b8] sm:$0xff]  ;;  %v6831_v21 = vcombine.low %v605_v9, %v609_v58 }
 0x204   :  { %v6714_v25 = vcombine.high %v486_v19, %v490_v20 }
 0x205   :  { %3675 = vmatpush1.bf16.msra.mxu1 %v6655_v27  ;;  %v625_v27 = vld [vmem:[#allocation6 + $0xcf0] sm:$0xff] }
 0x206   :  { %3798 = vmatpush1.bf16.msra.mxu0 %v6529_v29  ;;  %3676 = vmatprep.subr.bf16.mxu1 %v6664_v30  ;;  %v494_v29 = vld [vmem:[#allocation6 + $0x8d8] sm:$0xff]  ;;  %v6848_v32 = vcombine.high %v621_v26, %v625_v27 }
 0x207   :  { %3799 = vmatprep.subr.bf16.mxu0 %v6538_v31  ;;  %v498_v30 = vld [vmem:[#allocation6 + $0x8f8] sm:$0xff]  ;;  %v6839_v31 = vcombine.low %v613_v16, %v617_v18  ;;  %v661_v18 = vld [vmem:[#allocation6 + $0xe10] sm:$0xff] }
 0x208   :  { %v6722_v33 = vcombine.high %v494_v29, %v498_v30 }
 0x209   :  { %3677 = vmatpush1.bf16.msra.mxu1 %v6663_v38  ;;  %v502_v38 = vld [vmem:[#allocation6 + $0x918] sm:$0xff] }
 0x20a   :  { %3800 = vmatpush1.bf16.msra.mxu0 %v6537_v39  ;;  %3678 = vmatprep.subr.bf16.mxu1 %v6672_v40  ;;  %v506_v39 = vld [vmem:[#allocation6 + $0x938] sm:$0xff]  ;;  %v6847_v40 = vcombine.low %v621_v26, %v625_v27  ;;  %v669_v27 = vld [vmem:[#allocation6 + $0xe50] sm:$0xff] }
 0x20b   :  { %3801 = vmatprep.subr.bf16.mxu0 %v6546_v43  ;;  %v6721_v43 = vcombine.low %v494_v29, %v498_v30  ;;  %v673_v29 = vld [vmem:[#allocation6 + $0xe70] sm:$0xff]  ;;  %v542_v30 = vld [vmem:[#allocation6 + $0xa58] sm:$0xff] }
 0x20d   :  { %3679 = vmatpush1.bf16.msra.mxu1 %v6671_v61  ;;  %v514_v61 = vld [vmem:[#allocation6 + $0x978] sm:$0xff] }
 0x20e   :  { %3802 = vmatpush1.bf16.msra.mxu0 %v6545_v49  ;;  %3680 = vmatprep.subr.bf16.mxu1 %v6680_v50  ;;  %v6855_v49 = vcombine.low %v629_v34, %v633_v36  ;;  %v6729_v50 = vcombine.low %v502_v38, %v506_v39  ;;  %v6738_v53 = vcombine.high %v510_v48, %v514_v61  ;;  %v677_v36 = vld [vmem:[#allocation6 + $0xe90] sm:$0xff] }
 0x20f   :  { %3803 = vmatprep.subr.bf16.mxu0 %v6554_v51  ;;  %v6864_v51 = vcombine.high %v637_v56, %v641_v46 }
 0x211   :  { %3681 = vmatpush1.bf16.msra.mxu1 %v6679_v57  ;;  %v522_v57 = vld [vmem:[#allocation6 + $0x9b8] sm:$0xff] }
 0x212   :  { %3804 = vmatpush1.bf16.msra.mxu0 %v6553_v59  ;;  %3682 = vmatprep.subr.bf16.mxu1 %v6688_v60  ;;  %v6863_v59 = vcombine.low %v637_v56, %v641_v46  ;;  %v6737_v60 = vcombine.low %v510_v48, %v514_v61  ;;  %v6746_v0 = vcombine.high %v518_v55, %v522_v57  ;;  %v685_v46 = vld [vmem:[#allocation6 + $0xed0] sm:$0xff]  ;;  %v558_v61 = vld [vmem:[#allocation6 + $0xad8] sm:$0xff] }
 0x213   :  { %3805 = vmatprep.subr.bf16.mxu0 %v6562_v63  ;;  %v6872_v63 = vcombine.high %v645_v54, %v649_v1  ;;  %v689_v48 = vld [vmem:[#allocation6 + $0xef0] sm:$0xff] }
 0x214   :  { %v6912_v54 = vcombine.high %v685_v46, %v689_v48 }
 0x215   :  { %3683 = vmatpush1.bf16.msra.mxu1 %v6687_v5 }
 0x216   :  { %3806 = vmatpush1.bf16.msra.mxu0 %v6561_v6  ;;  %3734 = vmatprep.subr.bf16.mxu1 %v6824_v7  ;;  %v526_v7 = vld [vmem:[#allocation6 + $0x9d8] sm:$0xff] }
 0x217   :  { %3857 = vmatprep.subr.bf16.mxu0 %v6698_v8  ;;  %v530_v8 = vld [vmem:[#allocation6 + $0x9f8] sm:$0xff] }
 0x218   :  { %3685 = vmatmul.mubr.bf16.vlgmr.msra.gmra.mrb[20].mxu1 %v8167_v35  ;;  %v6754_v16 = vcombine.high %v526_v7, %v530_v8 }
 0x219   :  { %3735 = vmatpush1.bf16.msra.mxu1 %v6823_v12  ;;  %3808 = vmatmul.mubr.bf16.vlgmr.msra.gmra.mrb[20].mxu0 %v8157_v17  ;;  %v6713_v17 = vcombine.low %v486_v19, %v490_v20  ;;  %v665_v19 = vld [vmem:[#allocation6 + $0xe30] sm:$0xff] }
 0x21a   :  { %3858 = vmatpush1.bf16.msra.mxu0 %v6697_v13  ;;  %3736 = vmatprep.subr.bf16.mxu1 %v6832_v14  ;;  %v6745_v14 = vcombine.low %v518_v55, %v522_v57  ;;  %v693_v55 = vld [vmem:[#allocation6 + $0xf10] sm:$0xff] }
 0x21b   :  { %3859 = vmatprep.subr.bf16.mxu0 %v6706_v15  ;;  %3766 = vmatprep.mubr.bf16.mxu1 %v8169_v44  ;;  %v6880_v15 = vcombine.high %v653_v2, %v657_v3  ;;  %v697_v57 = vld [vmem:[#allocation6 + $0xf30] sm:$0xff] }
 0x21c   :  { %3889 = vmatprep.mubr.bf16.mxu0 %v8153_v62  ;;  %v6730_v62 = vcombine.high %v502_v38, %v506_v39  ;;  %v681_v38 = vld [vmem:[#allocation6 + $0xeb0] sm:$0xff]  ;;  %v550_v39 = vld [vmem:[#allocation6 + $0xa98] sm:$0xff] }
 0x21d   :  { %3737 = vmatpush1.bf16.msra.mxu1 %v6831_v21  ;;  %v534_v21 = vld [vmem:[#allocation6 + $0xa18] sm:$0xff] }
 0x21e   :  { %3860 = vmatpush1.bf16.msra.mxu0 %v6705_v23  ;;  %3738 = vmatprep.subr.bf16.mxu1 %v6840_v24  ;;  %v538_v23 = vld [vmem:[#allocation6 + $0xa38] sm:$0xff]  ;;  %v6753_v24 = vcombine.low %v526_v7, %v530_v8  ;;  %v705_v7 = vld [vmem:[#allocation6 + $0xf70] sm:$0xff] }
 0x21f   :  { %3861 = vmatprep.subr.bf16.mxu0 %v6714_v25  ;;  %v6888_v25 = vcombine.high %v661_v18, %v665_v19  ;;  %v6762_v26 = vcombine.high %v534_v21, %v538_v23  ;;  %v574_v8 = vld [vmem:[#allocation6 + $0xb58] sm:$0xff] }
 0x221   :  { %3739 = vmatpush1.bf16.msra.mxu1 %v6839_v31  ;;  %v546_v31 = vld [vmem:[#allocation6 + $0xa78] sm:$0xff] }
 0x222   :  { %3862 = vmatpush1.bf16.msra.mxu0 %v6713_v17  ;;  %3740 = vmatprep.subr.bf16.mxu1 %v6848_v32  ;;  %v6887_v17 = vcombine.low %v661_v18, %v665_v19  ;;  %v6761_v32 = vcombine.low %v534_v21, %v538_v23  ;;  %v6770_v34 = vcombine.high %v542_v30, %v546_v31  ;;  %v709_v18 = vld [vmem:[#allocation6 + $0xf90] sm:$0xff]  ;;  %v586_v21 = vld [vmem:[#allocation6 + $0xbb8] sm:$0xff] }
 0x223   :  { %3863 = vmatprep.subr.bf16.mxu0 %v6722_v33  ;;  %v6896_v33 = vcombine.high %v669_v27, %v673_v29  ;;  %v713_v19 = vld [vmem:[#allocation6 + $0xfb0] sm:$0xff] }
 0x225   :  { %3741 = vmatpush1.bf16.msra.mxu1 %v6847_v40  ;;  %v554_v40 = vld [vmem:[#allocation6 + $0xab8] sm:$0xff] }
 0x226   :  { %3864 = vmatpush1.bf16.msra.mxu0 %v6721_v43  ;;  %3742 = vmatprep.subr.bf16.mxu1 %v6856_v45  ;;  %v6895_v43 = vcombine.low %v669_v27, %v673_v29  ;;  %v6769_v45 = vcombine.low %v542_v30, %v546_v31  ;;  %v6778_v56 = vcombine.high %v550_v39, %v554_v40  ;;  %v717_v27 = vld [vmem:[#allocation6 + $0xfd0] sm:$0xff]  ;;  %v590_v30 = vld [vmem:[#allocation6 + $0xbd8] sm:$0xff] }
 0x227   :  { %3865 = vmatprep.subr.bf16.mxu0 %v6730_v62  ;;  %v6904_v62 = vcombine.high %v677_v36, %v681_v38  ;;  %v721_v29 = vld [vmem:[#allocation6 + $0xff0] sm:$0xff]  ;;  %v594_v31 = vld [vmem:[#allocation6 + $0xbf8] sm:$0xff] }
 0x229   :  { %3743 = vmatpush1.bf16.msra.mxu1 %v6855_v49  ;;  %v562_v49 = vld [vmem:[#allocation6 + $0xaf8] sm:$0xff] }
 0x22a   :  { %3866 = vmatpush1.bf16.msra.mxu0 %v6729_v50  ;;  %3744 = vmatprep.subr.bf16.mxu1 %v6864_v51  ;;  %v139_v50 = vlaneseq  ;;  %v6903_v51 = vcombine.low %v677_v36, %v681_v38  ;;  %v6786_v1 = vcombine.high %v558_v61, %v562_v49  ;;  %v6818_v36 = vcombine.high %v590_v30, %v594_v31  ;;  %v342_v38 = vld [vmem:[#allocation6 + $0x418] sm:$0xff] }
 0x22b   :  { %v3440_v4 = vpop.f32.mrb[8].mxu1  ;;  %3867 = vmatprep.subr.bf16.mxu0 %v6738_v53  ;;  %v6777_v53 = vcombine.low %v550_v39, %v554_v40  ;;  %v346_v39 = vld [vmem:[#allocation6 + $0x438] sm:$0xff] }
 0x22c   :  { %v8214_v5 = vadd.f32 %v3440_v4, %v8204_v42  ;;  %v3442_v6 = vpop.f32.mrb[9].mxu1  ;;  %v8216_v9 = vpop.f32.mrb[8].mxu0  ;;  %v6911_v4 = vcombine.low %v685_v46, %v689_v48  ;;  %v354_v46 = vld [vmem:[#allocation6 + $0x478] sm:$0xff]  ;;  %v6569_v48 = vcombine.low %v342_v38, %v346_v39 }
 0x22d   :  { %v8219_v58 = vadd.f32 %v3442_v6, %v8207_v47  ;;  %v3444_v10 = vpop.f32.mrb[10].mxu1  ;;  %3745 = vmatpush1.bf16.msra.mxu1 %v6863_v59  ;;  %v8221_v12 = vpop.f32.mrb[9].mxu0  ;;  %v6879_v47 = vcombine.low %v653_v2, %v657_v3  ;;  %v566_v59 = vld [vmem:[#allocation6 + $0xb18] sm:$0xff]  ;;  %v6920_v2 = vcombine.high %v693_v55, %v697_v57  ;;  %v701_v6 = vld [vmem:[#allocation6 + $0xf50] sm:$0xff] }
 0x22e   :  { %3868 = vmatpush1.bf16.msra.mxu0 %v6737_v60  ;;  %v3445_v13 = vpop.f32.mrb[11].mxu1  ;;  %3746 = vmatprep.subr.bf16.mxu1 %v6872_v63  ;;  %v3567_v42 = vpop.f32.mrb[10].mxu0  ;;  %v570_v60 = vld [vmem:[#allocation6 + $0xb38] sm:$0xff]  ;;  %v8223_v63 = vshrl.u32 %v139_v50, 7 }
 0x22f   :  { %3869 = vmatprep.subr.bf16.mxu0 %v6746_v0  ;;  %v3568_v20 = vpop.f32.mrb[11].mxu0  ;;  %v6785_v0 = vcombine.low %v558_v61, %v562_v49  ;;  %v6794_v3 = vcombine.high %v566_v59, %v570_v60  ;;  %v578_v10 = vld [vmem:[#allocation6 + $0xb78] sm:$0xff]  ;;  %v6919_v13 = vcombine.low %v693_v55, %v697_v57  ;;  %v6928_v42 = vcombine.high %v701_v6, %v705_v7 }
 0x230   :  { %v582_v20 = vld [vmem:[#allocation6 + $0xb98] sm:$0xff] }
 0x231   :  { %3747 = vmatpush1.bf16.msra.mxu1 %v6871_v11  ;;  %v8226_v11 = vsub.s32 1, %v8223_v63  ;;  %v7317_v49 = vld [vmem:[#allocation9] ss:$16 sps:$4 sm:$0xff]  }
 0x232   :  { %3870 = vmatpush1.bf16.msra.mxu0 %v6745_v14  ;;  %3748 = vmatprep.subr.bf16.mxu1 %v6880_v15  ;;  %v8228_v14 = vld [vmem:[#allocation8] sm:$0xff]  ;;  %v6793_v15 = vcombine.low %v566_v59, %v570_v60  ;;  %v7320_v57 = vld [vmem:[#allocation9 + $0x20] ss:$16 sps:$4 sm:$0xff]   ;;  %v7325_v60 = vld [vmem:[#allocation9 + $0x44] ss:$16 sps:$4 sm:$0xff]  }
 0x233   :  { %3871 = vmatprep.subr.bf16.mxu0 %v6754_v16  ;;  %v6802_v16 = vcombine.high %v574_v8, %v578_v10  ;;  %v146_v23 = vrot.slane %v8228_v14, %v8226_v11 }
 0x235   :  { %3749 = vmatpush1.bf16.msra.mxu1 %v6879_v47  ;;  %v6927_v47 = vcombine.low %v701_v6, %v705_v7  ;;  %v7328_v6 = vld [vmem:[#allocation9 + $0x64] ss:$16 sps:$4 sm:$0xff]  }
 0x236   :  { %3872 = vmatpush1.bf16.msra.mxu0 %v6753_v24  ;;  %3750 = vmatprep.subr.bf16.mxu1 %v6888_v25  ;;  %v6801_v24 = vcombine.low %v574_v8, %v578_v10  ;;  %v6936_v25 = vcombine.high %v709_v18, %v713_v19  ;;  %v374_v7 = vld [vmem:[#allocation6 + $0x518] sm:$0xff] }
 0x237   :  { %3873 = vmatprep.subr.bf16.mxu0 %v6762_v26  ;;  %v6810_v26 = vcombine.high %v582_v20, %v586_v21  ;;  %v378_v8 = vld [vmem:[#allocation6 + $0x538] sm:$0xff] }
 0x239   :  { %3751 = vmatpush1.bf16.msra.mxu1 %v6887_v17  ;;  %v3940_v17 = vadd.f32 %v8219_v58, %v146_v23  ;;  %v7319_v58 = vld [vmem:[#allocation9 + $0x4] ss:$16 sps:$4 sm:$0xff]  }
 0x23a   :  { %3874 = vmatpush1.bf16.msra.mxu0 %v6761_v32  ;;  %3752 = vmatprep.subr.bf16.mxu1 %v6896_v33  ;;  %v6935_v32 = vcombine.low %v709_v18, %v713_v19  ;;  %v6809_v33 = vcombine.low %v582_v20, %v586_v21  ;;  %v6601_v18 = vcombine.low %v374_v7, %v378_v8  ;;  %v7329_v19 = vld [vmem:[#allocation9 + $0x80] ss:$16 sps:$4 sm:$0xff]   ;;  %v7334_v21 = vld [vmem:[#allocation9 + $0xa4] ss:$16 sps:$4 sm:$0xff]  }
 0x23b   :  { %3875 = vmatprep.subr.bf16.mxu0 %v6770_v34  ;;  %v6944_v34 = vcombine.high %v717_v27, %v721_v29  ;;  %v3975_v40 = vmul.f32 0.2, %v3940_v17  ;;  %vm3967_vm0 = vcmp.gt.f32.partialorder %v3940_v17, 0.0  ;;  %v390_v23 = vld [vmem:[#allocation6 + $0x598] sm:$0xff] }
 0x23d   :  { %3753 = vmatpush1.bf16.msra.mxu1 %v6895_v43  ;;  %v6943_v43 = vcombine.low %v717_v27, %v721_v29  ;;  %v3983_v61 = vsel %vm3967_vm0, %v3940_v17, %v3975_v40  ;;  %v7337_v29 = vld [vmem:[#allocation9 + $0xc4] ss:$16 sps:$4 sm:$0xff]  }
 0x23e   :  { %3876 = vmatpush1.bf16.msra.mxu0 %v6769_v45  ;;  %3754 = vmatprep.subr.bf16.mxu1 %v6904_v62  ;;  %v6817_v45 = vcombine.low %v590_v30, %v594_v31  ;;  %v6570_v62 = vcombine.high %v342_v38, %v346_v39  ;;  %v398_v30 = vld [vmem:[#allocation6 + $0x5d8] sm:$0xff] }
 0x23f   :  { %3877 = vmatprep.subr.bf16.mxu0 %v6778_v56  ;;  %v350_v56 = vld [vmem:[#allocation6 + $0x458] sm:$0xff] }
 0x240   :  { %v6578_v50 = vcombine.high %v350_v56, %v354_v46  ;;  %v6577_v55 = vcombine.low %v350_v56, %v354_v46  ;;  %v402_v31 = vld [vmem:[#allocation6 + $0x5f8] sm:$0xff] }
 0x241   :  { %3755 = vmatpush1.bf16.msra.mxu1 %v6903_v51  ;;  %v7322_v51 = vld [vmem:[#allocation9 + $0x24] ss:$16 sps:$4 sm:$0xff]  }
 0x242   :  { %3878 = vmatpush1.bf16.msra.mxu0 %v6777_v53  ;;  %3756 = vmatprep.subr.bf16.mxu1 %v6912_v54  ;;  %v358_v53 = vld [vmem:[#allocation6 + $0x498] sm:$0xff] }
 0x243   :  { %3879 = vmatprep.subr.bf16.mxu0 %v6786_v1  ;;  %v362_v54 = vld [vmem:[#allocation6 + $0x4b8] sm:$0xff]  ;;  %v8234_v1 = vpack.c.bf16 %v3983_v61, %v3983_v61  ;;  %v6625_v61 = vcombine.low %v398_v30, %v402_v31 }
 0x244   :  { %v6586_v59 = vcombine.high %v358_v53, %v362_v54  ;;  %v7340_v56 = vld [vmem:[#allocation9 + $0xe4] ss:$16 sps:$4 sm:$0xff]  }
 0x245   :  { %3757 = vmatpush1.bf16.msra.mxu1 %v6911_v4  ;;  %v366_v4 = vld [vmem:[#allocation6 + $0x4d8] sm:$0xff] }
 0x246   :  { %3880 = vmatpush1.bf16.msra.mxu0 %v6785_v0  ;;  %3758 = vmatprep.subr.bf16.mxu1 %v6920_v2  ;;  %v370_v0 = vld [vmem:[#allocation6 + $0x4f8] sm:$0xff]  ;;  %v6585_v2 = vcombine.low %v358_v53, %v362_v54 }
 0x247   :  { %3881 = vmatprep.subr.bf16.mxu0 %v6794_v3  ;;  %v7323_v3 = vld [vmem:[#allocation9 + $0x40] ss:$16 sps:$4 sm:$0xff]   ;;  %v6593_v10 = vcombine.low %v366_v4, %v370_v0 }
 0x248   :  { %v410_v46 = vld [vmem:[#allocation6 + $0x638] sm:$0xff] }
 0x249   :  { %3759 = vmatpush1.bf16.msra.mxu1 %v6919_v13  ;;  %v7326_v13 = vld [vmem:[#allocation9 + $0x60] ss:$16 sps:$4 sm:$0xff]  }
 0x24a   :  { %3882 = vmatpush1.bf16.msra.mxu0 %v6793_v15  ;;  %3760 = vmatprep.subr.bf16.mxu1 %v6928_v42  ;;  %v6602_v15 = vcombine.high %v374_v7, %v378_v8  ;;  %v7331_v42 = vld [vmem:[#allocation9 + $0x84] ss:$16 sps:$4 sm:$0xff]   ;;  %v7347_v8 = vld [vmem:[#allocation9 + $0x140] ss:$16 sps:$4 sm:$0xff]  }
 0x24b   :  { %3883 = vmatprep.subr.bf16.mxu0 %v6802_v16  ;;  %v382_v16 = vld [vmem:[#allocation6 + $0x558] sm:$0xff] }
 0x24c   :  { %v418_v53 = vld [vmem:[#allocation6 + $0x678] sm:$0xff] }
 0x24d   :  { %3761 = vmatpush1.bf16.msra.mxu1 %v6927_v47  ;;  %v394_v47 = vld [vmem:[#allocation6 + $0x5b8] sm:$0xff] }
 0x24e   :  { %3884 = vmatpush1.bf16.msra.mxu0 %v6801_v24  ;;  %3762 = vmatprep.subr.bf16.mxu1 %v6936_v25  ;;  %v7332_v25 = vld [vmem:[#allocation9 + $0xa0] ss:$16 sps:$4 sm:$0xff]   ;;  %v6617_v38 = vcombine.low %v390_v23, %v394_v47 }
 0x24f   :  { %3885 = vmatprep.subr.bf16.mxu0 %v6810_v26  ;;  %v6618_v26 = vcombine.high %v390_v23, %v394_v47  ;;  %v8252_v23 = vsub.s32 0, %v8223_v63 }
 0x251   :  { %3763 = vmatpush1.bf16.msra.mxu1 %v6935_v32 }
 0x252   :  { %3886 = vmatpush1.bf16.msra.mxu0 %v6809_v33  ;;  %3764 = vmatprep.subr.bf16.mxu1 %v6944_v34 }
 0x253   :  { %3887 = vmatprep.subr.bf16.mxu0 %v6818_v36 }
 0x255   :  { %3765 = vmatpush1.bf16.msra.mxu1 %v6943_v43 }
 0x256   :  { %3888 = vmatpush1.bf16.msra.mxu0 %v6817_v45  ;;  %3816 = vmatprep.subr.bf16.mxu1 %v6570_v62  ;;  %v7335_v45 = vld [vmem:[#allocation9 + $0xc0] ss:$16 sps:$4 sm:$0xff]   ;;  %v6626_v62 = vcombine.high %v398_v30, %v402_v31  ;;  %v142_v30 = vrot.slane %v8228_v14, %v8252_v23 }
 0x257   :  { %5556 = vmatprep.subr.bf16.mxu0 %v7319_v58 }
 0x258   :  { %3767 = vmatmul.mubr.bf16.vlgmr.msra.gmra.mrb[24].mxu1 %v8175_v52 }
 0x259   :  { %3890 = vmatmul.mubr.bf16.vlgmr.msra.gmra.mrb[24].mxu0 %v8159_v22  ;;  %3817 = vmatpush1.bf16.msra.mxu1 %v6569_v48  ;;  %v6594_v22 = vcombine.high %v366_v4, %v370_v0  ;;  %v7344_v0 = vld [vmem:[#allocation9 + $0x120] ss:$16 sps:$4 sm:$0xff]  }
 0x25a   :  { %5557 = vmatpush1.bf16.msra.mxu0 %v7317_v49  ;;  %5588 = vmatprep.mubr.bf16.mxu0 %v8234_v1 }
 0x25b   :  { %3818 = vmatprep.subr.bf16.mxu1 %v6578_v50  ;;  %5558 = vmatprep.subr.bf16.mxu0 %v7322_v51  ;;  %v7343_v50 = vld [vmem:[#allocation9 + $0x104] ss:$16 sps:$4 sm:$0xff]  }
 0x25c   :  { %3848 = vmatprep.mubr.bf16.mxu1 %v8161_v28  ;;  %v386_v28 = vld [vmem:[#allocation6 + $0x578] sm:$0xff] }
 0x25d   :  { %3819 = vmatpush1.bf16.msra.mxu1 %v6577_v55  ;;  %v6610_v20 = vcombine.high %v382_v16, %v386_v28  ;;  %v6609_v24 = vcombine.low %v382_v16, %v386_v28  ;;  %v414_v51 = vld [vmem:[#allocation6 + $0x658] sm:$0xff] }
 0x25e   :  { %5559 = vmatpush1.bf16.msra.mxu0 %v7320_v57  ;;  %3820 = vmatprep.subr.bf16.mxu1 %v6586_v59  ;;  %v6642_v55 = vcombine.high %v414_v51, %v418_v53  ;;  %v7346_v57 = vld [vmem:[#allocation9 + $0x124] ss:$16 sps:$4 sm:$0xff]   ;;  %v6641_v4 = vcombine.low %v414_v51, %v418_v53  ;;  %v7350_v28 = vld [vmem:[#allocation9 + $0x160] ss:$16 sps:$4 sm:$0xff]  }
 0x25f   :  { %5560 = vmatprep.subr.bf16.mxu0 %v7325_v60  ;;  %v422_v59 = vld [vmem:[#allocation6 + $0x698] sm:$0xff] }
 0x260   :  { %v426_v60 = vld [vmem:[#allocation6 + $0x6b8] sm:$0xff] }
 0x261   :  { %3821 = vmatpush1.bf16.msra.mxu1 %v6585_v2  ;;  %v6650_v2 = vcombine.high %v422_v59, %v426_v60  ;;  %v6649_v7 = vcombine.low %v422_v59, %v426_v60  ;;  %v610_v51 = vld [vmem:[#allocation6 + $0xc78] sm:$0xff] }
 0x262   :  { %5561 = vmatpush1.bf16.msra.mxu0 %v7323_v3  ;;  %3822 = vmatprep.subr.bf16.mxu1 %v6594_v22  ;;  %v7349_v3 = vld [vmem:[#allocation9 + $0x144] ss:$16 sps:$4 sm:$0xff]  }
 0x263   :  { %5562 = vmatprep.subr.bf16.mxu0 %v7328_v6  ;;  %v430_v22 = vld [vmem:[#allocation6 + $0x6d8] sm:$0xff] }
 0x264   :  { %v434_v6 = vld [vmem:[#allocation6 + $0x6f8] sm:$0xff] }
 0x265   :  { %3823 = vmatpush1.bf16.msra.mxu1 %v6593_v10  ;;  %v6658_v10 = vcombine.high %v430_v22, %v434_v6  ;;  %v6657_v16 = vcombine.low %v430_v22, %v434_v6  ;;  %v7370_v59 = vld [vmem:[#allocation9 + $0x224] ss:$16 sps:$4 sm:$0xff]  }
 0x266   :  { %5563 = vmatpush1.bf16.msra.mxu0 %v7326_v13  ;;  %3824 = vmatprep.subr.bf16.mxu1 %v6602_v15  ;;  %v7352_v13 = vld [vmem:[#allocation9 + $0x164] ss:$16 sps:$4 sm:$0xff]  }
 0x267   :  { %5564 = vmatprep.subr.bf16.mxu0 %v7331_v42  ;;  %v438_v15 = vld [vmem:[#allocation6 + $0x718] sm:$0xff] }
 0x268   :  { %v442_v42 = vld [vmem:[#allocation6 + $0x738] sm:$0xff] }
 0x269   :  { %3825 = vmatpush1.bf16.msra.mxu1 %v6601_v18  ;;  %v6666_v18 = vcombine.high %v438_v15, %v442_v42  ;;  %v6665_v47 = vcombine.low %v438_v15, %v442_v42  ;;  %v614_v60 = vld [vmem:[#allocation6 + $0xc98] sm:$0xff] }
 0x26a   :  { %5565 = vmatpush1.bf16.msra.mxu0 %v7329_v19  ;;  %3826 = vmatprep.subr.bf16.mxu1 %v6610_v20  ;;  %v7355_v19 = vld [vmem:[#allocation9 + $0x184] ss:$16 sps:$4 sm:$0xff]  }
 0x26b   :  { %v3522_v27 = vpop.f32.mrb[12].mxu1  ;;  %5566 = vmatprep.subr.bf16.mxu0 %v7334_v21  ;;  %v446_v20 = vld [vmem:[#allocation6 + $0x758] sm:$0xff] }
 0x26c   :  { %v3523_v17 = vadd.f32 %v3522_v27, %v8198_v37  ;;  %v3524_v32 = vpop.f32.mrb[13].mxu1  ;;  %v8240_v33 = vpop.f32.mrb[12].mxu0  ;;  %v450_v21 = vld [vmem:[#allocation6 + $0x778] sm:$0xff] }
 0x26d   :  { %v3525_v34 = vadd.f32 %v3524_v32, %v8201_v41  ;;  %v3526_v36 = vpop.f32.mrb[14].mxu1  ;;  %3827 = vmatpush1.bf16.msra.mxu1 %v6609_v24  ;;  %v8243_v39 = vpop.f32.mrb[13].mxu0  ;;  %v406_v41 = vld [vmem:[#allocation6 + $0x618] sm:$0xff]  ;;  %v6673_v31 = vcombine.low %v446_v20, %v450_v21 }
 0x26e   :  { %v8246_v40 = vadd.f32 %v8216_v9, %v3523_v17  ;;  %5567 = vmatpush1.bf16.msra.mxu0 %v7332_v25  ;;  %v3527_v43 = vpop.f32.mrb[15].mxu1  ;;  %3828 = vmatprep.subr.bf16.mxu1 %v6618_v26  ;;  %v3649_v58 = vpop.f32.mrb[14].mxu0  ;;  %v7338_v9 = vld [vmem:[#allocation9 + $0xe0] ss:$16 sps:$4 sm:$0xff]   ;;  %v6634_v49 = vcombine.high %v406_v41, %v410_v46  ;;  %v6633_v54 = vcombine.low %v406_v41, %v410_v46  ;;  %v7358_v26 = vld [vmem:[#allocation9 + $0x1a4] ss:$16 sps:$4 sm:$0xff]  }
 0x26f   :  { %v8249_v37 = vadd.f32 %v8221_v12, %v3525_v34  ;;  %5568 = vmatprep.subr.bf16.mxu0 %v7337_v29  ;;  %v3650_v48 = vpop.f32.mrb[15].mxu0  ;;  %v7341_v12 = vld [vmem:[#allocation9 + $0x100] ss:$16 sps:$4 sm:$0xff]   ;;  %v6674_v25 = vcombine.high %v446_v20, %v450_v21  ;;  %v7361_v34 = vld [vmem:[#allocation9 + $0x1c4] ss:$16 sps:$4 sm:$0xff]   ;;  %v3939_v43 = vadd.f32 %v8214_v5, %v142_v30 }
 0x270   :  { %v7353_v24 = vld [vmem:[#allocation9 + $0x180] ss:$16 sps:$4 sm:$0xff]   ;;  %v7367_v5 = vld [vmem:[#allocation9 + $0x204] ss:$16 sps:$4 sm:$0xff]  }
 0x271   :  { %3829 = vmatpush1.bf16.msra.mxu1 %v6617_v38  ;;  %v454_v27 = vld [vmem:[#allocation6 + $0x798] sm:$0xff]  ;;  %v3974_v48 = vmul.f32 0.2, %v3939_v43  ;;  %vm3966_vm1 = vcmp.gt.f32.partialorder %v3939_v43, 0.0 }
 0x272   :  { %5569 = vmatpush1.bf16.msra.mxu0 %v7335_v45  ;;  %3830 = vmatprep.subr.bf16.mxu1 %v6626_v62  ;;  %v458_v29 = vld [vmem:[#allocation6 + $0x7b8] sm:$0xff] }
 0x273   :  { %5570 = vmatprep.subr.bf16.mxu0 %v7340_v56  ;;  %v7356_v17 = vld [vmem:[#allocation9 + $0x1a0] ss:$16 sps:$4 sm:$0xff]   ;;  %v6682_v32 = vcombine.high %v454_v27, %v458_v29  ;;  %v6681_v45 = vcombine.low %v454_v27, %v458_v29  ;;  %v7364_v56 = vld [vmem:[#allocation9 + $0x1e4] ss:$16 sps:$4 sm:$0xff]   ;;  %v3982_v53 = vsel %vm3966_vm1, %v3939_v43, %v3974_v48 }
 0x274   :  { %v462_v36 = vld [vmem:[#allocation6 + $0x7d8] sm:$0xff] }
 0x275   :  { %3831 = vmatpush1.bf16.msra.mxu1 %v6625_v61  ;;  %v466_v38 = vld [vmem:[#allocation6 + $0x7f8] sm:$0xff] }
 0x276   :  { %5571 = vmatpush1.bf16.msra.mxu0 %v7338_v9  ;;  %3832 = vmatprep.subr.bf16.mxu1 %v6634_v49  ;;  %v7359_v62 = vld [vmem:[#allocation9 + $0x1c0] ss:$16 sps:$4 sm:$0xff]   ;;  %v6690_v58 = vcombine.high %v462_v36, %v466_v38  ;;  %v6689_v61 = vcombine.low %v462_v36, %v466_v38  ;;  %v7373_v22 = vld [vmem:[#allocation9 + $0x244] ss:$16 sps:$4 sm:$0xff]  }
 0x277   :  { %5572 = vmatprep.subr.bf16.mxu0 %v7343_v50  ;;  %v598_v41 = vld [vmem:[#allocation6 + $0xc18] sm:$0xff] }
 0x278   :  { %v602_v46 = vld [vmem:[#allocation6 + $0xc38] sm:$0xff] }
 0x279   :  { %3833 = vmatpush1.bf16.msra.mxu1 %v6633_v54  ;;  %v7362_v9 = vld [vmem:[#allocation9 + $0x1e0] ss:$16 sps:$4 sm:$0xff]   ;;  %v6826_v49 = vcombine.high %v598_v41, %v602_v46  ;;  %v6825_v54 = vcombine.low %v598_v41, %v602_v46  ;;  %v7385_v36 = vld [vmem:[#allocation9 + $0x2c4] ss:$16 sps:$4 sm:$0xff]  }
 0x27a   :  { %5573 = vmatpush1.bf16.msra.mxu0 %v7341_v12  ;;  %3834 = vmatprep.subr.bf16.mxu1 %v6642_v55  ;;  %v606_v50 = vld [vmem:[#allocation6 + $0xc58] sm:$0xff] }
 0x27b   :  { %5574 = vmatprep.subr.bf16.mxu0 %v7346_v57  ;;  %v7365_v12 = vld [vmem:[#allocation9 + $0x200] ss:$16 sps:$4 sm:$0xff]   ;;  %v6834_v55 = vcombine.high %v606_v50, %v610_v51  ;;  %v8257_v57 = vpack.c.bf16 %v3982_v53, %v3982_v53 }
 0x27c   :  { %v622_v6 = vld [vmem:[#allocation6 + $0xcd8] sm:$0xff] }
 0x27d   :  { %3835 = vmatpush1.bf16.msra.mxu1 %v6641_v4  ;;  %v618_v4 = vld [vmem:[#allocation6 + $0xcb8] sm:$0xff] }
 0x27e   :  { %5575 = vmatpush1.bf16.msra.mxu0 %v7344_v0  ;;  %3836 = vmatprep.subr.bf16.mxu1 %v6650_v2  ;;  %v6833_v0 = vcombine.low %v606_v50, %v610_v51  ;;  %v7368_v2 = vld [vmem:[#allocation9 + $0x220] ss:$16 sps:$4 sm:$0xff]  }
 0x27f   :  { %5576 = vmatprep.subr.bf16.mxu0 %v7349_v3  ;;  %v6842_v3 = vcombine.high %v614_v60, %v618_v4  ;;  %v630_v15 = vld [vmem:[#allocation6 + $0xd18] sm:$0xff] }
 0x280   :  { %v634_v42 = vld [vmem:[#allocation6 + $0xd38] sm:$0xff] }
 0x281   :  { %3837 = vmatpush1.bf16.msra.mxu1 %v6649_v7  ;;  %v626_v7 = vld [vmem:[#allocation6 + $0xcf8] sm:$0xff]  ;;  %v6857_v21 = vcombine.low %v630_v15, %v634_v42 }
 0x282   :  { %5577 = vmatpush1.bf16.msra.mxu0 %v7347_v8  ;;  %3838 = vmatprep.subr.bf16.mxu1 %v6658_v10  ;;  %v6841_v8 = vcombine.low %v614_v60, %v618_v4  ;;  %v7371_v10 = vld [vmem:[#allocation9 + $0x240] ss:$16 sps:$4 sm:$0xff]   ;;  %v7391_v4 = vld [vmem:[#allocation9 + $0x304] ss:$16 sps:$4 sm:$0xff]  }
 0x283   :  { %5578 = vmatprep.subr.bf16.mxu0 %v7352_v13  ;;  %v7376_v13 = vld [vmem:[#allocation9 + $0x264] ss:$16 sps:$4 sm:$0xff]  }
 0x284   :  { %v638_v20 = vld [vmem:[#allocation6 + $0xd58] sm:$0xff] }
 0x285   :  { %3839 = vmatpush1.bf16.msra.mxu1 %v6657_v16  ;;  %v6849_v16 = vcombine.low %v622_v6, %v626_v7  ;;  %v646_v27 = vld [vmem:[#allocation6 + $0xd98] sm:$0xff] }
 0x286   :  { %5579 = vmatpush1.bf16.msra.mxu0 %v7350_v28  ;;  %3840 = vmatprep.subr.bf16.mxu1 %v6666_v18  ;;  %v7374_v28 = vld [vmem:[#allocation9 + $0x260] ss:$16 sps:$4 sm:$0xff]   ;;  %v6858_v18 = vcombine.high %v630_v15, %v634_v42 }
 0x287   :  { %5580 = vmatprep.subr.bf16.mxu0 %v7355_v19  ;;  %v7379_v19 = vld [vmem:[#allocation9 + $0x284] ss:$16 sps:$4 sm:$0xff]   ;;  %v7392_v15 = vld [vmem:[#allocation9 + $0x320] ss:$16 sps:$4 sm:$0xff]  }
 0x288   :  { %v650_v29 = vld [vmem:[#allocation6 + $0xdb8] sm:$0xff] }
 0x289   :  { %3841 = vmatpush1.bf16.msra.mxu1 %v6665_v47  ;;  %v7377_v47 = vld [vmem:[#allocation9 + $0x280] ss:$16 sps:$4 sm:$0xff]   ;;  %v6873_v46 = vcombine.low %v646_v27, %v650_v29 }
 0x28a   :  { %5581 = vmatpush1.bf16.msra.mxu0 %v7353_v24  ;;  %3842 = vmatprep.subr.bf16.mxu1 %v6674_v25  ;;  %v153_v25 = vsub.s32 3, %v8223_v63  ;;  %v654_v38 = vld [vmem:[#allocation6 + $0xdd8] sm:$0xff] }
 0x28b   :  { %5582 = vmatprep.subr.bf16.mxu0 %v7358_v26  ;;  %v7382_v26 = vld [vmem:[#allocation9 + $0x2a4] ss:$16 sps:$4 sm:$0xff]  }
 0x28c   :  { %v658_v43 = vld [vmem:[#allocation6 + $0xdf8] sm:$0xff] }
 0x28d   :  { %3843 = vmatpush1.bf16.msra.mxu1 %v6673_v31  ;;  %v7380_v31 = vld [vmem:[#allocation9 + $0x2a0] ss:$16 sps:$4 sm:$0xff]  }
 0x28e   :  { %5583 = vmatpush1.bf16.msra.mxu0 %v7356_v17  ;;  %3844 = vmatprep.subr.bf16.mxu1 %v6682_v32  ;;  %v6874_v17 = vcombine.high %v646_v27, %v650_v29  ;;  %v662_v53 = vld [vmem:[#allocation6 + $0xe18] sm:$0xff] }
 0x28f   :  { %5584 = vmatprep.subr.bf16.mxu0 %v7361_v34  ;;  %v154_v34 = vrot.slane %v8228_v14, %v153_v25  ;;  %v7398_v27 = vld [vmem:[#allocation9 + $0x360] ss:$16 sps:$4 sm:$0xff]  }
 0x291   :  { %3845 = vmatpush1.bf16.msra.mxu1 %v6681_v45 }
 0x292   :  { %5585 = vmatpush1.bf16.msra.mxu0 %v7359_v62  ;;  %3846 = vmatprep.subr.bf16.mxu1 %v6690_v58 }
 0x293   :  { %5586 = vmatprep.subr.bf16.mxu0 %v7364_v56 }
 0x295   :  { %3847 = vmatpush1.bf16.msra.mxu1 %v6689_v61 }
 0x296   :  { %5587 = vmatpush1.bf16.msra.mxu0 %v7362_v9  ;;  %3898 = vmatprep.subr.bf16.mxu1 %v6826_v49  ;;  %v7383_v9 = vld [vmem:[#allocation9 + $0x2c0] ss:$16 sps:$4 sm:$0xff]   ;;  %v6882_v49 = vcombine.high %v654_v38, %v658_v43 }
 0x297   :  { %5597 = vmatprep.subr.bf16.mxu0 %v7367_v5 }
 0x298   :  { %3849 = vmatmul.mubr.bf16.vlgmr.msra.gmra.mrb[28].mxu1 %v8167_v35  ;;  %v6850_v35 = vcombine.high %v622_v6, %v626_v7  ;;  %v7389_v6 = vld [vmem:[#allocation9 + $0x300] ss:$16 sps:$4 sm:$0xff]  }
 0x299   :  { %5589 = vmatmul.mubr.bf16.vlgmr.msra.gmra.mrb[28].mxu0 %v8257_v57  ;;  %3899 = vmatpush1.bf16.msra.mxu1 %v6825_v54  ;;  %v666_v54 = vld [vmem:[#allocation6 + $0xe38] sm:$0xff] }
 0x29a   :  { %5598 = vmatpush1.bf16.msra.mxu0 %v7365_v12  ;;  %3900 = vmatprep.subr.bf16.mxu1 %v6834_v55  ;;  %v7386_v55 = vld [vmem:[#allocation9 + $0x2e0] ss:$16 sps:$4 sm:$0xff]   ;;  %v6890_v60 = vcombine.high %v662_v53, %v666_v54 }
 0x29b   :  { %5599 = vmatprep.subr.bf16.mxu0 %v7370_v59  ;;  %3930 = vmatprep.mubr.bf16.mxu1 %v8169_v44  ;;  %v642_v44 = vld [vmem:[#allocation6 + $0xd78] sm:$0xff] }
 0x29c   :  { %v6866_v24 = vcombine.high %v638_v20, %v642_v44  ;;  %v6865_v30 = vcombine.low %v638_v20, %v642_v44  ;;  %v7395_v20 = vld [vmem:[#allocation9 + $0x340] ss:$16 sps:$4 sm:$0xff]  }
 0x29d   :  { %3901 = vmatpush1.bf16.msra.mxu1 %v6833_v0  ;;  %v670_v0 = vld [vmem:[#allocation6 + $0xe58] sm:$0xff] }
 0x29e   :  { %5600 = vmatpush1.bf16.msra.mxu0 %v7368_v2  ;;  %3902 = vmatprep.subr.bf16.mxu1 %v6842_v3  ;;  %v674_v2 = vld [vmem:[#allocation6 + $0xe78] sm:$0xff] }
 0x29f   :  { %5601 = vmatprep.subr.bf16.mxu0 %v7373_v22  ;;  %v6889_v22 = vcombine.low %v662_v53, %v666_v54  ;;  %v6898_v7 = vcombine.high %v670_v0, %v674_v2  ;;  %v7407_v53 = vld [vmem:[#allocation9 + $0x3c0] ss:$16 sps:$4 sm:$0xff]  }
 0x2a1   :  { %3903 = vmatpush1.bf16.msra.mxu1 %v6841_v8  ;;  %v7394_v8 = vld [vmem:[#allocation9 + $0x324] ss:$16 sps:$4 sm:$0xff]  }
 0x2a2   :  { %5602 = vmatpush1.bf16.msra.mxu0 %v7371_v10  ;;  %3904 = vmatprep.subr.bf16.mxu1 %v6850_v35  ;;  %v678_v10 = vld [vmem:[#allocation6 + $0xe98] sm:$0xff] }
 0x2a3   :  { %5603 = vmatprep.subr.bf16.mxu0 %v7376_v13  ;;  %v682_v35 = vld [vmem:[#allocation6 + $0xeb8] sm:$0xff]  ;;  %v6897_v13 = vcombine.low %v670_v0, %v674_v2  ;;  %v7418_v0 = vld [vmem:[#allocation9 + $0x2c] ss:$16 sps:$4 sm:$0xff]  }
 0x2a4   :  { %v6906_v42 = vcombine.high %v678_v10, %v682_v35 }
 0x2a5   :  { %3905 = vmatpush1.bf16.msra.mxu1 %v6849_v16  ;;  %v7397_v16 = vld [vmem:[#allocation9 + $0x344] ss:$16 sps:$4 sm:$0xff]  }
 0x2a6   :  { %5604 = vmatpush1.bf16.msra.mxu0 %v7374_v28  ;;  %3906 = vmatprep.subr.bf16.mxu1 %v6858_v18  ;;  %v686_v28 = vld [vmem:[#allocation6 + $0xed8] sm:$0xff] }
 0x2a7   :  { %5605 = vmatprep.subr.bf16.mxu0 %v7379_v19  ;;  %v690_v18 = vld [vmem:[#allocation6 + $0xef8] sm:$0xff]  ;;  %v6905_v19 = vcombine.low %v678_v10, %v682_v35 }
 0x2a8   :  { %v6914_v44 = vcombine.high %v686_v28, %v690_v18  ;;  %v7443_v10 = vld [vmem:[#allocation9 + $0x420] ss:$16 sps:$4 sm:$0xff]   ;;  %v7451_v35 = vld [vmem:[#allocation9 + $0x444] ss:$16 sps:$4 sm:$0xff]  }
 0x2a9   :  { %3907 = vmatpush1.bf16.msra.mxu1 %v6857_v21  ;;  %v7400_v21 = vld [vmem:[#allocation9 + $0x364] ss:$16 sps:$4 sm:$0xff]  }
 0x2aa   :  { %5606 = vmatpush1.bf16.msra.mxu0 %v7377_v47  ;;  %3908 = vmatprep.subr.bf16.mxu1 %v6866_v24  ;;  %v694_v47 = vld [vmem:[#allocation6 + $0xf18] sm:$0xff] }
 0x2ab   :  { %v3604_v32 = vpop.f32.mrb[16].mxu1  ;;  %5607 = vmatprep.subr.bf16.mxu0 %v7382_v26  ;;  %v698_v24 = vld [vmem:[#allocation6 + $0xf38] sm:$0xff]  ;;  %v6913_v26 = vcombine.low %v686_v28, %v690_v18  ;;  %v7427_v28 = vld [vmem:[#allocation9 + $0x8c] ss:$16 sps:$4 sm:$0xff]  }
 0x2ac   :  { %v8267_v45 = vadd.f32 %v3604_v32, %v8246_v40  ;;  %v3606_v62 = vpop.f32.mrb[17].mxu1  ;;  %v8269_v58 = vpop.f32.mrb[16].mxu0  ;;  %v7388_v40 = vld [vmem:[#allocation9 + $0x2e4] ss:$16 sps:$4 sm:$0xff]   ;;  %v6922_v29 = vcombine.high %v694_v47, %v698_v24  ;;  %v8278_v32 = vsub.s32 2, %v8223_v63 }
 0x2ad   :  { %v3607_v56 = vadd.f32 %v3606_v62, %v8249_v37  ;;  %v3608_v41 = vpop.f32.mrb[18].mxu1  ;;  %3909 = vmatpush1.bf16.msra.mxu1 %v6865_v30  ;;  %v8272_v48 = vpop.f32.mrb[17].mxu0  ;;  %v6881_v37 = vcombine.low %v654_v38, %v658_v43  ;;  %v7403_v30 = vld [vmem:[#allocation9 + $0x384] ss:$16 sps:$4 sm:$0xff]  }
 0x2ae   :  { %5608 = vmatpush1.bf16.msra.mxu0 %v7380_v31  ;;  %v3609_v61 = vpop.f32.mrb[19].mxu1  ;;  %3910 = vmatprep.subr.bf16.mxu1 %v6874_v17  ;;  %v3731_v5 = vpop.f32.mrb[18].mxu0  ;;  %v702_v31 = vld [vmem:[#allocation6 + $0xf58] sm:$0xff]  ;;  %v150_v41 = vrot.slane %v8228_v14, %v8278_v32 }
 0x2af   :  { %v3942_v50 = vadd.f32 %v3607_v56, %v154_v34  ;;  %5609 = vmatprep.subr.bf16.mxu0 %v7385_v36  ;;  %v3732_v51 = vpop.f32.mrb[19].mxu0  ;;  %v706_v17 = vld [vmem:[#allocation6 + $0xf78] sm:$0xff]  ;;  %v6921_v34 = vcombine.low %v694_v47, %v698_v24  ;;  %v7428_v47 = vld [vmem:[#allocation9 + $0xa8] ss:$16 sps:$4 sm:$0xff]   ;;  %v7433_v24 = vld [vmem:[#allocation9 + $0xcc] ss:$16 sps:$4 sm:$0xff]  }
 0x2b0   :  { %v7401_v36 = vld [vmem:[#allocation9 + $0x380] ss:$16 sps:$4 sm:$0xff]   ;;  %v6930_v38 = vcombine.high %v702_v31, %v706_v17  ;;  %v7406_v43 = vld [vmem:[#allocation9 + $0x3a4] ss:$16 sps:$4 sm:$0xff]  }
 0x2b1   :  { %v3977_v12 = vmul.f32 0.2, %v3942_v50  ;;  %3911 = vmatpush1.bf16.msra.mxu1 %v6873_v46  ;;  %vm3969_vm2 = vcmp.gt.f32.partialorder %v3942_v50, 0.0  ;;  %v710_v62 = vld [vmem:[#allocation6 + $0xf98] sm:$0xff]  ;;  %v6929_v46 = vcombine.low %v702_v31, %v706_v17 }
 0x2b2   :  { %5610 = vmatpush1.bf16.msra.mxu0 %v7383_v9  ;;  %3912 = vmatprep.subr.bf16.mxu1 %v6882_v49  ;;  %v714_v56 = vld [vmem:[#allocation6 + $0xfb8] sm:$0xff] }
 0x2b3   :  { %5611 = vmatprep.subr.bf16.mxu0 %v7388_v40  ;;  %v3985_v59 = vsel %vm3969_vm2, %v3942_v50, %v3977_v12  ;;  %v7404_v61 = vld [vmem:[#allocation9 + $0x3a0] ss:$16 sps:$4 sm:$0xff]   ;;  %v6938_v9 = vcombine.high %v710_v62, %v714_v56  ;;  %v7409_v49 = vld [vmem:[#allocation9 + $0x3c4] ss:$16 sps:$4 sm:$0xff]   ;;  %v3941_v40 = vadd.f32 %v8267_v45, %v150_v41  ;;  %v6937_v51 = vcombine.low %v710_v62, %v714_v56  ;;  %v7413_v45 = vld [vmem:[#allocation9 + $0x8] ss:$16 sps:$4 sm:$0xff]  }
 0x2b4   :  { %v8274_v3 = vpack.c.bf16 %v3985_v59, %v3985_v59  ;;  %v718_v5 = vld [vmem:[#allocation6 + $0xfd8] sm:$0xff]  ;;  %v7415_v59 = vld [vmem:[#allocation9 + $0xc] ss:$16 sps:$4 sm:$0xff]  }
 0x2b5   :  { %3913 = vmatpush1.bf16.msra.mxu1 %v6881_v37  ;;  %v722_v50 = vld [vmem:[#allocation6 + $0xff8] sm:$0xff]  ;;  %v3976_v12 = vmul.f32 0.2, %v3941_v40  ;;  %vm3968_vm3 = vcmp.gt.f32.partialorder %v3941_v40, 0.0  ;;  %v7436_v41 = vld [vmem:[#allocation9 + $0xec] ss:$16 sps:$4 sm:$0xff]  }
 0x2b6   :  { %5612 = vmatpush1.bf16.msra.mxu0 %v7386_v55  ;;  %5629 = vmatprep.mubr.bf16.mxu0 %v8274_v3  ;;  %v6946_v54 = vcombine.high %v718_v5, %v722_v50  ;;  %v7412_v14 = vld [vmem:[#allocation9 + $0x3e4] ss:$16 sps:$4 sm:$0xff]   ;;  %v6945_v37 = vcombine.low %v718_v5, %v722_v50  ;;  %v7410_v55 = vld [vmem:[#allocation9 + $0x3e0] ss:$16 sps:$4 sm:$0xff]   ;;  %v7442_v5 = vld [vmem:[#allocation9 + $0x10c] ss:$16 sps:$4 sm:$0xff]  }
 0x2b7   :  { %3914 = vmatprep.subr.bf16.mxu1 %v6890_v60  ;;  %5613 = vmatprep.subr.bf16.mxu0 %v7391_v4  ;;  %v7439_v60 = vld [vmem:[#allocation9 + $0x404] ss:$16 sps:$4 sm:$0xff]   ;;  %v3984_v4 = vsel %vm3968_vm3, %v3941_v40, %v3976_v12  ;;  %v7479_v50 = vld [vmem:[#allocation9 + $0x4e0] ss:$16 sps:$4 sm:$0xff]   ;;  %v7440_v40 = vld [vmem:[#allocation9 + $0x108] ss:$16 sps:$4 sm:$0xff]  }
 0x2b8   :  { %v8283_v2 = vpack.c.bf16 %v3984_v4, %v3984_v4  ;;  %v7463_v18 = vld [vmem:[#allocation9 + $0x484] ss:$16 sps:$4 sm:$0xff]   ;;  %v7491_v12 = vld [vmem:[#allocation9 + $0x520] ss:$16 sps:$4 sm:$0xff]  }
 0x2b9   :  { %3915 = vmatpush1.bf16.msra.mxu1 %v6889_v22  ;;  %v7437_v22 = vld [vmem:[#allocation9 + $0x400] ss:$16 sps:$4 sm:$0xff]   ;;  %v7475_v31 = vld [vmem:[#allocation9 + $0x4c4] ss:$16 sps:$4 sm:$0xff]  }
 0x2ba   :  { %5614 = vmatpush1.bf16.msra.mxu0 %v7389_v6  ;;  %3916 = vmatprep.subr.bf16.mxu1 %v6898_v7  ;;  %v7445_v6 = vld [vmem:[#allocation9 + $0x424] ss:$16 sps:$4 sm:$0xff]   ;;  %v7416_v7 = vld [vmem:[#allocation9 + $0x28] ss:$16 sps:$4 sm:$0xff]  }
 0x2bb   :  { %5615 = vmatprep.subr.bf16.mxu0 %v7394_v8  ;;  %v7421_v8 = vld [vmem:[#allocation9 + $0x4c] ss:$16 sps:$4 sm:$0xff]   ;;  %v7505_v4 = vld [vmem:[#allocation9 + $0x564] ss:$16 sps:$4 sm:$0xff]  }
 0x2bd   :  { %3917 = vmatpush1.bf16.msra.mxu1 %v6897_v13  ;;  %v7419_v13 = vld [vmem:[#allocation9 + $0x48] ss:$16 sps:$4 sm:$0xff]  }
 0x2be   :  { %5616 = vmatpush1.bf16.msra.mxu0 %v7392_v15  ;;  %3918 = vmatprep.subr.bf16.mxu1 %v6906_v42  ;;  %v7424_v15 = vld [vmem:[#allocation9 + $0x6c] ss:$16 sps:$4 sm:$0xff]   ;;  %v7449_v42 = vld [vmem:[#allocation9 + $0x440] ss:$16 sps:$4 sm:$0xff]  }
 0x2bf   :  { %5617 = vmatprep.subr.bf16.mxu0 %v7397_v16  ;;  %v7422_v16 = vld [vmem:[#allocation9 + $0x68] ss:$16 sps:$4 sm:$0xff]  }
 0x2c1   :  { %3919 = vmatpush1.bf16.msra.mxu1 %v6905_v19  ;;  %v7425_v19 = vld [vmem:[#allocation9 + $0x88] ss:$16 sps:$4 sm:$0xff]  }
 0x2c2   :  { %5618 = vmatpush1.bf16.msra.mxu0 %v7395_v20  ;;  %3920 = vmatprep.subr.bf16.mxu1 %v6914_v44  ;;  %v7430_v20 = vld [vmem:[#allocation9 + $0xac] ss:$16 sps:$4 sm:$0xff]   ;;  %v7461_v44 = vld [vmem:[#allocation9 + $0x480] ss:$16 sps:$4 sm:$0xff]  }
 0x2c3   :  { %5619 = vmatprep.subr.bf16.mxu0 %v7400_v21  ;;  %v7469_v21 = vld [vmem:[#allocation9 + $0x4a4] ss:$16 sps:$4 sm:$0xff]  }
 0x2c5   :  { %3921 = vmatpush1.bf16.msra.mxu1 %v6913_v26 }
 0x2c6   :  { %5620 = vmatpush1.bf16.msra.mxu0 %v7398_v27  ;;  %3922 = vmatprep.subr.bf16.mxu1 %v6922_v29  ;;  %v7467_v27 = vld [vmem:[#allocation9 + $0x4a0] ss:$16 sps:$4 sm:$0xff]  }
 0x2c7   :  { %5621 = vmatprep.subr.bf16.mxu0 %v7403_v30 }
 0x2c9   :  { %3923 = vmatpush1.bf16.msra.mxu1 %v6921_v34 }
 0x2ca   :  { %5622 = vmatpush1.bf16.msra.mxu0 %v7401_v36  ;;  %3924 = vmatprep.subr.bf16.mxu1 %v6930_v38  ;;  %v7431_v38 = vld [vmem:[#allocation9 + $0xc8] ss:$16 sps:$4 sm:$0xff]  }
 0x2cb   :  { %5623 = vmatprep.subr.bf16.mxu0 %v7406_v43 }
 0x2cd   :  { %3925 = vmatpush1.bf16.msra.mxu1 %v6929_v46 }
 0x2ce   :  { %5624 = vmatpush1.bf16.msra.mxu0 %v7404_v61  ;;  %3926 = vmatprep.subr.bf16.mxu1 %v6938_v9  ;;  %v7473_v61 = vld [vmem:[#allocation9 + $0x4c0] ss:$16 sps:$4 sm:$0xff]  }
 0x2cf   :  { %5625 = vmatprep.subr.bf16.mxu0 %v7409_v49  ;;  %v7434_v49 = vld [vmem:[#allocation9 + $0xe8] ss:$16 sps:$4 sm:$0xff]  }
 0x2d1   :  { %3927 = vmatpush1.bf16.msra.mxu1 %v6937_v51  ;;  %v7448_v51 = vld [vmem:[#allocation9 + $0x12c] ss:$16 sps:$4 sm:$0xff]  }
 0x2d2   :  { %5626 = vmatpush1.bf16.msra.mxu0 %v7407_v53  ;;  %3928 = vmatprep.subr.bf16.mxu1 %v6946_v54  ;;  %v7493_v53 = vld [vmem:[#allocation9 + $0x524] ss:$16 sps:$4 sm:$0xff]   ;;  %v7446_v54 = vld [vmem:[#allocation9 + $0x128] ss:$16 sps:$4 sm:$0xff]  }
 0x2d3   :  { %5627 = vmatprep.subr.bf16.mxu0 %v7412_v14  ;;  %v7454_v14 = vld [vmem:[#allocation9 + $0x14c] ss:$16 sps:$4 sm:$0xff]  }
 0x2d5   :  { %3929 = vmatpush1.bf16.msra.mxu1 %v6945_v37  ;;  %v7499_v37 = vld [vmem:[#allocation9 + $0x544] ss:$16 sps:$4 sm:$0xff]  }
 0x2d6   :  { %5628 = vmatpush1.bf16.msra.mxu0 %v7410_v55  ;;  %5720 = vmatprep.subr.bf16.mxu1 %v7415_v59  ;;  %v7452_v55 = vld [vmem:[#allocation9 + $0x148] ss:$16 sps:$4 sm:$0xff]   ;;  %v7460_v59 = vld [vmem:[#allocation9 + $0x16c] ss:$16 sps:$4 sm:$0xff]  }
 0x2d7   :  { %5638 = vmatprep.subr.bf16.mxu0 %v7439_v60  ;;  %v7497_v60 = vld [vmem:[#allocation9 + $0x540] ss:$16 sps:$4 sm:$0xff]  }
 0x2d8   :  { %3931 = vmatmul.mubr.bf16.vlgmr.msra.gmra.mrb[32].mxu1 %v8175_v52  ;;  %v7457_v52 = vld [vmem:[#allocation9 + $0x464] ss:$16 sps:$4 sm:$0xff]  }
 0x2d9   :  { %5630 = vmatmul.mubr.bf16.vlgmr.msra.gmra.mrb[28].mxu0 %v8283_v2  ;;  %5721 = vmatpush1.bf16.msra.mxu1 %v7413_v45  ;;  %v7458_v45 = vld [vmem:[#allocation9 + $0x168] ss:$16 sps:$4 sm:$0xff]  }
 0x2da   :  { %5752 = vmatprep.mubr.bf16.mxu1 %v8234_v1  ;;  %5722 = vmatprep.subr.bf16.mxu1 %v7418_v0  ;;  %v7455_v1 = vld [vmem:[#allocation9 + $0x460] ss:$16 sps:$4 sm:$0xff]   ;;  %v7466_v0 = vld [vmem:[#allocation9 + $0x18c] ss:$16 sps:$4 sm:$0xff]  }
 0x2db   :  { %5639 = vmatpush1.bf16.msra.mxu0 %v7437_v22  ;;  %v7503_v22 = vld [vmem:[#allocation9 + $0x560] ss:$16 sps:$4 sm:$0xff]  }
 0x2dc   :  { %5640 = vmatprep.subr.bf16.mxu0 %v7445_v6  ;;  %v7511_v6 = vld [vmem:[#allocation9 + $0x584] ss:$16 sps:$4 sm:$0xff]  }
 0x2dd   :  { %5723 = vmatpush1.bf16.msra.mxu1 %v7416_v7  ;;  %v7464_v7 = vld [vmem:[#allocation9 + $0x188] ss:$16 sps:$4 sm:$0xff]  }
 0x2de   :  { %5724 = vmatprep.subr.bf16.mxu1 %v7421_v8  ;;  %v7472_v8 = vld [vmem:[#allocation9 + $0x1ac] ss:$16 sps:$4 sm:$0xff]  }
 0x2df   :  { %5641 = vmatpush1.bf16.msra.mxu0 %v7443_v10  ;;  %v7509_v10 = vld [vmem:[#allocation9 + $0x580] ss:$16 sps:$4 sm:$0xff]  }
 0x2e0   :  { %5642 = vmatprep.subr.bf16.mxu0 %v7451_v35  ;;  %v7517_v35 = vld [vmem:[#allocation9 + $0x5a4] ss:$16 sps:$4 sm:$0xff]  }
 0x2e1   :  { %5725 = vmatpush1.bf16.msra.mxu1 %v7419_v13  ;;  %v7470_v13 = vld [vmem:[#allocation9 + $0x1a8] ss:$16 sps:$4 sm:$0xff]  }
 0x2e2   :  { %5726 = vmatprep.subr.bf16.mxu1 %v7424_v15  ;;  %v7478_v15 = vld [vmem:[#allocation9 + $0x1cc] ss:$16 sps:$4 sm:$0xff]  }
 0x2e3   :  { %5643 = vmatpush1.bf16.msra.mxu0 %v7449_v42  ;;  %v7515_v42 = vld [vmem:[#allocation9 + $0x5a0] ss:$16 sps:$4 sm:$0xff]  }
 0x2e4   :  { %5644 = vmatprep.subr.bf16.mxu0 %v7457_v52  ;;  %v7523_v52 = vld [vmem:[#allocation9 + $0x5c4] ss:$16 sps:$4 sm:$0xff]  }
 0x2e5   :  { %5727 = vmatpush1.bf16.msra.mxu1 %v7422_v16  ;;  %v7476_v16 = vld [vmem:[#allocation9 + $0x1c8] ss:$16 sps:$4 sm:$0xff]  }
 0x2e6   :  { %5728 = vmatprep.subr.bf16.mxu1 %v7427_v28  ;;  %v7484_v28 = vld [vmem:[#allocation9 + $0x1ec] ss:$16 sps:$4 sm:$0xff]  }
 0x2e7   :  { %5645 = vmatpush1.bf16.msra.mxu0 %v7455_v1  ;;  %v7521_v1 = vld [vmem:[#allocation9 + $0x5c0] ss:$16 sps:$4 sm:$0xff]  }
 0x2e8   :  { %5646 = vmatprep.subr.bf16.mxu0 %v7463_v18  ;;  %v7529_v18 = vld [vmem:[#allocation9 + $0x5e4] ss:$16 sps:$4 sm:$0xff]  }
 0x2e9   :  { %5729 = vmatpush1.bf16.msra.mxu1 %v7425_v19  ;;  %v7482_v19 = vld [vmem:[#allocation9 + $0x1e8] ss:$16 sps:$4 sm:$0xff]  }
 0x2ea   :  { %5730 = vmatprep.subr.bf16.mxu1 %v7430_v20  ;;  %v7490_v20 = vld [vmem:[#allocation9 + $0x20c] ss:$16 sps:$4 sm:$0xff]  }
 0x2eb   :  { %v3686_v26 = vpop.f32.mrb[20].mxu1  ;;  %5647 = vmatpush1.bf16.msra.mxu0 %v7461_v44  ;;  %v7527_v44 = vld [vmem:[#allocation9 + $0x5e0] ss:$16 sps:$4 sm:$0xff]  }
 0x2ec   :  { %v3687_v29 = vadd.f32 %v3686_v26, %v8240_v33  ;;  %v3688_v30 = vpop.f32.mrb[21].mxu1  ;;  %5648 = vmatprep.subr.bf16.mxu0 %v7469_v21  ;;  %v8289_v17 = vpop.f32.mrb[20].mxu0  ;;  %v7583_v21 = vld [vmem:[#allocation9 + $0x604] ss:$16 sps:$4 sm:$0xff]   ;;  %v7494_v26 = vld [vmem:[#allocation9 + $0x228] ss:$16 sps:$4 sm:$0xff]  }
 0x2ed   :  { %v3689_v34 = vadd.f32 %v3688_v30, %v8243_v39  ;;  %v3690_v36 = vpop.f32.mrb[22].mxu1  ;;  %5731 = vmatpush1.bf16.msra.mxu1 %v7428_v47  ;;  %v8292_v43 = vpop.f32.mrb[21].mxu0  ;;  %v7481_v39 = vld [vmem:[#allocation9 + $0x4e4] ss:$16 sps:$4 sm:$0xff]   ;;  %v7488_v47 = vld [vmem:[#allocation9 + $0x208] ss:$16 sps:$4 sm:$0xff]  }
 0x2ee   :  { %v8295_v62 = vadd.f32 %v8269_v58, %v3687_v29  ;;  %v3691_v56 = vpop.f32.mrb[23].mxu1  ;;  %5732 = vmatprep.subr.bf16.mxu1 %v7433_v24  ;;  %v3813_v46 = vpop.f32.mrb[22].mxu0  ;;  %v7487_v58 = vld [vmem:[#allocation9 + $0x504] ss:$16 sps:$4 sm:$0xff]   ;;  %v7496_v24 = vld [vmem:[#allocation9 + $0x22c] ss:$16 sps:$4 sm:$0xff]  }
 0x2ef   :  { %v8298_v33 = vadd.f32 %v8272_v48, %v3689_v34  ;;  %5649 = vmatpush1.bf16.msra.mxu0 %v7467_v27  ;;  %v3814_v9 = vpop.f32.mrb[23].mxu0  ;;  %v7485_v48 = vld [vmem:[#allocation9 + $0x500] ss:$16 sps:$4 sm:$0xff]   ;;  %v7502_v27 = vld [vmem:[#allocation9 + $0x24c] ss:$16 sps:$4 sm:$0xff]   ;;  %v161_v56 = vsub.s32 5, %v8223_v63 }
 0x2f0   :  { %5650 = vmatprep.subr.bf16.mxu0 %v7475_v31  ;;  %v7500_v29 = vld [vmem:[#allocation9 + $0x248] ss:$16 sps:$4 sm:$0xff]   ;;  %v7508_v30 = vld [vmem:[#allocation9 + $0x26c] ss:$16 sps:$4 sm:$0xff]  }
 0x2f1   :  { %5733 = vmatpush1.bf16.msra.mxu1 %v7431_v38  ;;  %v7506_v31 = vld [vmem:[#allocation9 + $0x268] ss:$16 sps:$4 sm:$0xff]   ;;  %v7514_v34 = vld [vmem:[#allocation9 + $0x28c] ss:$16 sps:$4 sm:$0xff]  }
 0x2f2   :  { %5734 = vmatprep.subr.bf16.mxu1 %v7436_v41  ;;  %v7512_v36 = vld [vmem:[#allocation9 + $0x288] ss:$16 sps:$4 sm:$0xff]   ;;  %v7520_v38 = vld [vmem:[#allocation9 + $0x2ac] ss:$16 sps:$4 sm:$0xff]  }
 0x2f3   :  { %5651 = vmatpush1.bf16.msra.mxu0 %v7473_v61  ;;  %v8304_v41 = vld [vmem:[#allocation8] sm:$0xff] }
 0x2f4   :  { %5652 = vmatprep.subr.bf16.mxu0 %v7481_v39  ;;  %v7526_v61 = vld [vmem:[#allocation9 + $0x2cc] ss:$16 sps:$4 sm:$0xff]   ;;  %v162_v39 = vrot.slane %v8304_v41, %v161_v56  ;;  %v7623_v56 = vld [vmem:[#allocation9 + $0x6e0] ss:$16 sps:$4 sm:$0xff]  }
 0x2f5   :  { %5735 = vmatpush1.bf16.msra.mxu1 %v7434_v49 }
 0x2f6   :  { %5736 = vmatprep.subr.bf16.mxu1 %v7442_v5 }
 0x2f7   :  { %5653 = vmatpush1.bf16.msra.mxu0 %v7479_v50 }
 0x2f8   :  { %5654 = vmatprep.subr.bf16.mxu0 %v7487_v58 }
 0x2f9   :  { %5737 = vmatpush1.bf16.msra.mxu1 %v7440_v40 }
 0x2fa   :  { %5738 = vmatprep.subr.bf16.mxu1 %v7448_v51  ;;  %v7524_v51 = vld [vmem:[#allocation9 + $0x2c8] ss:$16 sps:$4 sm:$0xff]  }
 0x2fb   :  { %5655 = vmatpush1.bf16.msra.mxu0 %v7485_v48 }
 0x2fc   :  { %5656 = vmatprep.subr.bf16.mxu0 %v7493_v53 }
 0x2fd   :  { %5739 = vmatpush1.bf16.msra.mxu1 %v7446_v54 }
 0x2fe   :  { %5740 = vmatprep.subr.bf16.mxu1 %v7454_v14  ;;  %v7532_v14 = vld [vmem:[#allocation9 + $0x2ec] ss:$16 sps:$4 sm:$0xff]  }
 0x2ff   :  { %5657 = vmatpush1.bf16.msra.mxu0 %v7491_v12 }
 0x300   :  { %5658 = vmatprep.subr.bf16.mxu0 %v7499_v37 }
 0x301   :  { %5741 = vmatpush1.bf16.msra.mxu1 %v7452_v55 }
 0x302   :  { %5742 = vmatprep.subr.bf16.mxu1 %v7460_v59 }
 0x303   :  { %5659 = vmatpush1.bf16.msra.mxu0 %v7497_v60  ;;  %v7530_v60 = vld [vmem:[#allocation9 + $0x2e8] ss:$16 sps:$4 sm:$0xff]  }
 0x304   :  { %5660 = vmatprep.subr.bf16.mxu0 %v7505_v4 }
 0x305   :  { %5743 = vmatpush1.bf16.msra.mxu1 %v7458_v45 }
 0x306   :  { %5744 = vmatprep.subr.bf16.mxu1 %v7466_v0 }
 0x307   :  { %5661 = vmatpush1.bf16.msra.mxu0 %v7503_v22  ;;  %v7581_v22 = vld [vmem:[#allocation9 + $0x600] ss:$16 sps:$4 sm:$0xff]  }
 0x308   :  { %5662 = vmatprep.subr.bf16.mxu0 %v7511_v6 }
 0x309   :  { %5745 = vmatpush1.bf16.msra.mxu1 %v7464_v7  ;;  %v7533_v7 = vld [vmem:[#allocation9 + $0x308] ss:$16 sps:$4 sm:$0xff]  }
 0x30a   :  { %5746 = vmatprep.subr.bf16.mxu1 %v7472_v8  ;;  %v7589_v8 = vld [vmem:[#allocation9 + $0x624] ss:$16 sps:$4 sm:$0xff]  }
 0x30b   :  { %5663 = vmatpush1.bf16.msra.mxu0 %v7509_v10  ;;  %v7538_v10 = vld [vmem:[#allocation9 + $0x32c] ss:$16 sps:$4 sm:$0xff]  }
 0x30c   :  { %5664 = vmatprep.subr.bf16.mxu0 %v7517_v35  ;;  %v7587_v35 = vld [vmem:[#allocation9 + $0x620] ss:$16 sps:$4 sm:$0xff]  }
 0x30d   :  { %5747 = vmatpush1.bf16.msra.mxu1 %v7470_v13  ;;  %v7536_v13 = vld [vmem:[#allocation9 + $0x328] ss:$16 sps:$4 sm:$0xff]  }
 0x30e   :  { %5748 = vmatprep.subr.bf16.mxu1 %v7478_v15  ;;  %v7595_v15 = vld [vmem:[#allocation9 + $0x644] ss:$16 sps:$4 sm:$0xff]  }
 0x30f   :  { %5665 = vmatpush1.bf16.msra.mxu0 %v7515_v42  ;;  %v7541_v42 = vld [vmem:[#allocation9 + $0x34c] ss:$16 sps:$4 sm:$0xff]  }
 0x310   :  { %5666 = vmatprep.subr.bf16.mxu0 %v7523_v52  ;;  %v7593_v52 = vld [vmem:[#allocation9 + $0x640] ss:$16 sps:$4 sm:$0xff]  }
 0x311   :  { %5749 = vmatpush1.bf16.msra.mxu1 %v7476_v16  ;;  %v7539_v16 = vld [vmem:[#allocation9 + $0x348] ss:$16 sps:$4 sm:$0xff]  }
 0x312   :  { %5750 = vmatprep.subr.bf16.mxu1 %v7484_v28  ;;  %v7601_v28 = vld [vmem:[#allocation9 + $0x664] ss:$16 sps:$4 sm:$0xff]  }
 0x313   :  { %5667 = vmatpush1.bf16.msra.mxu0 %v7521_v1  ;;  %v7544_v1 = vld [vmem:[#allocation9 + $0x36c] ss:$16 sps:$4 sm:$0xff]  }
 0x314   :  { %5668 = vmatprep.subr.bf16.mxu0 %v7529_v18  ;;  %v7599_v18 = vld [vmem:[#allocation9 + $0x660] ss:$16 sps:$4 sm:$0xff]  }
 0x315   :  { %5751 = vmatpush1.bf16.msra.mxu1 %v7482_v19  ;;  %v7542_v19 = vld [vmem:[#allocation9 + $0x368] ss:$16 sps:$4 sm:$0xff]  }
 0x316   :  { %5761 = vmatprep.subr.bf16.mxu1 %v7490_v20  ;;  %v7607_v20 = vld [vmem:[#allocation9 + $0x684] ss:$16 sps:$4 sm:$0xff]  }
 0x317   :  { %5669 = vmatpush1.bf16.msra.mxu0 %v7527_v44  ;;  %v7547_v44 = vld [vmem:[#allocation9 + $0x38c] ss:$16 sps:$4 sm:$0xff]  }
 0x318   :  { %5753 = vmatmul.mubr.bf16.vlgmr.msra.gmra.mrb[36].mxu1 %v8257_v57  ;;  %5679 = vmatprep.subr.bf16.mxu0 %v7583_v21  ;;  %v157_v57 = vsub.s32 4, %v8223_v63  ;;  %v7605_v21 = vld [vmem:[#allocation9 + $0x680] ss:$16 sps:$4 sm:$0xff]  }
 0x319   :  { %5762 = vmatpush1.bf16.msra.mxu1 %v7488_v47  ;;  %5793 = vmatprep.mubr.bf16.mxu1 %v8274_v3  ;;  %v7518_v3 = vld [vmem:[#allocation9 + $0x2a8] ss:$16 sps:$4 sm:$0xff]  }
 0x31a   :  { %5763 = vmatprep.subr.bf16.mxu1 %v7496_v24  ;;  %v158_v46 = vrot.slane %v8304_v41, %v157_v57  ;;  %v7545_v47 = vld [vmem:[#allocation9 + $0x388] ss:$16 sps:$4 sm:$0xff]   ;;  %v7613_v24 = vld [vmem:[#allocation9 + $0x6a4] ss:$16 sps:$4 sm:$0xff]  }
 0x31b   :  { %v7625_v57 = vld [vmem:[#allocation9 + $0x6e4] ss:$16 sps:$4 sm:$0xff]  }
 0x31d   :  { %5764 = vmatpush1.bf16.msra.mxu1 %v7494_v26  ;;  %v7550_v26 = vld [vmem:[#allocation9 + $0x3ac] ss:$16 sps:$4 sm:$0xff]  }
 0x31e   :  { %5765 = vmatprep.subr.bf16.mxu1 %v7502_v27  ;;  %v7611_v27 = vld [vmem:[#allocation9 + $0x6a0] ss:$16 sps:$4 sm:$0xff]  }
 0x321   :  { %5766 = vmatpush1.bf16.msra.mxu1 %v7500_v29  ;;  %v7548_v29 = vld [vmem:[#allocation9 + $0x3a8] ss:$16 sps:$4 sm:$0xff]  }
 0x322   :  { %5767 = vmatprep.subr.bf16.mxu1 %v7508_v30  ;;  %v7619_v30 = vld [vmem:[#allocation9 + $0x6c4] ss:$16 sps:$4 sm:$0xff]  }
 0x325   :  { %5768 = vmatpush1.bf16.msra.mxu1 %v7506_v31  ;;  %v7553_v31 = vld [vmem:[#allocation9 + $0x3cc] ss:$16 sps:$4 sm:$0xff]  }
 0x326   :  { %5769 = vmatprep.subr.bf16.mxu1 %v7514_v34  ;;  %v7617_v34 = vld [vmem:[#allocation9 + $0x6c0] ss:$16 sps:$4 sm:$0xff]  }
 0x329   :  { %5770 = vmatpush1.bf16.msra.mxu1 %v7512_v36  ;;  %v7551_v36 = vld [vmem:[#allocation9 + $0x3c8] ss:$16 sps:$4 sm:$0xff]  }
 0x32a   :  { %5771 = vmatprep.subr.bf16.mxu1 %v7520_v38  ;;  %v7556_v38 = vld [vmem:[#allocation9 + $0x3ec] ss:$16 sps:$4 sm:$0xff]  }
 0x32b   :  { %v3768_v9 = vpop.f32.mrb[24].mxu1 }
 0x32c   :  { %v3769_v49 = vadd.f32 %v3768_v9, %v8295_v62  ;;  %v3770_v5 = vpop.f32.mrb[25].mxu1  ;;  %v8309_v50 = vpop.f32.mrb[24].mxu0  ;;  %v7629_v9 = vld [vmem:[#allocation9 + $0x700] ss:$16 sps:$4 sm:$0xff]  }
 0x32d   :  { %v3771_v58 = vadd.f32 %v3770_v5, %v8298_v33  ;;  %v3772_v40 = vpop.f32.mrb[26].mxu1  ;;  %5772 = vmatpush1.bf16.msra.mxu1 %v7518_v3  ;;  %v8312_v48 = vpop.f32.mrb[25].mxu0  ;;  %v7535_v33 = vld [vmem:[#allocation9 + $0x30c] ss:$16 sps:$4 sm:$0xff]   ;;  %v7554_v3 = vld [vmem:[#allocation9 + $0x3e8] ss:$16 sps:$4 sm:$0xff]  }
 0x32e   :  { %v3943_v53 = vadd.f32 %v3769_v49, %v158_v46  ;;  %v3773_v54 = vpop.f32.mrb[27].mxu1  ;;  %5773 = vmatprep.subr.bf16.mxu1 %v7526_v61  ;;  %v3895_v12 = vpop.f32.mrb[26].mxu0  ;;  %v7631_v46 = vld [vmem:[#allocation9 + $0x704] ss:$16 sps:$4 sm:$0xff]   ;;  %v7559_v61 = vld [vmem:[#allocation9 + $0x40c] ss:$16 sps:$4 sm:$0xff]  }
 0x32f   :  { %v3944_v37 = vadd.f32 %v3771_v58, %v162_v39  ;;  %v3896_v55 = vpop.f32.mrb[27].mxu0  ;;  %v7557_v39 = vld [vmem:[#allocation9 + $0x408] ss:$16 sps:$4 sm:$0xff]   ;;  %v7562_v49 = vld [vmem:[#allocation9 + $0x42c] ss:$16 sps:$4 sm:$0xff]  }
 0x330   :  { %vm3970_vm4 = vcmp.gt.f32.partialorder %v3943_v53, 0.0  ;;  %v3978_v59 = vmul.f32 0.2, %v3943_v53  ;;  %v7637_v5 = vld [vmem:[#allocation9 + $0x724] ss:$16 sps:$4 sm:$0xff]  }
 0x331   :  { %v3979_v62 = vmul.f32 0.2, %v3944_v37  ;;  %5774 = vmatpush1.bf16.msra.mxu1 %v7524_v51  ;;  %vm3971_vm5 = vcmp.gt.f32.partialorder %v3944_v37, 0.0  ;;  %v7635_v58 = vld [vmem:[#allocation9 + $0x720] ss:$16 sps:$4 sm:$0xff]  }
 0x332   :  { %v3986_v4 = vsel %vm3970_vm4, %v3943_v53, %v3978_v59  ;;  %5775 = vmatprep.subr.bf16.mxu1 %v7532_v14  ;;  %v7560_v40 = vld [vmem:[#allocation9 + $0x428] ss:$16 sps:$4 sm:$0xff]   ;;  %v7643_v51 = vld [vmem:[#allocation9 + $0x744] ss:$16 sps:$4 sm:$0xff]   ;;  %v7565_v53 = vld [vmem:[#allocation9 + $0x44c] ss:$16 sps:$4 sm:$0xff]  }
 0x333   :  { %v3987_v45 = vsel %vm3971_vm5, %v3944_v37, %v3979_v62  ;;  %v8316_v6 = vpack.c.bf16 %v3986_v4, %v3986_v4  ;;  %v7641_v54 = vld [vmem:[#allocation9 + $0x740] ss:$16 sps:$4 sm:$0xff]   ;;  %v7563_v14 = vld [vmem:[#allocation9 + $0x448] ss:$16 sps:$4 sm:$0xff]   ;;  %v7649_v12 = vld [vmem:[#allocation9 + $0x764] ss:$16 sps:$4 sm:$0xff]  }
 0x334   :  { %v8314_v0 = vpack.c.bf16 %v3987_v45, %v3987_v45  ;;  %v7568_v37 = vld [vmem:[#allocation9 + $0x46c] ss:$16 sps:$4 sm:$0xff]   ;;  %v7566_v55 = vld [vmem:[#allocation9 + $0x468] ss:$16 sps:$4 sm:$0xff]   ;;  %v7655_v59 = vld [vmem:[#allocation9 + $0x784] ss:$16 sps:$4 sm:$0xff]  }
 0x335   :  { %5776 = vmatpush1.bf16.msra.mxu1 %v7530_v60  ;;  %v7571_v62 = vld [vmem:[#allocation9 + $0x48c] ss:$16 sps:$4 sm:$0xff]   ;;  %v7653_v60 = vld [vmem:[#allocation9 + $0x780] ss:$16 sps:$4 sm:$0xff]   ;;  %v7569_v4 = vld [vmem:[#allocation9 + $0x488] ss:$16 sps:$4 sm:$0xff]  }
 0x336   :  { %5670 = vmatprep.mubr.bf16.mxu0 %v8314_v0  ;;  %5777 = vmatprep.subr.bf16.mxu1 %v7535_v33  ;;  %v7661_v33 = vld [vmem:[#allocation9 + $0x7a4] ss:$16 sps:$4 sm:$0xff]   ;;  %v7574_v45 = vld [vmem:[#allocation9 + $0x4ac] ss:$16 sps:$4 sm:$0xff]  }
 0x337   :  { %5671 = vmatmul.mubr.bf16.vlgmr.msra.gmra.mrb[28].mxu0 %v8316_v6 }
 0x338   :  { %5680 = vmatpush1.bf16.msra.mxu0 %v7581_v22  ;;  %v7572_v22 = vld [vmem:[#allocation9 + $0x4a8] ss:$16 sps:$4 sm:$0xff]  }
 0x339   :  { %5778 = vmatpush1.bf16.msra.mxu1 %v7533_v7  ;;  %5681 = vmatprep.subr.bf16.mxu0 %v7589_v8  ;;  %v7667_v7 = vld [vmem:[#allocation9 + $0x7c4] ss:$16 sps:$4 sm:$0xff]   ;;  %v7577_v8 = vld [vmem:[#allocation9 + $0x4cc] ss:$16 sps:$4 sm:$0xff]  }
 0x33a   :  { %5779 = vmatprep.subr.bf16.mxu1 %v7538_v10 }
 0x33c   :  { %5682 = vmatpush1.bf16.msra.mxu0 %v7587_v35 }
 0x33d   :  { %5780 = vmatpush1.bf16.msra.mxu1 %v7536_v13  ;;  %5683 = vmatprep.subr.bf16.mxu0 %v7595_v15  ;;  %v7665_v15 = vld [vmem:[#allocation9 + $0x7c0] ss:$16 sps:$4 sm:$0xff]  }
 0x33e   :  { %5781 = vmatprep.subr.bf16.mxu1 %v7541_v42 }
 0x340   :  { %5684 = vmatpush1.bf16.msra.mxu0 %v7593_v52 }
 0x341   :  { %5782 = vmatpush1.bf16.msra.mxu1 %v7539_v16  ;;  %5685 = vmatprep.subr.bf16.mxu0 %v7601_v28  ;;  %v7575_v16 = vld [vmem:[#allocation9 + $0x4c8] ss:$16 sps:$4 sm:$0xff]   ;;  %v7673_v28 = vld [vmem:[#allocation9 + $0x7e4] ss:$16 sps:$4 sm:$0xff]  }
 0x342   :  { %5783 = vmatprep.subr.bf16.mxu1 %v7544_v1 }
 0x344   :  { %5686 = vmatpush1.bf16.msra.mxu0 %v7599_v18 }
 0x345   :  { %5784 = vmatpush1.bf16.msra.mxu1 %v7542_v19  ;;  %5687 = vmatprep.subr.bf16.mxu0 %v7607_v20  ;;  %v7580_v19 = vld [vmem:[#allocation9 + $0x4ec] ss:$16 sps:$4 sm:$0xff]  }
 0x346   :  { %5785 = vmatprep.subr.bf16.mxu1 %v7547_v44  ;;  %v7578_v44 = vld [vmem:[#allocation9 + $0x4e8] ss:$16 sps:$4 sm:$0xff]  }
 0x348   :  { %5688 = vmatpush1.bf16.msra.mxu0 %v7605_v21  ;;  %v7586_v21 = vld [vmem:[#allocation9 + $0x50c] ss:$16 sps:$4 sm:$0xff]  }
 0x349   :  { %5786 = vmatpush1.bf16.msra.mxu1 %v7545_v47  ;;  %5689 = vmatprep.subr.bf16.mxu0 %v7613_v24  ;;  %v7584_v47 = vld [vmem:[#allocation9 + $0x508] ss:$16 sps:$4 sm:$0xff]  }
 0x34a   :  { %5787 = vmatprep.subr.bf16.mxu1 %v7550_v26  ;;  %v7590_v24 = vld [vmem:[#allocation9 + $0x528] ss:$16 sps:$4 sm:$0xff]   ;;  %v7598_v26 = vld [vmem:[#allocation9 + $0x54c] ss:$16 sps:$4 sm:$0xff]  }
 0x34c   :  { %5690 = vmatpush1.bf16.msra.mxu0 %v7611_v27  ;;  %v7604_v27 = vld [vmem:[#allocation9 + $0x56c] ss:$16 sps:$4 sm:$0xff]  }
 0x34d   :  { %5788 = vmatpush1.bf16.msra.mxu1 %v7548_v29  ;;  %5691 = vmatprep.subr.bf16.mxu0 %v7619_v30  ;;  %v7602_v29 = vld [vmem:[#allocation9 + $0x568] ss:$16 sps:$4 sm:$0xff]   ;;  %v7610_v30 = vld [vmem:[#allocation9 + $0x58c] ss:$16 sps:$4 sm:$0xff]  }
 0x34e   :  { %5789 = vmatprep.subr.bf16.mxu1 %v7553_v31  ;;  %v7608_v31 = vld [vmem:[#allocation9 + $0x588] ss:$16 sps:$4 sm:$0xff]  }
 0x350   :  { %5692 = vmatpush1.bf16.msra.mxu0 %v7617_v34  ;;  %v7616_v34 = vld [vmem:[#allocation9 + $0x5ac] ss:$16 sps:$4 sm:$0xff]  }
 0x351   :  { %5790 = vmatpush1.bf16.msra.mxu1 %v7551_v36  ;;  %5693 = vmatprep.subr.bf16.mxu0 %v7625_v57  ;;  %v7614_v36 = vld [vmem:[#allocation9 + $0x5a8] ss:$16 sps:$4 sm:$0xff]   ;;  %v7622_v57 = vld [vmem:[#allocation9 + $0x5cc] ss:$16 sps:$4 sm:$0xff]  }
 0x352   :  { %5791 = vmatprep.subr.bf16.mxu1 %v7556_v38  ;;  %v7620_v38 = vld [vmem:[#allocation9 + $0x5c8] ss:$16 sps:$4 sm:$0xff]  }
 0x354   :  { %5694 = vmatpush1.bf16.msra.mxu0 %v7623_v56  ;;  %v7628_v56 = vld [vmem:[#allocation9 + $0x5ec] ss:$16 sps:$4 sm:$0xff]  }
 0x355   :  { %5792 = vmatpush1.bf16.msra.mxu1 %v7554_v3  ;;  %5695 = vmatprep.subr.bf16.mxu0 %v7631_v46  ;;  %v7626_v3 = vld [vmem:[#allocation9 + $0x5e8] ss:$16 sps:$4 sm:$0xff]   ;;  %v7634_v46 = vld [vmem:[#allocation9 + $0x60c] ss:$16 sps:$4 sm:$0xff]  }
 0x356   :  { %5802 = vmatprep.subr.bf16.mxu1 %v7559_v61  ;;  %v7632_v61 = vld [vmem:[#allocation9 + $0x608] ss:$16 sps:$4 sm:$0xff]  }
 0x358   :  { %5794 = vmatmul.mubr.bf16.vlgmr.msra.gmra.mrb[36].mxu1 %v8283_v2  ;;  %5696 = vmatpush1.bf16.msra.mxu0 %v7629_v9  ;;  %v7647_v2 = vld [vmem:[#allocation9 + $0x760] ss:$16 sps:$4 sm:$0xff]   ;;  %v7640_v9 = vld [vmem:[#allocation9 + $0x62c] ss:$16 sps:$4 sm:$0xff]  }
 0x359   :  { %5803 = vmatpush1.bf16.msra.mxu1 %v7557_v39  ;;  %5834 = vmatprep.mubr.bf16.mxu1 %v8314_v0  ;;  %v7659_v0 = vld [vmem:[#allocation9 + $0x7a0] ss:$16 sps:$4 sm:$0xff]   ;;  %v7638_v39 = vld [vmem:[#allocation9 + $0x628] ss:$16 sps:$4 sm:$0xff]  }
 0x35a   :  { %5804 = vmatprep.subr.bf16.mxu1 %v7562_v49  ;;  %5697 = vmatprep.subr.bf16.mxu0 %v7637_v5  ;;  %v7646_v49 = vld [vmem:[#allocation9 + $0x64c] ss:$16 sps:$4 sm:$0xff]   ;;  %v7644_v5 = vld [vmem:[#allocation9 + $0x648] ss:$16 sps:$4 sm:$0xff]  }
 0x35c   :  { %5698 = vmatpush1.bf16.msra.mxu0 %v7635_v58  ;;  %v7652_v58 = vld [vmem:[#allocation9 + $0x66c] ss:$16 sps:$4 sm:$0xff]  }
 0x35d   :  { %5805 = vmatpush1.bf16.msra.mxu1 %v7560_v40  ;;  %5699 = vmatprep.subr.bf16.mxu0 %v7643_v51  ;;  %v7650_v40 = vld [vmem:[#allocation9 + $0x668] ss:$16 sps:$4 sm:$0xff]   ;;  %v7658_v51 = vld [vmem:[#allocation9 + $0x68c] ss:$16 sps:$4 sm:$0xff]  }
 0x35e   :  { %5806 = vmatprep.subr.bf16.mxu1 %v7565_v53  ;;  %v7656_v53 = vld [vmem:[#allocation9 + $0x688] ss:$16 sps:$4 sm:$0xff]  }
 0x360   :  { %5700 = vmatpush1.bf16.msra.mxu0 %v7641_v54  ;;  %v165_v54 = vsub.s32 6, %v8223_v63 }
 0x361   :  { %5807 = vmatpush1.bf16.msra.mxu1 %v7563_v14  ;;  %5701 = vmatprep.subr.bf16.mxu0 %v7649_v12  ;;  %v7664_v14 = vld [vmem:[#allocation9 + $0x6ac] ss:$16 sps:$4 sm:$0xff]   ;;  %v7662_v12 = vld [vmem:[#allocation9 + $0x6a8] ss:$16 sps:$4 sm:$0xff]  }
 0x362   :  { %5808 = vmatprep.subr.bf16.mxu1 %v7568_v37  ;;  %v166_v37 = vrot.slane %v8304_v41, %v165_v54  ;;  %v7733_v54 = vld [vmem:[#allocation12 + $0xa4] ss:$8 sps:$4 sm:$0xff]  }
 0x364   :  { %5702 = vmatpush1.bf16.msra.mxu0 %v7647_v2  ;;  %v7670_v2 = vld [vmem:[#allocation9 + $0x6cc] ss:$16 sps:$4 sm:$0xff]  }
 0x365   :  { %5809 = vmatpush1.bf16.msra.mxu1 %v7566_v55  ;;  %5703 = vmatprep.subr.bf16.mxu0 %v7655_v59 }
 0x366   :  { %5810 = vmatprep.subr.bf16.mxu1 %v7571_v62 }
 0x368   :  { %5704 = vmatpush1.bf16.msra.mxu0 %v7653_v60 }
 0x369   :  { %5811 = vmatpush1.bf16.msra.mxu1 %v7569_v4  ;;  %5705 = vmatprep.subr.bf16.mxu0 %v7661_v33 }
 0x36a   :  { %5812 = vmatprep.subr.bf16.mxu1 %v7574_v45  ;;  %v7668_v45 = vld [vmem:[#allocation9 + $0x6c8] ss:$16 sps:$4 sm:$0xff]  }
 0x36b   :  { %v3850_v10 = vpop.f32.mrb[28].mxu1 }
 0x36c   :  { %v3851_v35 = vadd.f32 %v3850_v10, %v8289_v17  ;;  %v3852_v13 = vpop.f32.mrb[29].mxu1  ;;  %5706 = vmatpush1.bf16.msra.mxu0 %v7659_v0  ;;  %v7671_v17 = vld [vmem:[#allocation9 + $0x7e0] ss:$16 sps:$4 sm:$0xff]  }
 0x36d   :  { %v3853_v42 = vadd.f32 %v3852_v13, %v8292_v43  ;;  %v3854_v52 = vpop.f32.mrb[30].mxu1  ;;  %5813 = vmatpush1.bf16.msra.mxu1 %v7572_v22  ;;  %5707 = vmatprep.subr.bf16.mxu0 %v7667_v7  ;;  %v7703_v43 = vld [vmem:[#allocation12 + $0x4] ss:$8 sps:$4 sm:$0xff]   ;;  %v7676_v7 = vld [vmem:[#allocation9 + $0x6ec] ss:$16 sps:$4 sm:$0xff]  }
 0x36e   :  { %v8325_v1 = vadd.f32 %v8309_v50, %v3851_v35  ;;  %v3855_v18 = vpop.f32.mrb[31].mxu1  ;;  %5814 = vmatprep.subr.bf16.mxu1 %v7577_v8  ;;  %v7592_v50 = vld [vmem:[#allocation9 + $0x52c] ss:$16 sps:$4 sm:$0xff]   ;;  %v7674_v13 = vld [vmem:[#allocation9 + $0x6e8] ss:$16 sps:$4 sm:$0xff]  }
 0x36f   :  { %v8328_v20 = vadd.f32 %v8312_v48, %v3853_v42  ;;  %v7596_v48 = vld [vmem:[#allocation9 + $0x548] ss:$16 sps:$4 sm:$0xff]   ;;  %v7679_v42 = vld [vmem:[#allocation9 + $0x70c] ss:$16 sps:$4 sm:$0xff]  }
 0x370   :  { %5708 = vmatpush1.bf16.msra.mxu0 %v7665_v15  ;;  %v7706_v18 = vld [vmem:[#allocation12 + $0x14] ss:$8 sps:$4 sm:$0xff]  }
 0x371   :  { %5815 = vmatpush1.bf16.msra.mxu1 %v7575_v16  ;;  %5709 = vmatprep.subr.bf16.mxu0 %v7673_v28  ;;  %v7701_v16 = vld [vmem:[#allocation12] ss:$8 sps:$4 sm:$0xff]  }
 0x372   :  { %5816 = vmatprep.subr.bf16.mxu1 %v7580_v19  ;;  %v7682_v19 = vld [vmem:[#allocation9 + $0x72c] ss:$16 sps:$4 sm:$0xff]  }
 0x374   :  { %5710 = vmatpush1.bf16.msra.mxu0 %v7671_v17  ;;  %v7680_v17 = vld [vmem:[#allocation9 + $0x728] ss:$16 sps:$4 sm:$0xff]  }
 0x375   :  { %5817 = vmatpush1.bf16.msra.mxu1 %v7578_v44  ;;  %6296 = vmatprep.subr.bf16.mxu0 %v7703_v43  ;;  %v7709_v44 = vld [vmem:[#allocation12 + $0x24] ss:$8 sps:$4 sm:$0xff]   ;;  %v7685_v43 = vld [vmem:[#allocation9 + $0x74c] ss:$16 sps:$4 sm:$0xff]  }
 0x376   :  { %5818 = vmatprep.subr.bf16.mxu1 %v7586_v21  ;;  %v7707_v21 = vld [vmem:[#allocation12 + $0x20] ss:$8 sps:$4 sm:$0xff]  }
 0x379   :  { %5819 = vmatpush1.bf16.msra.mxu1 %v7584_v47  ;;  %v7683_v47 = vld [vmem:[#allocation9 + $0x748] ss:$16 sps:$4 sm:$0xff]  }
 0x37a   :  { %5820 = vmatprep.subr.bf16.mxu1 %v7592_v50  ;;  %v7712_v50 = vld [vmem:[#allocation12 + $0x34] ss:$8 sps:$4 sm:$0xff]  }
 0x37d   :  { %5821 = vmatpush1.bf16.msra.mxu1 %v7590_v24  ;;  %v7688_v24 = vld [vmem:[#allocation9 + $0x76c] ss:$16 sps:$4 sm:$0xff]  }
 0x37e   :  { %5822 = vmatprep.subr.bf16.mxu1 %v7598_v26  ;;  %v7710_v26 = vld [vmem:[#allocation12 + $0x30] ss:$8 sps:$4 sm:$0xff]  }
 0x381   :  { %5823 = vmatpush1.bf16.msra.mxu1 %v7596_v48  ;;  %v7686_v48 = vld [vmem:[#allocation9 + $0x768] ss:$16 sps:$4 sm:$0xff]  }
 0x382   :  { %5824 = vmatprep.subr.bf16.mxu1 %v7604_v27  ;;  %v7715_v27 = vld [vmem:[#allocation12 + $0x44] ss:$8 sps:$4 sm:$0xff]  }
 0x385   :  { %5825 = vmatpush1.bf16.msra.mxu1 %v7602_v29  ;;  %v7691_v29 = vld [vmem:[#allocation9 + $0x78c] ss:$16 sps:$4 sm:$0xff]  }
 0x386   :  { %5826 = vmatprep.subr.bf16.mxu1 %v7610_v30  ;;  %v7713_v30 = vld [vmem:[#allocation12 + $0x40] ss:$8 sps:$4 sm:$0xff]  }
 0x389   :  { %5827 = vmatpush1.bf16.msra.mxu1 %v7608_v31  ;;  %v7689_v31 = vld [vmem:[#allocation9 + $0x788] ss:$16 sps:$4 sm:$0xff]  }
 0x38a   :  { %5828 = vmatprep.subr.bf16.mxu1 %v7616_v34  ;;  %v7718_v34 = vld [vmem:[#allocation12 + $0x54] ss:$8 sps:$4 sm:$0xff]  }
 0x38d   :  { %5829 = vmatpush1.bf16.msra.mxu1 %v7614_v36  ;;  %v7694_v36 = vld [vmem:[#allocation9 + $0x7ac] ss:$16 sps:$4 sm:$0xff]  }
 0x38e   :  { %5830 = vmatprep.subr.bf16.mxu1 %v7622_v57  ;;  %v7716_v57 = vld [vmem:[#allocation12 + $0x50] ss:$8 sps:$4 sm:$0xff]  }
 0x391   :  { %5831 = vmatpush1.bf16.msra.mxu1 %v7620_v38  ;;  %v7692_v38 = vld [vmem:[#allocation9 + $0x7a8] ss:$16 sps:$4 sm:$0xff]  }
 0x392   :  { %5832 = vmatprep.subr.bf16.mxu1 %v7628_v56  ;;  %v7721_v56 = vld [vmem:[#allocation12 + $0x64] ss:$8 sps:$4 sm:$0xff]  }
 0x395   :  { %5833 = vmatpush1.bf16.msra.mxu1 %v7626_v3  ;;  %v7697_v3 = vld [vmem:[#allocation9 + $0x7cc] ss:$16 sps:$4 sm:$0xff]  }
 0x396   :  { %5843 = vmatprep.subr.bf16.mxu1 %v7634_v46  ;;  %v7719_v46 = vld [vmem:[#allocation12 + $0x60] ss:$8 sps:$4 sm:$0xff]  }
 0x398   :  { %5835 = vmatmul.mubr.bf16.vlgmr.msra.gmra.mrb[36].mxu1 %v8316_v6  ;;  %v169_v6 = vsub.s32 7, %v8223_v63 }
 0x399   :  { %5844 = vmatpush1.bf16.msra.mxu1 %v7632_v61  ;;  %v7695_v61 = vld [vmem:[#allocation9 + $0x7c8] ss:$16 sps:$4 sm:$0xff]  }
 0x39a   :  { %5845 = vmatprep.subr.bf16.mxu1 %v7640_v9  ;;  %v170_v59 = vrot.slane %v8304_v41, %v169_v6  ;;  %v7724_v9 = vld [vmem:[#allocation12 + $0x74] ss:$8 sps:$4 sm:$0xff]  }
 0x39b   :  { %v7736_v6 = vld [vmem:[#allocation12 + $0xb4] ss:$8 sps:$4 sm:$0xff]  }
 0x39d   :  { %5846 = vmatpush1.bf16.msra.mxu1 %v7638_v39  ;;  %v7700_v39 = vld [vmem:[#allocation9 + $0x7ec] ss:$16 sps:$4 sm:$0xff]  }
 0x39e   :  { %5847 = vmatprep.subr.bf16.mxu1 %v7646_v49  ;;  %v7722_v49 = vld [vmem:[#allocation12 + $0x70] ss:$8 sps:$4 sm:$0xff]  }
 0x3a1   :  { %5848 = vmatpush1.bf16.msra.mxu1 %v7644_v5  ;;  %v7698_v5 = vld [vmem:[#allocation9 + $0x7e8] ss:$16 sps:$4 sm:$0xff]  }
 0x3a2   :  { %5849 = vmatprep.subr.bf16.mxu1 %v7652_v58  ;;  %v7727_v58 = vld [vmem:[#allocation12 + $0x84] ss:$8 sps:$4 sm:$0xff]  }
 0x3a5   :  { %5850 = vmatpush1.bf16.msra.mxu1 %v7650_v40  ;;  %v7725_v40 = vld [vmem:[#allocation12 + $0x80] ss:$8 sps:$4 sm:$0xff]  }
 0x3a6   :  { %5851 = vmatprep.subr.bf16.mxu1 %v7658_v51  ;;  %v7730_v51 = vld [vmem:[#allocation12 + $0x94] ss:$8 sps:$4 sm:$0xff]  }
 0x3a9   :  { %5852 = vmatpush1.bf16.msra.mxu1 %v7656_v53  ;;  %v7728_v53 = vld [vmem:[#allocation12 + $0x90] ss:$8 sps:$4 sm:$0xff]  }
 0x3aa   :  { %5853 = vmatprep.subr.bf16.mxu1 %v7664_v14  ;;  %v7731_v14 = vld [vmem:[#allocation12 + $0xa0] ss:$8 sps:$4 sm:$0xff]  }
 0x3ab   :  { %v3932_v55 = vpop.f32.mrb[32].mxu1 }
 0x3ac   :  { %v3933_v62 = vadd.f32 %v3932_v55, %v8325_v1  ;;  %v3934_v60 = vpop.f32.mrb[33].mxu1  ;;  %v7677_v1 = vld [vmem:[#allocation9 + $0x708] ss:$16 sps:$4 sm:$0xff]  }
 0x3ad   :  { %v3935_v4 = vadd.f32 %v3934_v60, %v8328_v20  ;;  %v3936_v33 = vpop.f32.mrb[34].mxu1  ;;  %5854 = vmatpush1.bf16.msra.mxu1 %v7662_v12  ;;  %v7704_v20 = vld [vmem:[#allocation12 + $0x10] ss:$8 sps:$4 sm:$0xff]   ;;  %v7742_v55 = vld [vmem:[#allocation12 + $0xd4] ss:$8 sps:$4 sm:$0xff]  }
 0x3ae   :  { %v3945_v0 = vadd.f32 %v3933_v62, %v166_v37  ;;  %v3937_v22 = vpop.f32.mrb[35].mxu1  ;;  %5855 = vmatprep.subr.bf16.mxu1 %v7670_v2  ;;  %v7734_v12 = vld [vmem:[#allocation12 + $0xb0] ss:$8 sps:$4 sm:$0xff]   ;;  %v7739_v37 = vld [vmem:[#allocation12 + $0xc4] ss:$8 sps:$4 sm:$0xff]  }
 0x3af   :  { %v3946_v8 = vadd.f32 %v3935_v4, %v170_v59  ;;  %v7737_v2 = vld [vmem:[#allocation12 + $0xc0] ss:$8 sps:$4 sm:$0xff]   ;;  %v7740_v59 = vld [vmem:[#allocation12 + $0xd0] ss:$8 sps:$4 sm:$0xff]   ;;  %v7745_v62 = vld [vmem:[#allocation12 + $0xe4] ss:$8 sps:$4 sm:$0xff]  }
 0x3b0   :  { %vm3972_vm6 = vcmp.gt.f32.partialorder %v3945_v0, 0.0  ;;  %v3980_v10 = vmul.f32 0.2, %v3945_v0  ;;  %v7743_v60 = vld [vmem:[#allocation12 + $0xe0] ss:$8 sps:$4 sm:$0xff]  }
 0x3b1   :  { %v3981_v35 = vmul.f32 0.2, %v3946_v8  ;;  %5856 = vmatpush1.bf16.msra.mxu1 %v7668_v45  ;;  %vm3973_vm7 = vcmp.gt.f32.partialorder %v3946_v8, 0.0  ;;  %v7748_v4 = vld [vmem:[#allocation12 + $0xf4] ss:$8 sps:$4 sm:$0xff]  }
 0x3b2   :  { %v3988_v41 = vsel %vm3972_vm6, %v3945_v0, %v3980_v10  ;;  %5857 = vmatprep.subr.bf16.mxu1 %v7676_v7  ;;  %v7746_v33 = vld [vmem:[#allocation12 + $0xf0] ss:$8 sps:$4 sm:$0xff]   ;;  %v7751_v45 = vld [vmem:[#allocation12 + $0x104] ss:$8 sps:$4 sm:$0xff]   ;;  %v8341_v0 = vld [vmem:[#allocation11] sm:$0xf] }
 0x3b3   :  { %v3989_v15 = vsel %vm3973_vm7, %v3946_v8, %v3981_v35  ;;  %v8337_v28 = vpack.c.bf16 %v3988_v41, %v3988_v41  ;;  %v4259_v22 = vrot.slane %v8341_v0, %v8252_v23  ;;  %v4263_v7 = vrot.slane %v8341_v0, %v8226_v11 }
 0x3b4   :  { %v3997_v52 = vpack.c.bf16 %v3989_v15, %v3989_v15 }
 0x3b5   :  { %5858 = vmatpush1.bf16.msra.mxu1 %v7674_v13 }
 0x3b6   :  { %5711 = vmatprep.mubr.bf16.mxu0 %v3997_v52  ;;  %5875 = vmatprep.mubr.bf16.mxu1 %v3997_v52 }
 0x3b7   :  { %5712 = vmatmul.mubr.bf16.vlgmr.msra.gmra.mrb[28].mxu0 %v8337_v28  ;;  %5859 = vmatprep.subr.bf16.mxu1 %v7679_v42 }
 0x3b8   :  { %6297 = vmatpush1.bf16.msra.mxu0 %v7701_v16 }
 0x3b9   :  { %5860 = vmatpush1.bf16.msra.mxu1 %v7677_v1  ;;  %6298 = vmatprep.subr.bf16.mxu0 %v7706_v18  ;;  %v7749_v18 = vld [vmem:[#allocation12 + $0x100] ss:$8 sps:$4 sm:$0xff]  }
 0x3ba   :  { %5861 = vmatprep.subr.bf16.mxu1 %v7682_v19 }
 0x3bc   :  { %6299 = vmatpush1.bf16.msra.mxu0 %v7704_v20  ;;  %v7754_v20 = vld [vmem:[#allocation12 + $0x114] ss:$8 sps:$4 sm:$0xff]  }
 0x3bd   :  { %5862 = vmatpush1.bf16.msra.mxu1 %v7680_v17  ;;  %6300 = vmatprep.subr.bf16.mxu0 %v7709_v44  ;;  %v7752_v17 = vld [vmem:[#allocation12 + $0x110] ss:$8 sps:$4 sm:$0xff]   ;;  %v7757_v44 = vld [vmem:[#allocation12 + $0x124] ss:$8 sps:$4 sm:$0xff]  }
 0x3be   :  { %5863 = vmatprep.subr.bf16.mxu1 %v7685_v43  ;;  %v7755_v43 = vld [vmem:[#allocation12 + $0x120] ss:$8 sps:$4 sm:$0xff]  }
 0x3c0   :  { %6301 = vmatpush1.bf16.msra.mxu0 %v7707_v21  ;;  %v7760_v21 = vld [vmem:[#allocation12 + $0x134] ss:$8 sps:$4 sm:$0xff]  }
 0x3c1   :  { %5864 = vmatpush1.bf16.msra.mxu1 %v7683_v47  ;;  %6302 = vmatprep.subr.bf16.mxu0 %v7712_v50  ;;  %v7758_v47 = vld [vmem:[#allocation12 + $0x130] ss:$8 sps:$4 sm:$0xff]   ;;  %v7763_v50 = vld [vmem:[#allocation12 + $0x144] ss:$8 sps:$4 sm:$0xff]  }
 0x3c2   :  { %5865 = vmatprep.subr.bf16.mxu1 %v7688_v24  ;;  %v7761_v24 = vld [vmem:[#allocation12 + $0x140] ss:$8 sps:$4 sm:$0xff]  }
 0x3c4   :  { %6303 = vmatpush1.bf16.msra.mxu0 %v7710_v26  ;;  %v7766_v26 = vld [vmem:[#allocation12 + $0x154] ss:$8 sps:$4 sm:$0xff]  }
 0x3c5   :  { %5866 = vmatpush1.bf16.msra.mxu1 %v7686_v48  ;;  %6304 = vmatprep.subr.bf16.mxu0 %v7715_v27  ;;  %v7764_v48 = vld [vmem:[#allocation12 + $0x150] ss:$8 sps:$4 sm:$0xff]   ;;  %v7769_v27 = vld [vmem:[#allocation12 + $0x164] ss:$8 sps:$4 sm:$0xff]  }
 0x3c6   :  { %5867 = vmatprep.subr.bf16.mxu1 %v7691_v29  ;;  %v7767_v29 = vld [vmem:[#allocation12 + $0x160] ss:$8 sps:$4 sm:$0xff]  }
 0x3c8   :  { %6305 = vmatpush1.bf16.msra.mxu0 %v7713_v30  ;;  %v4271_v30 = vrot.slane %v8341_v0, %v153_v25  ;;  %v7776_v25 = vld [vmem:[#allocation12 + $0x190] ss:$8 sps:$4 sm:$0xff]  }
 0x3c9   :  { %5868 = vmatpush1.bf16.msra.mxu1 %v7689_v31  ;;  %6306 = vmatprep.subr.bf16.mxu0 %v7718_v34  ;;  %v7772_v31 = vld [vmem:[#allocation12 + $0x174] ss:$8 sps:$4 sm:$0xff]  }
 0x3ca   :  { %5869 = vmatprep.subr.bf16.mxu1 %v7694_v36 }
 0x3cc   :  { %6307 = vmatpush1.bf16.msra.mxu0 %v7716_v57 }
 0x3cd   :  { %5870 = vmatpush1.bf16.msra.mxu1 %v7692_v38  ;;  %6308 = vmatprep.subr.bf16.mxu0 %v7721_v56  ;;  %v7770_v56 = vld [vmem:[#allocation12 + $0x170] ss:$8 sps:$4 sm:$0xff]  }
 0x3ce   :  { %5871 = vmatprep.subr.bf16.mxu1 %v7697_v3 }
 0x3d0   :  { %6309 = vmatpush1.bf16.msra.mxu0 %v7719_v46  ;;  %v7775_v46 = vld [vmem:[#allocation12 + $0x184] ss:$8 sps:$4 sm:$0xff]  }
 0x3d1   :  { %5872 = vmatpush1.bf16.msra.mxu1 %v7695_v61  ;;  %6310 = vmatprep.subr.bf16.mxu0 %v7724_v9  ;;  %v7773_v9 = vld [vmem:[#allocation12 + $0x180] ss:$8 sps:$4 sm:$0xff]  }
 0x3d2   :  { %5873 = vmatprep.subr.bf16.mxu1 %v7700_v39 }
 0x3d4   :  { %6311 = vmatpush1.bf16.msra.mxu0 %v7722_v49  ;;  %v7778_v49 = vld [vmem:[#allocation12 + $0x194] ss:$8 sps:$4 sm:$0xff]  }
 0x3d5   :  { %5874 = vmatpush1.bf16.msra.mxu1 %v7698_v5  ;;  %6312 = vmatprep.subr.bf16.mxu0 %v7727_v58  ;;  %v7781_v5 = vld [vmem:[#allocation12 + $0x1a4] ss:$8 sps:$4 sm:$0xff]   ;;  %v7779_v58 = vld [vmem:[#allocation12 + $0x1a0] ss:$8 sps:$4 sm:$0xff]  }
 0x3d8   :  { %5876 = vmatmul.mubr.bf16.vlgmr.msra.gmra.mrb[36].mxu1 %v8337_v28  ;;  %6313 = vmatpush1.bf16.msra.mxu0 %v7725_v40  ;;  %v7784_v40 = vld [vmem:[#allocation12 + $0x1b4] ss:$8 sps:$4 sm:$0xff]  }
 0x3d9   :  { %6314 = vmatprep.subr.bf16.mxu0 %v7730_v51  ;;  %v7782_v51 = vld [vmem:[#allocation12 + $0x1b0] ss:$8 sps:$4 sm:$0xff]  }
 0x3dc   :  { %6315 = vmatpush1.bf16.msra.mxu0 %v7728_v53  ;;  %v7787_v53 = vld [vmem:[#allocation12 + $0x1c4] ss:$8 sps:$4 sm:$0xff]  }
 0x3dd   :  { %6316 = vmatprep.subr.bf16.mxu0 %v7733_v54  ;;  %v7785_v54 = vld [vmem:[#allocation12 + $0x1c0] ss:$8 sps:$4 sm:$0xff]  }
 0x3e0   :  { %6317 = vmatpush1.bf16.msra.mxu0 %v7731_v14  ;;  %v7790_v14 = vld [vmem:[#allocation12 + $0x1d4] ss:$8 sps:$4 sm:$0xff]  }
 0x3e1   :  { %6318 = vmatprep.subr.bf16.mxu0 %v7736_v6  ;;  %v4267_v6 = vrot.slane %v8341_v0, %v8278_v32  ;;  %v5964_v0 = vld [vmem:[#allocation14] sm:$0x3] }
 0x3e4   :  { %6319 = vmatpush1.bf16.msra.mxu0 %v7734_v12  ;;  %v7788_v12 = vld [vmem:[#allocation12 + $0x1d0] ss:$8 sps:$4 sm:$0xff]  }
 0x3e5   :  { %6320 = vmatprep.subr.bf16.mxu0 %v7739_v37  ;;  %v7793_v37 = vld [vmem:[#allocation12 + $0x1e4] ss:$8 sps:$4 sm:$0xff]  }
 0x3e8   :  { %6321 = vmatpush1.bf16.msra.mxu0 %v7737_v2 }
 0x3e9   :  { %6322 = vmatprep.subr.bf16.mxu0 %v7742_v55  ;;  %v7791_v55 = vld [vmem:[#allocation12 + $0x1e0] ss:$8 sps:$4 sm:$0xff]  }
 0x3ec   :  { %6323 = vmatpush1.bf16.msra.mxu0 %v7740_v59  ;;  %v7796_v59 = vld [vmem:[#allocation12 + $0x1f4] ss:$8 sps:$4 sm:$0xff]  }
 0x3ed   :  { %6324 = vmatprep.subr.bf16.mxu0 %v7745_v62 }
 0x3f0   :  { %6325 = vmatpush1.bf16.msra.mxu0 %v7743_v60  ;;  %v7794_v60 = vld [vmem:[#allocation12 + $0x1f0] ss:$8 sps:$4 sm:$0xff]  }
 0x3f1   :  { %6326 = vmatprep.subr.bf16.mxu0 %v7748_v4 }
 0x3f4   :  { %6327 = vmatpush1.bf16.msra.mxu0 %v7746_v33 }
 0x3f5   :  { %6337 = vmatprep.subr.bf16.mxu0 %v7751_v45  ;;  %v6384_v45 = vld [vmem:[#allocation15] sm:$0x3] }
 0x48a   :  { %v5713_v8 = vpop.f32.mrb[28].mxu0 }
 0x48b   :  { %v7269_v10 = vadd.f32 %v5713_v8, %v4259_v22  ;;  %v5715_v35 = vpop.f32.mrb[29].mxu0  ;;  %v6385_v22 = vunpack.c.l.bf16 %v6384_v45  ;;  %v5973_v8 = vrot.slane %v5964_v0, %v8226_v11 }
 0x48c   :  { %v7270_v13 = vadd.f32 %v5715_v35, %v4263_v7  ;;  %v5717_v41 = vpop.f32.mrb[30].mxu0  ;;  %v5969_v7 = vrot.slane %v5964_v0, %v8252_v23 }
 0x48d   :  { %vm5884_vm8 = vcmp.gt.f32.partialorder %v7269_v10, 0.0  ;;  %v5888_v15 = vmul.f32 0.2, %v7269_v10  ;;  %v5718_v42 = vpop.f32.mrb[31].mxu0  ;;  %v6394_v35 = vrot.slane %v6385_v22, %v8278_v32  ;;  %v7267_v32 = vld [vmem:[#allocation3] ss:$0 sm:$0xff] }
 0x48e   :  { %vm5885_vm9 = vcmp.gt.f32.partialorder %v7270_v13, 0.0  ;;  %v5889_v52 = vmul.f32 0.2, %v7270_v13 }
 0x48f   :  { %v5892_v16 = vsel %vm5884_vm8, %v7269_v10, %v5888_v15  ;;  %v6390_v10 = vrot.slane %v6385_v22, %v8252_v23 }
 0x490   :  { %v5893_v28 = vsel %vm5885_vm9, %v7270_v13, %v5889_v52  ;;  %v5896_v19 = vpack.c.bf16 %v5892_v16, %v5892_v16 }
 0x491   :  { %v5897_v1 = vpack.c.bf16 %v5893_v28, %v5893_v28  ;;  %v6400_v16 = vrot.slane %v6390_v10, %v8252_v23 }
 0x493   :  { %6328 = vmatprep.mubr.bf16.mxu0 %v5897_v1 }
 0x494   :  { %6329 = vmatmul.mubr.bf16.vlgmr.msra.gmra.mrb[32].mxu0 %v5896_v19 }
 0x495   :  { %6338 = vmatpush1.bf16.msra.mxu0 %v7749_v18  ;;  %v6404_v18 = vrot.slane %v6394_v35, %v8252_v23 }
 0x496   :  { %6339 = vmatprep.subr.bf16.mxu0 %v7754_v20 }
 0x499   :  { %6340 = vmatpush1.bf16.msra.mxu0 %v7752_v17 }
 0x49a   :  { %6341 = vmatprep.subr.bf16.mxu0 %v7757_v44 }
 0x49d   :  { %6342 = vmatpush1.bf16.msra.mxu0 %v7755_v43 }
 0x49e   :  { %6343 = vmatprep.subr.bf16.mxu0 %v7760_v21 }
 0x4a1   :  { %6344 = vmatpush1.bf16.msra.mxu0 %v7758_v47 }
 0x4a2   :  { %6345 = vmatprep.subr.bf16.mxu0 %v7763_v50 }
 0x4a5   :  { %6346 = vmatpush1.bf16.msra.mxu0 %v7761_v24 }
 0x4a6   :  { %6347 = vmatprep.subr.bf16.mxu0 %v7766_v26 }
 0x4a9   :  { %6348 = vmatpush1.bf16.msra.mxu0 %v7764_v48 }
 0x4aa   :  { %6349 = vmatprep.subr.bf16.mxu0 %v7769_v27 }
 0x4ab   :  { %v5877_v34 = vpop.f32.mrb[36].mxu1 }
 0x4ac   :  { %v5879_v36 = vpop.f32.mrb[37].mxu1  ;;  %v7271_v2 = vadd.f32 %v5877_v34, %v4267_v6 }
 0x4ad   :  { %v7272_v57 = vadd.f32 %v5879_v36, %v4271_v30  ;;  %6350 = vmatpush1.bf16.msra.mxu0 %v7767_v29  ;;  %v5881_v38 = vpop.f32.mrb[38].mxu1 }
 0x4ae   :  { %v5882_v3 = vpop.f32.mrb[39].mxu1  ;;  %6351 = vmatprep.subr.bf16.mxu0 %v7772_v31  ;;  %v5890_v62 = vmul.f32 0.2, %v7271_v2  ;;  %vm5886_vm11 = vcmp.gt.f32.partialorder %v7271_v2, 0.0 }
 0x4af   :  { %vm5887_vm10 = vcmp.gt.f32.partialorder %v7272_v57, 0.0  ;;  %v5891_v61 = vmul.f32 0.2, %v7272_v57 }
 0x4b0   :  { %v5894_v4 = vsel %vm5886_vm11, %v7271_v2, %v5890_v62 }
 0x4b1   :  { %6352 = vmatpush1.bf16.msra.mxu0 %v7770_v56  ;;  %v5895_v39 = vsel %vm5887_vm10, %v7272_v57, %v5891_v61  ;;  %v5898_v33 = vpack.c.bf16 %v5894_v4, %v5894_v4 }
 0x4b2   :  { %6353 = vmatprep.subr.bf16.mxu0 %v7775_v46  ;;  %v5899_v63 = vpack.c.bf16 %v5895_v39, %v5895_v39 }
 0x4b4   :  { %6369 = vmatprep.mubr.bf16.mxu0 %v5899_v63 }
 0x4b5   :  { %6354 = vmatpush1.bf16.msra.mxu0 %v7773_v9 }
 0x4b6   :  { %6355 = vmatprep.subr.bf16.mxu0 %v7778_v49 }
 0x4b9   :  { %6356 = vmatpush1.bf16.msra.mxu0 %v7776_v25 }
 0x4ba   :  { %6357 = vmatprep.subr.bf16.mxu0 %v7781_v5 }
 0x4bd   :  { %6358 = vmatpush1.bf16.msra.mxu0 %v7779_v58 }
 0x4be   :  { %6359 = vmatprep.subr.bf16.mxu0 %v7784_v40 }
 0x4c1   :  { %6360 = vmatpush1.bf16.msra.mxu0 %v7782_v51 }
 0x4c2   :  { %6361 = vmatprep.subr.bf16.mxu0 %v7787_v53 }
 0x4c5   :  { %6362 = vmatpush1.bf16.msra.mxu0 %v7785_v54 }
 0x4c6   :  { %6363 = vmatprep.subr.bf16.mxu0 %v7790_v14 }
 0x4c9   :  { %6364 = vmatpush1.bf16.msra.mxu0 %v7788_v12 }
 0x4ca   :  { %6365 = vmatprep.subr.bf16.mxu0 %v7793_v37 }
 0x4cd   :  { %6366 = vmatpush1.bf16.msra.mxu0 %v7791_v55 }
 0x4ce   :  { %6367 = vmatprep.subr.bf16.mxu0 %v7796_v59 }
 0x4d1   :  { %6368 = vmatpush1.bf16.msra.mxu0 %v7794_v60 }
 0x4d4   :  { %6370 = vmatmul.mubr.bf16.vlgmr.msra.gmra.mrb[32].mxu0 %v5898_v33 }
 0x5a7   :  { %v6371_v13 = vpop.f32.mrb[32].mxu0 }
 0x5a8   :  { %v7273_v41 = vadd.f32 %v6371_v13, %v5969_v7  ;;  %v6373_v15 = vpop.f32.mrb[33].mxu0 }
 0x5a9   :  { %v7274_v42 = vadd.f32 %v6373_v15, %v5973_v8  ;;  %v6375_v52 = vpop.f32.mrb[34].mxu0 }
 0x5aa   :  { %vm6378_vm12 = vcmp.gt.f32.partialorder %v7273_v41, 0.0  ;;  %v6380_v28 = vmul.f32 0.2, %v7273_v41  ;;  %v6376_v1 = vpop.f32.mrb[35].mxu0 }
 0x5ab   :  { %vm6379_vm13 = vcmp.gt.f32.partialorder %v7274_v42, 0.0  ;;  %v6381_v19 = vmul.f32 0.2, %v7274_v42 }
 0x5ac   :  { %v6382_v20 = vsel %vm6378_vm12, %v7273_v41, %v6380_v28 }
 0x5ad   :  { %v6383_v11 = vsel %vm6379_vm13, %v7274_v42, %v6381_v19  ;;  %v6405_v17 = vmul.f32 %v6400_v16, %v6382_v20 }
 0x5ae   :  { %v6406_v44 = vmul.f32 %v6404_v18, %v6383_v11 }
 0x5b0   :  { %v6407_v43 = vadd.f32 %v6406_v44, %v6405_v17 }
 0x5b2   :  { %6408 = vadd.xlane.f32.xlu0 %v6407_v43 }
 0x63f   :  { %v6409_v21 = vpop.xlane.xlu0 %6408 }
 0x640   :  { %v6417_v47 = vadd.f32 %v7267_v32, %v6409_v21 }
 0x642   :  { %v7268_v50 = vmul.f32 -1.442695, %v6417_v47 }
 0x644   :  { %7797 = vpow2.f32 %v7268_v50 }
 0x64e   :  { %v7798_v24 = vpop.eup %7797 }
 0x64f   :  { %v6421_v26 = vadd.f32 1.0, %v7798_v24 }
 0x651   :  { %7799 = vrcp.f32 %v6421_v26 }
 0x65b   :  { %v7800_v48 = vpop.eup %7799 }
 0x65c   :  { %6425 = vst.msk [vmem:[%s8370_s9] sm:$0xff] %vm6424_vm14, %v7800_v48 }
 0x65d   :  { %6430 = vsyncpa [#allocation5], 1 }
 0x65e   :  { %6431 = vsyncpa [#allocation7], 1 }
 0x65f   :  { %6432 = vsyncpa [#allocation10], 1 }
 0x660   :  { %6433 = vsyncpa [#allocation13], 1 }
 0x661   :  { %6434 = vsyncpa [#allocation16], 1 }

</bundles_post_ra>
